<compile_context>
chip_gen: v7x
topology: tpu7x:2x2x1
jax: 0.10.0
libtpu: 0.0.40
codegen_flags: <defaults>
</compile_context>

<pallas_src>
import functools

import jax
import jax.numpy as jnp
from jax import lax
from jax.experimental import pallas as pl
from jax.experimental.pallas import tpu as pltpu

EPS = 1e-5  # torch.nn.LayerNorm default


def _expand_norm_shuffle_kernel(x_ref, w_ref, sum_ref, bcastg_ref, beta_ref,
                                o_ref, *, dim, dim_scale, rows, width):
    """One grid step: `rows` rows of the flat (B*H) axis (= rows*width tokens).

    x_ref      : (rows*width, dim)          input tokens
    w_ref      : (dim, 16*dim)              expand weight, (in, out) layout
    sum_ref    : (16*dim, 16)               block-diagonal mean weights (1/dim)
    bcastg_ref : (16, 16*dim)               chunk->flat broadcast, gamma folded
    beta_ref   : (1, 16*dim)                LayerNorm beta, tiled 16x, f32
    o_ref      : (rows, ds, width, ds*dim)  pixel-shuffled output block
    """
    ds = dim_scale
    cs = ds * dim  # lane width of one p1-slab (covers the (p2, c) channels)

    # Expansion: one lane-dense MXU matmul for all 16 chunks at once.
    y = jnp.dot(x_ref[...], w_ref[...],
                preferred_element_type=jnp.float32)              # (T, 16*dim) f32

    # Per-chunk LayerNorm statistics, kept lane-dense.  Both reductions depend
    # only on y (E[y^2] - mean^2 form) so the two sum-matmuls can issue
    # back-to-back; the broadcasts back to the flat layout reuse one
    # gamma-scaled indicator matrix.  All this extra MXU work hides under the
    # store-bound pipeline.
    mean16 = jnp.dot(y, sum_ref[...], preferred_element_type=jnp.float32)
    msq16 = jnp.dot(y * y, sum_ref[...], preferred_element_type=jnp.float32)
    var16 = jnp.maximum(msq16 - mean16 * mean16, 0.0)
    rstd16 = lax.rsqrt(var16 + EPS)
    # gamma*rstd and gamma*rstd*mean, broadcast to the flat (T, 16*dim) layout.
    scale_f = jnp.dot(rstd16, bcastg_ref[...],
                      preferred_element_type=jnp.float32)
    shift_f = jnp.dot(mean16 * rstd16, bcastg_ref[...],
                      preferred_element_type=jnp.float32)
    out = (y * scale_f - shift_f + beta_ref[...]).astype(o_ref.dtype)

    # Fused pixel shuffle: chunk (p1, p2), channel c of token (r, w) goes to
    # o_ref[r, p1, w, p2*dim + c].  Each slab is a lane-aligned column slice
    # (cs = 4*dim) and a layout-preserving (T, cs) -> (rows, width, cs) view
    # when width is a multiple of the sublane granule; all ds stores are
    # full-lane-width (unmasked).
    for p1 in range(ds):
        slab = out[:, p1 * cs:(p1 + 1) * cs]                     # (T, ds*dim)
        o_ref[:, p1, :, :] = slab.reshape(rows, width, cs)


def _round_up(x, m):
    return -(-x // m) * m


def _vmem_capacity_bytes():
    """Physical VMEM per TensorCore; conservative fallback if unavailable."""
    try:
        info = pltpu.get_tpu_info()
        cap = int(getattr(info, "vmem_capacity_bytes", 0))
        if cap > 0:
            return cap
    except Exception:
        pass
    return 64 << 20  # v7x-sized fallback is conservatively safe everywhere


def _pick_rows(total_rows, width, max_tokens, granule):
    """Largest row tile dividing the flat B*H axis that fits the VMEM budget.

    Prefers an even grid with >= 2 steps so v7x's two TensorCores both get
    work; falls back to any valid divisor otherwise.
    """
    r_cap = max(1, min(total_rows, max_tokens // width))
    for require_even_grid in (True, False):
        for r in range(r_cap, 0, -1):
            if total_rows % r or (r * width) % granule:
                continue
            n_steps = total_rows // r
            if require_even_grid and (n_steps < 2 or n_steps % 2):
                continue
            return r
    return 0


def final_patch_expand_x4(x, w_expand, gamma, beta, *, input_resolution, dim,
                          dim_scale=4, rows=None):
    """x: (B, H*W, dim) -> (B, (dim_scale*H)*(dim_scale*W), dim).

    w_expand is stored (in, out) = (dim, 16*dim)  (torch weight transposed).
    """
    H, W = input_resolution
    B, L, C = x.shape
    assert L == H * W, "input feature has wrong size"
    assert C == dim
    ds = dim_scale
    n_chunks = ds * ds
    big_c = n_chunks * dim
    assert w_expand.shape == (dim, big_c)

    itemsize = jnp.dtype(x.dtype).itemsize
    # Sublane granule of the activation/output dtype (f32: 8, bf16: 16, i8: 32).
    granule = {4: 8, 2: 16, 1: 32}.get(itemsize, 8)

    # ---------------------------------------------------------------- tiling
    # Per-generation budgets.  v7x has 64 MiB VMEM per TensorCore; v5e/v6e have
    # 128 MiB (their *default scoped* limit is only 16/32 MiB, so the explicit
    # vmem_limit_bytes raise below is still required).  Pipelined-copy
    # measurements show >=~1-4 MiB output blocks already sit at ~85% of the
    # HBM roofline, so the smaller v7x tile costs essentially nothing.
    vmem_cap = _vmem_capacity_bytes()
    if vmem_cap >= (96 << 20):          # v5e / v6e
        out_block_target = 8 << 20
        vmem_limit_cap = 100 << 20
    else:                               # v7x (or unknown -> conservative)
        out_block_target = int(3.5 * (1 << 20))
        vmem_limit_cap = 56 << 20

    # Per-token VMEM cost: double-buffered input (lane-padded to 128), double-
    # buffered output block, and ~5 live (T, 16*dim) f32 compute temporaries
    # (y, y*y, scale_f, shift_f, out) from the fused LayerNorm epilogue.
    dim_lanes = _round_up(dim, 128)
    bigc_lanes = _round_up(big_c, 128)
    per_token_bytes = (2 * dim_lanes * itemsize          # input, 2x buffered
                       + 2 * bigc_lanes * itemsize       # output, 2x buffered
                       + 5 * bigc_lanes * 4)             # f32 temporaries
    # Grid-invariant operands (weight + indicator matrices + beta).  Counted
    # double-buffered so the budget stays safe even if the Buffered(1) request
    # below is unsupported and Pallas falls back to double-buffering them.
    w_itemsize = jnp.dtype(w_expand.dtype).itemsize
    inv_bytes = (_round_up(dim, 8) * bigc_lanes * w_itemsize   # w_expand
                 + big_c * 128 * 4                             # sum_mat (lane pad)
                 + _round_up(n_chunks, 8) * bigc_lanes * 4     # bcast_g
                 + 8 * bigc_lanes * 4)                         # beta
    headroom = 6 << 20                                         # Mosaic scratch etc.

    if rows is None:
        budget = vmem_limit_cap - headroom - 2 * inv_bytes
        tokens_by_total = max(budget, 0) // per_token_bytes
        tokens_by_out = out_block_target // (big_c * itemsize)
        max_tokens = max(W, min(tokens_by_total, tokens_by_out))
        rows = _pick_rows(B * H, W, max_tokens, granule)
        if rows == 0:
            # TODO(synk): pad the token axis so (rows*W) hits the sublane
            # granule when W and B*H are both odd-granularity.
            raise ValueError(
                "no valid row tile: need (rows*W) %% %d == 0" % granule)
    assert (B * H) % rows == 0 and (rows * W) % granule == 0
    # NOTE: if W % granule != 0 the in-kernel (T, cs)->(rows, W, cs) view needs
    # a relayout (still correct, just slower stores).
    tokens = rows * W
    n_steps = (B * H) // rows

    # ------------------------------------------------------- host precompute
    x_flat = x.reshape(B * H * W, dim)
    chunk_of = jnp.arange(big_c, dtype=jnp.int32) // dim          # (16*dim,)
    pids = jnp.arange(n_chunks, dtype=jnp.int32)                  # (16,)
    sum_mat = (chunk_of[:, None] == pids[None, :]).astype(jnp.float32) / dim
    gamma_tiled = jnp.tile(gamma.astype(jnp.float32).reshape(-1), n_chunks)
    bcast_g = ((pids[:, None] == chunk_of[None, :]).astype(jnp.float32)
               * gamma_tiled[None, :])                            # gamma folded
    beta_f = jnp.tile(beta.astype(jnp.float32).reshape(-1),
                      n_chunks).reshape(1, big_c)

    kernel = functools.partial(_expand_norm_shuffle_kernel, dim=dim,
                               dim_scale=ds, rows=rows, width=W)

    vmem_limit = int(min(max(tokens * per_token_bytes + 2 * inv_bytes + headroom,
                             32 << 20),
                         vmem_limit_cap))

    def _build(single_buffer_invariants):
        inv_kwargs = ({"pipeline_mode": pl.Buffered(1)}
                      if single_buffer_invariants else {})
        return pl.pallas_call(
            kernel,
            out_shape=jax.ShapeDtypeStruct((B * H, ds, W, ds * dim), x.dtype),
            grid_spec=pltpu.PrefetchScalarGridSpec(
                num_scalar_prefetch=0,
                grid=(n_steps,),
                in_specs=[
                    pl.BlockSpec((tokens, dim), lambda i: (i, 0)),
                    pl.BlockSpec((dim, big_c), lambda i: (0, 0), **inv_kwargs),
                    pl.BlockSpec((big_c, n_chunks), lambda i: (0, 0),
                                 **inv_kwargs),
                    pl.BlockSpec((n_chunks, big_c), lambda i: (0, 0),
                                 **inv_kwargs),
                    pl.BlockSpec((1, big_c), lambda i: (0, 0), **inv_kwargs),
                ],
                out_specs=pl.BlockSpec((rows, ds, W, ds * dim),
                                       lambda i: (i, 0, 0, 0)),
            ),
            compiler_params=pltpu.CompilerParams(
                dimension_semantics=("parallel",),
                vmem_limit_bytes=vmem_limit),
        )

    args = (x_flat, w_expand, sum_mat, bcast_g, beta_f)
    try:
        # Grid-invariant operands single-buffered (halves their VMEM footprint
        # -- matters at large dim, e.g. 37.7 MiB f32 weight at dim=768).
        out = jax.block_until_ready(_build(True)(*args))
    except Exception:
        # Fallback for JAX builds where pipeline_mode=pl.Buffered(1) is rejected.
        out = _build(False)(*args)

    # out[b*H + h, p1, w, p2*dim + c] -> y[b, (h*ds+p1)*(W*ds) + (w*ds+p2), c]
    # The pixel shuffle already happened inside the kernel's output layout, so
    # this reshape is a free contiguous view (no XLA transpose of the 16x-
    # expanded tensor through HBM).
    return out.reshape(B, (H * ds) * (W * ds), dim)


def reference(x, w_expand, gamma, beta, *, input_resolution, dim, dim_scale=4):
    """Pure-JAX reference mirroring the PyTorch forward."""
    H, W = input_resolution
    B, L, C = x.shape
    y = x @ w_expand                                  # Linear, no bias
    big_c = dim_scale * dim_scale * dim
    y = y.reshape(B, H, W, big_c)
    y = y.reshape(B, H, W, dim_scale, dim_scale, dim)
    y = jnp.transpose(y, (0, 1, 3, 2, 4, 5))
    y = y.reshape(B, dim_scale * H * dim_scale * W, dim)
    mean = jnp.mean(y, axis=-1, keepdims=True)
    var = jnp.mean((y - mean) ** 2, axis=-1, keepdims=True)
    yn = (y - mean) / jnp.sqrt(var + EPS)
    return yn * gamma + beta


if __name__ == "__main__":
    # Small shapes: B=2, H=W=8 (L=64), dim=32, dim_scale=4 -> expand to 16*dim=512.
    B, H, W, dim, dim_scale = 2, 8, 8, 32, 4
    key = jax.random.PRNGKey(0)
    kx, kw, kg, kb = jax.random.split(key, 4)

    x = jax.random.normal(kx, (B, H * W, dim), dtype=jnp.float32)
    # nn.Linear(dim, 16*dim, bias=False): torch weight is (out, in); we store (in, out).
    w_expand = (jax.random.normal(kw, (dim, dim_scale * dim_scale * dim),
                                  dtype=jnp.float32) * 0.05)
    # LayerNorm(dim) affine params (deterministic random values to exercise the affine path).
    gamma = 1.0 + 0.1 * jax.random.normal(kg, (dim,), dtype=jnp.float32)
    beta = 0.1 * jax.random.normal(kb, (dim,), dtype=jnp.float32)

    out = final_patch_expand_x4(x, w_expand, gamma, beta,
                                input_resolution=(H, W), dim=dim,
                                dim_scale=dim_scale)
    out = jax.block_until_ready(out)

    ref = reference(x, w_expand, gamma, beta,
                    input_resolution=(H, W), dim=dim, dim_scale=dim_scale)
    assert out.shape == (B, dim_scale * H * dim_scale * W, dim)
    assert jnp.allclose(out, ref, atol=2e-4, rtol=2e-4), "mismatch vs reference"
    print("KERNEL_OK")
</pallas_src>

<mosaic_0001>
module attributes {stable_mosaic.version = 11 : i64} {
  func.func @_expand_norm_shuffle_kernel(%arg0: i32, %arg1: memref<64x32xf32, #tpu.memory_space<vmem>>, %arg2: memref<32x512xf32, #tpu.memory_space<vmem>>, %arg3: memref<512x16xf32, #tpu.memory_space<vmem>>, %arg4: memref<16x512xf32, #tpu.memory_space<vmem>>, %arg5: memref<1x512xf32, #tpu.memory_space<vmem>>, %arg6: memref<8x4x8x128xf32, #tpu.memory_space<vmem>>) attributes {dimension_semantics = [#tpu.dimension_semantics<parallel>], iteration_bounds = array<i64: 2>, scalar_prefetch = 0 : i64, scratch_operands = 0 : i64, tpu.core_type = #tpu.core_type<tc>, window_params = [{transform_indices = @transform_0, window_bounds = array<i64: 64, 32>}, {pipeline_mode = #tpu.pipeline_mode<synchronous>, transform_indices = @transform_1, window_bounds = array<i64: 32, 512>}, {pipeline_mode = #tpu.pipeline_mode<synchronous>, transform_indices = @transform_2, window_bounds = array<i64: 512, 16>}, {pipeline_mode = #tpu.pipeline_mode<synchronous>, transform_indices = @transform_3, window_bounds = array<i64: 16, 512>}, {pipeline_mode = #tpu.pipeline_mode<synchronous>, transform_indices = @transform_4, window_bounds = array<i64: 1, 512>}, {transform_indices = @transform_5, window_bounds = array<i64: 8, 4, 8, 128>}]} {
    %c0 = arith.constant 0 : index
    %c0_0 = arith.constant 0 : index
    %0 = vector.load %arg1[%c0, %c0_0] : memref<64x32xf32, #tpu.memory_space<vmem>>, vector<64x32xf32>
    %c0_1 = arith.constant 0 : index
    %c0_2 = arith.constant 0 : index
    %1 = vector.load %arg2[%c0_1, %c0_2] : memref<32x512xf32, #tpu.memory_space<vmem>>, vector<32x512xf32>
    %cst = arith.constant dense<0.000000e+00> : vector<64x512xf32>
    %2 = tpu.matmul %0, %1, %cst {dimension_numbers = #tpu.dot_dimension_numbers<[1], [0], [0], [1], [0, 0, 1, 1], [], []>} : vector<64x32xf32>, vector<32x512xf32>, vector<64x512xf32> -> vector<64x512xf32>
    %c0_3 = arith.constant 0 : index
    %c0_4 = arith.constant 0 : index
    %3 = vector.load %arg3[%c0_3, %c0_4] : memref<512x16xf32, #tpu.memory_space<vmem>>, vector<512x16xf32>
    %cst_5 = arith.constant dense<0.000000e+00> : vector<64x16xf32>
    %4 = tpu.matmul %2, %3, %cst_5 {dimension_numbers = #tpu.dot_dimension_numbers<[1], [0], [0], [1], [0, 0, 1, 1], [], []>} : vector<64x512xf32>, vector<512x16xf32>, vector<64x16xf32> -> vector<64x16xf32>
    %5 = arith.mulf %2, %2 : vector<64x512xf32>
    %c0_6 = arith.constant 0 : index
    %c0_7 = arith.constant 0 : index
    %6 = vector.load %arg3[%c0_6, %c0_7] : memref<512x16xf32, #tpu.memory_space<vmem>>, vector<512x16xf32>
    %cst_8 = arith.constant dense<0.000000e+00> : vector<64x16xf32>
    %7 = tpu.matmul %5, %6, %cst_8 {dimension_numbers = #tpu.dot_dimension_numbers<[1], [0], [0], [1], [0, 0, 1, 1], [], []>} : vector<64x512xf32>, vector<512x16xf32>, vector<64x16xf32> -> vector<64x16xf32>
    %8 = arith.mulf %4, %4 : vector<64x16xf32>
    %9 = arith.subf %7, %8 : vector<64x16xf32>
    %cst_9 = arith.constant 0.000000e+00 : f32
    %10 = vector.broadcast %cst_9 : f32 to vector<64x16xf32>
    %11 = arith.maximumf %9, %10 : vector<64x16xf32>
    %cst_10 = arith.constant 9.99999974E-6 : f32
    %12 = vector.broadcast %cst_10 : f32 to vector<64x16xf32>
    %13 = arith.addf %11, %12 : vector<64x16xf32>
    %14 = math.rsqrt %13 : vector<64x16xf32>
    %c0_11 = arith.constant 0 : index
    %c0_12 = arith.constant 0 : index
    %15 = vector.load %arg4[%c0_11, %c0_12] : memref<16x512xf32, #tpu.memory_space<vmem>>, vector<16x512xf32>
    %cst_13 = arith.constant dense<0.000000e+00> : vector<64x512xf32>
    %16 = tpu.matmul %14, %15, %cst_13 {dimension_numbers = #tpu.dot_dimension_numbers<[1], [0], [0], [1], [0, 0, 1, 1], [], []>} : vector<64x16xf32>, vector<16x512xf32>, vector<64x512xf32> -> vector<64x512xf32>
    %17 = arith.mulf %4, %14 : vector<64x16xf32>
    %c0_14 = arith.constant 0 : index
    %c0_15 = arith.constant 0 : index
    %18 = vector.load %arg4[%c0_14, %c0_15] : memref<16x512xf32, #tpu.memory_space<vmem>>, vector<16x512xf32>
    %cst_16 = arith.constant dense<0.000000e+00> : vector<64x512xf32>
    %19 = tpu.matmul %17, %18, %cst_16 {dimension_numbers = #tpu.dot_dimension_numbers<[1], [0], [0], [1], [0, 0, 1, 1], [], []>} : vector<64x16xf32>, vector<16x512xf32>, vector<64x512xf32> -> vector<64x512xf32>
    %20 = arith.mulf %2, %16 : vector<64x512xf32>
    %21 = arith.subf %20, %19 : vector<64x512xf32>
    %c0_17 = arith.constant 0 : index
    %c0_18 = arith.constant 0 : index
    %22 = vector.load %arg5[%c0_17, %c0_18] : memref<1x512xf32, #tpu.memory_space<vmem>>, vector<1x512xf32>
    %23 = vector.broadcast %22 : vector<1x512xf32> to vector<64x512xf32>
    %24 = arith.addf %21, %23 : vector<64x512xf32>
    %25 = vector.extract_strided_slice %24 {offsets = [0, 0], sizes = [64, 128], strides = [1, 1]} : vector<64x512xf32> to vector<64x128xf32>
    %26 = vector.shape_cast %25 : vector<64x128xf32> to vector<8x8x128xf32>
    %c0_19 = arith.constant 0 : index
    %c0_20 = arith.constant 0 : index
    %c0_21 = arith.constant 0 : index
    %c0_22 = arith.constant 0 : index
    %27 = vector.load %arg6[%c0_19, %c0_20, %c0_21, %c0_22] : memref<8x4x8x128xf32, #tpu.memory_space<vmem>>, vector<8x1x8x128xf32>
    %28 = vector.shape_cast %27 : vector<8x1x8x128xf32> to vector<8x8x128xf32>
    %29 = vector.shape_cast %26 : vector<8x8x128xf32> to vector<8x1x8x128xf32>
    tpu.vector_store %arg6[%c0_19, %c0_20, %c0_21, %c0_22], %29 {strides = array<i32>} : memref<8x4x8x128xf32, #tpu.memory_space<vmem>>, vector<8x1x8x128xf32>,
    %30 = vector.extract_strided_slice %24 {offsets = [0, 128], sizes = [64, 128], strides = [1, 1]} : vector<64x512xf32> to vector<64x128xf32>
    %31 = vector.shape_cast %30 : vector<64x128xf32> to vector<8x8x128xf32>
    %c0_23 = arith.constant 0 : index
    %c1 = arith.constant 1 : index
    %c0_24 = arith.constant 0 : index
    %c0_25 = arith.constant 0 : index
    %32 = vector.load %arg6[%c0_23, %c1, %c0_24, %c0_25] : memref<8x4x8x128xf32, #tpu.memory_space<vmem>>, vector<8x1x8x128xf32>
    %33 = vector.shape_cast %32 : vector<8x1x8x128xf32> to vector<8x8x128xf32>
    %34 = vector.shape_cast %31 : vector<8x8x128xf32> to vector<8x1x8x128xf32>
    tpu.vector_store %arg6[%c0_23, %c1, %c0_24, %c0_25], %34 {strides = array<i32>} : memref<8x4x8x128xf32, #tpu.memory_space<vmem>>, vector<8x1x8x128xf32>,
    %35 = vector.extract_strided_slice %24 {offsets = [0, 256], sizes = [64, 128], strides = [1, 1]} : vector<64x512xf32> to vector<64x128xf32>
    %36 = vector.shape_cast %35 : vector<64x128xf32> to vector<8x8x128xf32>
    %c0_26 = arith.constant 0 : index
    %c2 = arith.constant 2 : index
    %c0_27 = arith.constant 0 : index
    %c0_28 = arith.constant 0 : index
    %37 = vector.load %arg6[%c0_26, %c2, %c0_27, %c0_28] : memref<8x4x8x128xf32, #tpu.memory_space<vmem>>, vector<8x1x8x128xf32>
    %38 = vector.shape_cast %37 : vector<8x1x8x128xf32> to vector<8x8x128xf32>
    %39 = vector.shape_cast %36 : vector<8x8x128xf32> to vector<8x1x8x128xf32>
    tpu.vector_store %arg6[%c0_26, %c2, %c0_27, %c0_28], %39 {strides = array<i32>} : memref<8x4x8x128xf32, #tpu.memory_space<vmem>>, vector<8x1x8x128xf32>,
    %40 = vector.extract_strided_slice %24 {offsets = [0, 384], sizes = [64, 128], strides = [1, 1]} : vector<64x512xf32> to vector<64x128xf32>
    %41 = vector.shape_cast %40 : vector<64x128xf32> to vector<8x8x128xf32>
    %c0_29 = arith.constant 0 : index
    %c3 = arith.constant 3 : index
    %c0_30 = arith.constant 0 : index
    %c0_31 = arith.constant 0 : index
    %42 = vector.load %arg6[%c0_29, %c3, %c0_30, %c0_31] : memref<8x4x8x128xf32, #tpu.memory_space<vmem>>, vector<8x1x8x128xf32>
    %43 = vector.shape_cast %42 : vector<8x1x8x128xf32> to vector<8x8x128xf32>
    %44 = vector.shape_cast %41 : vector<8x8x128xf32> to vector<8x1x8x128xf32>
    tpu.vector_store %arg6[%c0_29, %c3, %c0_30, %c0_31], %44 {strides = array<i32>} : memref<8x4x8x128xf32, #tpu.memory_space<vmem>>, vector<8x1x8x128xf32>,
    return
  }
  func.func @transform_0(%arg0: i32) -> (i32, i32) {
    %c0_i32 = arith.constant 0 : i32
    %c0_i32_0 = arith.constant 0 : i32
    return %arg0, %c0_i32 : i32, i32
  }
  func.func @transform_1(%arg0: i32) -> (i32, i32) {
    %c0_i32 = arith.constant 0 : i32
    %c0_i32_0 = arith.constant 0 : i32
    %c0_i32_1 = arith.constant 0 : i32
    return %c0_i32, %c0_i32_0 : i32, i32
  }
  func.func @transform_2(%arg0: i32) -> (i32, i32) {
    %c0_i32 = arith.constant 0 : i32
    %c0_i32_0 = arith.constant 0 : i32
    %c0_i32_1 = arith.constant 0 : i32
    return %c0_i32, %c0_i32_0 : i32, i32
  }
  func.func @transform_3(%arg0: i32) -> (i32, i32) {
    %c0_i32 = arith.constant 0 : i32
    %c0_i32_0 = arith.constant 0 : i32
    %c0_i32_1 = arith.constant 0 : i32
    return %c0_i32, %c0_i32_0 : i32, i32
  }
  func.func @transform_4(%arg0: i32) -> (i32, i32) {
    %c0_i32 = arith.constant 0 : i32
    %c0_i32_0 = arith.constant 0 : i32
    %c0_i32_1 = arith.constant 0 : i32
    return %c0_i32, %c0_i32_0 : i32, i32
  }
  func.func @transform_5(%arg0: i32) -> (i32, i32, i32, i32) {
    %c0_i32 = arith.constant 0 : i32
    %c0_i32_0 = arith.constant 0 : i32
    %c0_i32_1 = arith.constant 0 : i32
    %c0_i32_2 = arith.constant 0 : i32
    return %arg0, %c0_i32, %c0_i32_0, %c0_i32_1 : i32, i32, i32, i32
  }
}

module attributes {stable_mosaic.version = 11 : i64} {
  func.func @_expand_norm_shuffle_kernel(%arg0: i32, %arg1: memref<64x32xf32, #tpu.memory_space<vmem>>, %arg2: memref<32x512xf32, #tpu.memory_space<vmem>>, %arg3: memref<512x16xf32, #tpu.memory_space<vmem>>, %arg4: memref<16x512xf32, #tpu.memory_space<vmem>>, %arg5: memref<1x512xf32, #tpu.memory_space<vmem>>, %arg6: memref<8x4x8x128xf32, #tpu.memory_space<vmem>>) attributes {dimension_semantics = [#tpu.dimension_semantics<parallel>], iteration_bounds = array<i64: 2>, scalar_prefetch = 0 : i64, scratch_operands = 0 : i64, tpu.core_type = #tpu.core_type<tc>, window_params = [{transform_indices = @transform_0, window_bounds = array<i64: 64, 32>}, {pipeline_mode = #tpu.pipeline_mode<synchronous>, transform_indices = @transform_1, window_bounds = array<i64: 32, 512>}, {pipeline_mode = #tpu.pipeline_mode<synchronous>, transform_indices = @transform_2, window_bounds = array<i64: 512, 16>}, {pipeline_mode = #tpu.pipeline_mode<synchronous>, transform_indices = @transform_3, window_bounds = array<i64: 16, 512>}, {pipeline_mode = #tpu.pipeline_mode<synchronous>, transform_indices = @transform_4, window_bounds = array<i64: 1, 512>}, {transform_indices = @transform_5, window_bounds = array<i64: 8, 4, 8, 128>}]} {
    %c0 = arith.constant 0 : index
    %c0_0 = arith.constant 0 : index
    %0 = vector.load %arg1[%c0, %c0_0] : memref<64x32xf32, #tpu.memory_space<vmem>>, vector<64x32xf32>
    %c0_1 = arith.constant 0 : index
    %c0_2 = arith.constant 0 : index
    %1 = vector.load %arg2[%c0_1, %c0_2] : memref<32x512xf32, #tpu.memory_space<vmem>>, vector<32x512xf32>
    %cst = arith.constant dense<0.000000e+00> : vector<64x512xf32>
    %2 = tpu.matmul %0, %1, %cst {dimension_numbers = #tpu.dot_dimension_numbers<[1], [0], [0], [1], [0, 0, 1, 1], [], []>} : vector<64x32xf32>, vector<32x512xf32>, vector<64x512xf32> -> vector<64x512xf32>
    %c0_3 = arith.constant 0 : index
    %c0_4 = arith.constant 0 : index
    %3 = vector.load %arg3[%c0_3, %c0_4] : memref<512x16xf32, #tpu.memory_space<vmem>>, vector<512x16xf32>
    %cst_5 = arith.constant dense<0.000000e+00> : vector<64x16xf32>
    %4 = tpu.matmul %2, %3, %cst_5 {dimension_numbers = #tpu.dot_dimension_numbers<[1], [0], [0], [1], [0, 0, 1, 1], [], []>} : vector<64x512xf32>, vector<512x16xf32>, vector<64x16xf32> -> vector<64x16xf32>
    %5 = arith.mulf %2, %2 : vector<64x512xf32>
    %c0_6 = arith.constant 0 : index
    %c0_7 = arith.constant 0 : index
    %6 = vector.load %arg3[%c0_6, %c0_7] : memref<512x16xf32, #tpu.memory_space<vmem>>, vector<512x16xf32>
    %cst_8 = arith.constant dense<0.000000e+00> : vector<64x16xf32>
    %7 = tpu.matmul %5, %6, %cst_8 {dimension_numbers = #tpu.dot_dimension_numbers<[1], [0], [0], [1], [0, 0, 1, 1], [], []>} : vector<64x512xf32>, vector<512x16xf32>, vector<64x16xf32> -> vector<64x16xf32>
    %8 = arith.mulf %4, %4 : vector<64x16xf32>
    %9 = arith.subf %7, %8 : vector<64x16xf32>
    %cst_9 = arith.constant 0.000000e+00 : f32
    %10 = vector.broadcast %cst_9 : f32 to vector<64x16xf32>
    %11 = arith.maximumf %9, %10 : vector<64x16xf32>
    %cst_10 = arith.constant 9.99999974E-6 : f32
    %12 = vector.broadcast %cst_10 : f32 to vector<64x16xf32>
    %13 = arith.addf %11, %12 : vector<64x16xf32>
    %14 = math.rsqrt %13 : vector<64x16xf32>
    %c0_11 = arith.constant 0 : index
    %c0_12 = arith.constant 0 : index
    %15 = vector.load %arg4[%c0_11, %c0_12] : memref<16x512xf32, #tpu.memory_space<vmem>>, vector<16x512xf32>
    %cst_13 = arith.constant dense<0.000000e+00> : vector<64x512xf32>
    %16 = tpu.matmul %14, %15, %cst_13 {dimension_numbers = #tpu.dot_dimension_numbers<[1], [0], [0], [1], [0, 0, 1, 1], [], []>} : vector<64x16xf32>, vector<16x512xf32>, vector<64x512xf32> -> vector<64x512xf32>
    %17 = arith.mulf %4, %14 : vector<64x16xf32>
    %c0_14 = arith.constant 0 : index
    %c0_15 = arith.constant 0 : index
    %18 = vector.load %arg4[%c0_14, %c0_15] : memref<16x512xf32, #tpu.memory_space<vmem>>, vector<16x512xf32>
    %cst_16 = arith.constant dense<0.000000e+00> : vector<64x512xf32>
    %19 = tpu.matmul %17, %18, %cst_16 {dimension_numbers = #tpu.dot_dimension_numbers<[1], [0], [0], [1], [0, 0, 1, 1], [], []>} : vector<64x16xf32>, vector<16x512xf32>, vector<64x512xf32> -> vector<64x512xf32>
    %20 = arith.mulf %2, %16 : vector<64x512xf32>
    %21 = arith.subf %20, %19 : vector<64x512xf32>
    %c0_17 = arith.constant 0 : index
    %c0_18 = arith.constant 0 : index
    %22 = vector.load %arg5[%c0_17, %c0_18] : memref<1x512xf32, #tpu.memory_space<vmem>>, vector<1x512xf32>
    %23 = vector.broadcast %22 : vector<1x512xf32> to vector<64x512xf32>
    %24 = arith.addf %21, %23 : vector<64x512xf32>
    %25 = vector.extract_strided_slice %24 {offsets = [0, 0], sizes = [64, 128], strides = [1, 1]} : vector<64x512xf32> to vector<64x128xf32>
    %26 = vector.shape_cast %25 : vector<64x128xf32> to vector<8x8x128xf32>
    %c0_19 = arith.constant 0 : index
    %c0_20 = arith.constant 0 : index
    %c0_21 = arith.constant 0 : index
    %c0_22 = arith.constant 0 : index
    %27 = vector.load %arg6[%c0_19, %c0_20, %c0_21, %c0_22] : memref<8x4x8x128xf32, #tpu.memory_space<vmem>>, vector<8x1x8x128xf32>
    %28 = vector.shape_cast %27 : vector<8x1x8x128xf32> to vector<8x8x128xf32>
    %29 = vector.shape_cast %26 : vector<8x8x128xf32> to vector<8x1x8x128xf32>
    tpu.vector_store %arg6[%c0_19, %c0_20, %c0_21, %c0_22], %29 {strides = array<i32>} : memref<8x4x8x128xf32, #tpu.memory_space<vmem>>, vector<8x1x8x128xf32>,
    %30 = vector.extract_strided_slice %24 {offsets = [0, 128], sizes = [64, 128], strides = [1, 1]} : vector<64x512xf32> to vector<64x128xf32>
    %31 = vector.shape_cast %30 : vector<64x128xf32> to vector<8x8x128xf32>
    %c0_23 = arith.constant 0 : index
    %c1 = arith.constant 1 : index
    %c0_24 = arith.constant 0 : index
    %c0_25 = arith.constant 0 : index
    %32 = vector.load %arg6[%c0_23, %c1, %c0_24, %c0_25] : memref<8x4x8x128xf32, #tpu.memory_space<vmem>>, vector<8x1x8x128xf32>
    %33 = vector.shape_cast %32 : vector<8x1x8x128xf32> to vector<8x8x128xf32>
    %34 = vector.shape_cast %31 : vector<8x8x128xf32> to vector<8x1x8x128xf32>
    tpu.vector_store %arg6[%c0_23, %c1, %c0_24, %c0_25], %34 {strides = array<i32>} : memref<8x4x8x128xf32, #tpu.memory_space<vmem>>, vector<8x1x8x128xf32>,
    %35 = vector.extract_strided_slice %24 {offsets = [0, 256], sizes = [64, 128], strides = [1, 1]} : vector<64x512xf32> to vector<64x128xf32>
    %36 = vector.shape_cast %35 : vector<64x128xf32> to vector<8x8x128xf32>
    %c0_26 = arith.constant 0 : index
    %c2 = arith.constant 2 : index
    %c0_27 = arith.constant 0 : index
    %c0_28 = arith.constant 0 : index
    %37 = vector.load %arg6[%c0_26, %c2, %c0_27, %c0_28] : memref<8x4x8x128xf32, #tpu.memory_space<vmem>>, vector<8x1x8x128xf32>
    %38 = vector.shape_cast %37 : vector<8x1x8x128xf32> to vector<8x8x128xf32>
    %39 = vector.shape_cast %36 : vector<8x8x128xf32> to vector<8x1x8x128xf32>
    tpu.vector_store %arg6[%c0_26, %c2, %c0_27, %c0_28], %39 {strides = array<i32>} : memref<8x4x8x128xf32, #tpu.memory_space<vmem>>, vector<8x1x8x128xf32>,
    %40 = vector.extract_strided_slice %24 {offsets = [0, 384], sizes = [64, 128], strides = [1, 1]} : vector<64x512xf32> to vector<64x128xf32>
    %41 = vector.shape_cast %40 : vector<64x128xf32> to vector<8x8x128xf32>
    %c0_29 = arith.constant 0 : index
    %c3 = arith.constant 3 : index
    %c0_30 = arith.constant 0 : index
    %c0_31 = arith.constant 0 : index
    %42 = vector.load %arg6[%c0_29, %c3, %c0_30, %c0_31] : memref<8x4x8x128xf32, #tpu.memory_space<vmem>>, vector<8x1x8x128xf32>
    %43 = vector.shape_cast %42 : vector<8x1x8x128xf32> to vector<8x8x128xf32>
    %44 = vector.shape_cast %41 : vector<8x8x128xf32> to vector<8x1x8x128xf32>
    tpu.vector_store %arg6[%c0_29, %c3, %c0_30, %c0_31], %44 {strides = array<i32>} : memref<8x4x8x128xf32, #tpu.memory_space<vmem>>, vector<8x1x8x128xf32>,
    return
  }
  func.func @transform_0(%arg0: i32) -> (i32, i32) {
    %c0_i32 = arith.constant 0 : i32
    %c0_i32_0 = arith.constant 0 : i32
    return %arg0, %c0_i32 : i32, i32
  }
  func.func @transform_1(%arg0: i32) -> (i32, i32) {
    %c0_i32 = arith.constant 0 : i32
    %c0_i32_0 = arith.constant 0 : i32
    %c0_i32_1 = arith.constant 0 : i32
    return %c0_i32, %c0_i32_0 : i32, i32
  }
  func.func @transform_2(%arg0: i32) -> (i32, i32) {
    %c0_i32 = arith.constant 0 : i32
    %c0_i32_0 = arith.constant 0 : i32
    %c0_i32_1 = arith.constant 0 : i32
    return %c0_i32, %c0_i32_0 : i32, i32
  }
  func.func @transform_3(%arg0: i32) -> (i32, i32) {
    %c0_i32 = arith.constant 0 : i32
    %c0_i32_0 = arith.constant 0 : i32
    %c0_i32_1 = arith.constant 0 : i32
    return %c0_i32, %c0_i32_0 : i32, i32
  }
  func.func @transform_4(%arg0: i32) -> (i32, i32) {
    %c0_i32 = arith.constant 0 : i32
    %c0_i32_0 = arith.constant 0 : i32
    %c0_i32_1 = arith.constant 0 : i32
    return %c0_i32, %c0_i32_0 : i32, i32
  }
  func.func @transform_5(%arg0: i32) -> (i32, i32, i32, i32) {
    %c0_i32 = arith.constant 0 : i32
    %c0_i32_0 = arith.constant 0 : i32
    %c0_i32_1 = arith.constant 0 : i32
    %c0_i32_2 = arith.constant 0 : i32
    return %arg0, %c0_i32, %c0_i32_0, %c0_i32_1 : i32, i32, i32, i32
  }
}

</mosaic_0001>

<bundles_post_ra>
// kernel: tpu_custom_call.1
= control target key start
LH: loop header
LB: loop body
LE: loop exit
PB: predicated region body
PF: predicated region fallthrough
CT: control target
= control target key end

     0   :  { %10 = vsyncpa [#allocation3], 0  ;;  %s3457_s0 = inlined_call_operand.vmem [shape: f32[128,32], index: 0, kind: input, shape index: {}]   ;;  %s3458_s1 = inlined_call_operand.vmem [shape: f32[32,512], index: 1, kind: input, shape index: {}]   ;;  %s3459_s2 = inlined_call_operand.vmem [shape: f32[512,16], index: 2, kind: input, shape index: {}]   ;;  %s3460_s3 = inlined_call_operand.vmem [shape: f32[16,512], index: 3, kind: input, shape index: {}]   ;;  %s3461_s4 = inlined_call_operand.vmem [shape: f32[1,512], index: 4, kind: input, shape index: {}]   ;;  %s3462_s5 = inlined_call_operand.hbm [shape: f32[16,4,8,128], index: 5, kind: output, shape index: {}]  }
   0x1   :  { %12 = vsyncpa [#allocation3 + $0x1], 0  ;;  %s2431_s18 = smov 0   ;;  %s2433_s19 = smov 0  }
   0x2   :  { %s2435_s20 = smov 0   ;;  %s2437_s21 = smov 0  }
   0x3 LB: > { %s2452_s22 = sadd.s32 4294967295, %s2395_s21   ;;  %s1804_s23 = sadd.s32 4294967294, %s2395_s21   ;;  %s2395_s21 = sphi %s2437_s21, %s3474_s21   ;;  %s2391_s20 = sphi %s2435_s20, %s3473_s20   ;;  %s2387_s19 = sphi %s2433_s19, %s3472_s19   ;;  %s2383_s18 = sphi %s2431_s18, %s3471_s18  }
   0x4   : > { %s2456_s24 = sadd.s32 1, %s2395_s21   ;;  %s135_s25 = sadd.s32 1, %s2391_s20 }
   0x5   : > { %s132_s26 = ssub.s32 %s2395_s21, %s2456_s24  ;;  %p145_p0 = scmp.ne.s32.totalorder %s2391_s20, %s2387_s19 }
   0x6   : > { %p133_p1 = scmp.eq.s32.totalorder %s132_s26, 0  ;;  %p146_p2 = scmp.eq.s32.totalorder %s2452_s22, 1 }
   0x7   : > { %p151_p3 = scmp.ne.s32.totalorder %s2387_s19, %s2383_s18  ;;  %p152_p4 = scmp.eq.s32.totalorder %s1804_s23, 1 }
   0x8   : > { %s2467_s27 = scalar_select %p133_p1, %s2391_s20, %s135_s25  }
   0x9   : > { %p2469_p5 = por %p146_p2, %p145_p0  ;;  %p2473_p6 = por %p152_p4, %p151_p3 }
   0xa   : > { %p1807_p7 = scmp.ge.s32.totalorder %s2395_s21, 1  ;;  %p191_p8 = scmp.lt.s32.totalorder %s2395_s21, 3 }
   0xc   : > { %p192_p9 = pnand %p1807_p7, %p191_p8 }
   0xe   : > { %195 = sbr.rel (%p192_p9) target bundleno = 806 (0x326), region = 40 }
  0x15   : > { %v235_v0 = vld [vmem:[%s3458_s1 + $0x8] sm:$0xff]  ;;  %v237_v2 = vld [vmem:[%s3458_s1 + $0x18] sm:$0xff]  ;;  %s1809_s11 = sshll.u32 %s2452_s22, 3  ;;  %v234_v5 = vld [vmem:[%s3458_s1] sm:$0xff]  ;;  %v3463_v7 = vmov 0.0   ;;  %vm250_vm0 = vcmask 261120  }
  0x16   : > { %v239_v1 = vld [vmem:[%s3458_s1 + $0x28] sm:$0xff]  ;;  %v241_v4 = vld [vmem:[%s3458_s1 + $0x38] sm:$0xff]  ;;  %v238_v6 = vld [vmem:[%s3458_s1 + $0x20] sm:$0xff]  ;;  %339 = vmatprep.mubr.f32.mxu0 %v3463_v7  ;;  %452 = vmatprep.mubr.f32.mxu1 %v3463_v7  ;;  %p220_p10 = scmp.lt.s32.totalorder %s1809_s11, 15  ;;  %vm1065_vm1 = vcmask 130048   ;;  %s2398_s14 = smov [#allocation2]  }
  0x17   : > { %v2115_v3 = vpack.c.bf16 %v239_v1, %v235_v0  ;;  %v2123_v8 = vpack.c.bf16 %v241_v4, %v237_v2  ;;  %v2117_v9 = vpack.c.bf16 %v238_v6, %v234_v5  ;;  %v236_v10 = vld [vmem:[%s3458_s1 + $0x10] sm:$0xff]  ;;  %v243_v12 = vld [vmem:[%s3458_s1 + $0x48] sm:$0xff]  ;;  %v245_v15 = vld [vmem:[%s3458_s1 + $0x58] sm:$0xff] }
  0x18   : > { %v240_v11 = vld [vmem:[%s3458_s1 + $0x30] sm:$0xff]  ;;  %v247_v14 = vld [vmem:[%s3458_s1 + $0x68] sm:$0xff]  ;;  %v249_v16 = vld [vmem:[%s3458_s1 + $0x78] sm:$0xff]  ;;  %s3476_s11 = smov (!%p220_p10, %s1809_s11), 15 }
  0x19   : > { %2116 = vmatprep.subr.bf16.mxu0 %v2115_v3  ;;  %v2125_v13 = vpack.c.bf16 %v240_v11, %v236_v10  ;;  %2124 = vmatprep.subr.bf16.mxu1 %v2123_v8  ;;  %v2119_v17 = vpack.c.bf16 %v247_v14, %v243_v12  ;;  %v2127_v18 = vpack.c.bf16 %v249_v16, %v245_v15  ;;  %v242_v19 = vld [vmem:[%s3458_s1 + $0x40] sm:$0xff]  ;;  %v244_v21 = vld [vmem:[%s3458_s1 + $0x50] sm:$0xff]  ;;  %s1810_s7 = sshll.u32 %s3476_s11, 3  ;;  %v518_v25 = vld [vmem:[%s3459_s2 + $0x88] sm:$0xff]  ;;  %s2337_s11 = sshll.u32 %s2398_s14, 4  ;;  %s2338_s11 = int_to_ptr.vmem [resolvable:$false] %s2337_s11 }
  0x1a   : > { %2118 = vmatpush1.bf16.msra.mxu0 %v2117_v9  ;;  %v246_v20 = vld [vmem:[%s3458_s1 + $0x60] sm:$0xff]  ;;  %v248_v23 = vld [vmem:[%s3458_s1 + $0x70] sm:$0xff]  ;;  %s2539_s15 = scalar_lea.vmem %s3457_s0, %s1810_s7  ;;  %v550_v29 = vld [vmem:[%s3459_s2 + $0x188] sm:$0xff]  ;;  %s1890_s7 = sshll.u32 %s2452_s22, 12 }
  0x1b   : > { %2126 = vmatpush1.bf16.msra.mxu1 %v2125_v13  ;;  %v2121_v22 = vpack.c.bf16 %v246_v20, %v242_v19  ;;  %v517_v24 = vld [vmem:[%s3459_s2 + $0x80] sm:$0xff]  ;;  %2120 = vmatprep.subr.bf16.mxu0 %v2119_v17  ;;  %v2129_v26 = vpack.c.bf16 %v248_v23, %v244_v21  ;;  %v502_v33 = vld [vmem:[%s3459_s2 + $0x8] sm:$0xff]  ;;  %v519_v38 = vld [vmem:[%s3459_s2 + $0x90] sm:$0xff]  ;;  %s3404_s10 = scalar_lea.hbm %s3462_s5, %s1890_s7  ;;  %s2339_s16 = scalar_lea.vmem %s2338_s11, 8192 }
  0x1c   : > { %2128 = vmatprep.subr.bf16.mxu1 %v2127_v18  ;;  %v2541_v27 = vpack.c.bf16 %v518_v25, %v517_v24  ;;  %v549_v28 = vld [vmem:[%s3459_s2 + $0x180] sm:$0xff]  ;;  %v227_v34 = vld [vmem:[%s2539_s15 + $0x8] sm:$0xff]  ;;  %v520_v40 = vld [vmem:[%s3459_s2 + $0x98] sm:$0xff] }
  0x1d   : > { %v2549_v30 = vpack.c.bf16 %v550_v29, %v549_v28  ;;  %v501_v31 = vld [vmem:[%s3459_s2] sm:$0xff]  ;;  %v534_v37 = vld [vmem:[%s3459_s2 + $0x108] sm:$0xff]  ;;  %v551_v41 = vld [vmem:[%s3459_s2 + $0x190] sm:$0xff]  ;;  %v2586_v43 = vpack.c.bf16 %v520_v40, %v519_v38 }
  0x1e   : > { %2122 = vmatpush1.bf16.msra.mxu0 %v2121_v22  ;;  %v226_v32 = vld [vmem:[%s2539_s15] sm:$0xff]  ;;  %v2561_v35 = vpack.c.bf16 %v502_v33, %v501_v31  ;;  %v552_v42 = vld [vmem:[%s3459_s2 + $0x198] sm:$0xff]  ;;  %v503_v45 = vld [vmem:[%s3459_s2 + $0x10] sm:$0xff] }
  0x1f   : > { %2130 = vmatpush1.bf16.msra.mxu1 %v2129_v26  ;;  %2132 = vmatprep.subr.bf16.mxu0 %v2541_v27  ;;  %v533_v36 = vld [vmem:[%s3459_s2 + $0x100] sm:$0xff]  ;;  %v2588_v44 = vpack.c.bf16 %v552_v42, %v551_v41  ;;  %v504_v46 = vld [vmem:[%s3459_s2 + $0x18] sm:$0xff]  ;;  %v535_v47 = vld [vmem:[%s3459_s2 + $0x110] sm:$0xff] }
  0x20   : > { %2164 = vmatprep.subr.bf16.mxu1 %v2549_v30  ;;  %v2573_v39 = vpack.c.bf16 %v534_v37, %v533_v36  ;;  %v2601_v48 = vpack.c.bf16 %v504_v46, %v503_v45  ;;  %v536_v49 = vld [vmem:[%s3459_s2 + $0x118] sm:$0xff]  ;;  %v521_v50 = vld [vmem:[%s3459_s2 + $0xa0] sm:$0xff]  ;;  %v522_v51 = vld [vmem:[%s3459_s2 + $0xa8] sm:$0xff] }
  0x21   : > { %1811 = vmatmul.mubr.msk.f32.vlgmr.msra.gmra.mrb[0].mxu0 %vm250_vm0, %v226_v32  ;;  %v228_v52 = vld [vmem:[%s2539_s15 + $0x10] sm:$0xff]  ;;  %v2615_v53 = vpack.c.bf16 %v536_v49, %v535_v47  ;;  %v2617_v54 = vpack.c.bf16 %v522_v51, %v521_v50  ;;  %v553_v55 = vld [vmem:[%s3459_s2 + $0x1a0] sm:$0xff]  ;;  %v554_v56 = vld [vmem:[%s3459_s2 + $0x1a8] sm:$0xff] }
  0x22   : > { %1819 = vmatmul.mubr.msk.f32.vlgmr.msra.gmra.mrb[0].mxu1 %vm250_vm0, %v226_v32  ;;  %345 = vmatprep.mubr.f32.mxu0 %v3463_v7  ;;  %v505_v57 = vld [vmem:[%s3459_s2 + $0x20] sm:$0xff]  ;;  %v2630_v58 = vpack.c.bf16 %v554_v56, %v553_v55  ;;  %v506_v59 = vld [vmem:[%s3459_s2 + $0x28] sm:$0xff]  ;;  %v523_v62 = vld [vmem:[%s3459_s2 + $0xb0] sm:$0xff] }
  0x23   : > { %458 = vmatprep.mubr.f32.mxu1 %v3463_v7  ;;  %2134 = vmatpush3.bf16.msra.mxu0 %v2561_v35  ;;  %v537_v60 = vld [vmem:[%s3459_s2 + $0x120] sm:$0xff]  ;;  %v538_v61 = vld [vmem:[%s3459_s2 + $0x128] sm:$0xff]  ;;  %v524_v63 = vld [vmem:[%s3459_s2 + $0xb8] sm:$0xff]  ;;  %v2654_v1 = vpack.c.bf16 %v506_v59, %v505_v57 }
  0x24   : > { %2166 = vmatpush3.bf16.msra.mxu1 %v2573_v39  ;;  %2136 = vmatprep.subr.bf16.mxu0 %v2586_v43  ;;  %v555_v0 = vld [vmem:[%s3459_s2 + $0x1b0] sm:$0xff]  ;;  %v556_v2 = vld [vmem:[%s3459_s2 + $0x1b8] sm:$0xff]  ;;  %v2661_v3 = vpack.c.bf16 %v538_v61, %v537_v60  ;;  %v2663_v4 = vpack.c.bf16 %v524_v63, %v523_v62  ;;  %v525_v11 = vld [vmem:[%s3459_s2 + $0xc0] sm:$0xff] }
  0x25   : > { %1812 = vmatmul.mubr.msk.f32.gmra.mrb[2].mxu0 %vm250_vm0, %v227_v34  ;;  %2168 = vmatprep.subr.bf16.mxu1 %v2588_v44  ;;  %v507_v5 = vld [vmem:[%s3459_s2 + $0x30] sm:$0xff]  ;;  %v508_v6 = vld [vmem:[%s3459_s2 + $0x38] sm:$0xff]  ;;  %v2676_v9 = vpack.c.bf16 %v556_v2, %v555_v0  ;;  %v526_v12 = vld [vmem:[%s3459_s2 + $0xc8] sm:$0xff] }
  0x26   : > { %1820 = vmatmul.mubr.msk.f32.gmra.mrb[2].mxu1 %vm250_vm0, %v227_v34  ;;  %351 = vmatprep.mubr.f32.mxu0 %v3463_v7  ;;  %v539_v8 = vld [vmem:[%s3459_s2 + $0x130] sm:$0xff]  ;;  %v540_v10 = vld [vmem:[%s3459_s2 + $0x138] sm:$0xff]  ;;  %v557_v14 = vld [vmem:[%s3459_s2 + $0x1c0] sm:$0xff]  ;;  %v2698_v16 = vpack.c.bf16 %v508_v6, %v507_v5  ;;  %v2704_v18 = vpack.c.bf16 %v526_v12, %v525_v11 }
  0x27   : > { %464 = vmatprep.mubr.f32.mxu1 %v3463_v7  ;;  %2138 = vmatpush3.bf16.msra.mxu0 %v2601_v48  ;;  %v229_v13 = vld [vmem:[%s2539_s15 + $0x18] sm:$0xff]  ;;  %v558_v15 = vld [vmem:[%s3459_s2 + $0x1c8] sm:$0xff]  ;;  %v2702_v17 = vpack.c.bf16 %v540_v10, %v539_v8  ;;  %v509_v19 = vld [vmem:[%s3459_s2 + $0x40] sm:$0xff] }
  0x28   : > { %2170 = vmatpush3.bf16.msra.mxu1 %v2615_v53  ;;  %2140 = vmatprep.subr.bf16.mxu0 %v2617_v54  ;;  %v510_v20 = vld [vmem:[%s3459_s2 + $0x48] sm:$0xff]  ;;  %v541_v21 = vld [vmem:[%s3459_s2 + $0x140] sm:$0xff]  ;;  %v2717_v22 = vpack.c.bf16 %v558_v15, %v557_v14  ;;  %v527_v24 = vld [vmem:[%s3459_s2 + $0xd0] sm:$0xff] }
  0x29   : > { %1813 = vmatmul.mubr.msk.f32.gmra.mrb[4].mxu0 %vm250_vm0, %v228_v52  ;;  %2172 = vmatprep.subr.bf16.mxu1 %v2630_v58  ;;  %v542_v23 = vld [vmem:[%s3459_s2 + $0x148] sm:$0xff]  ;;  %v528_v25 = vld [vmem:[%s3459_s2 + $0xd8] sm:$0xff]  ;;  %v230_v26 = vld [vmem:[%s2539_s15 + $0x20] sm:$0xff]  ;;  %v2739_v31 = vpack.c.bf16 %v510_v20, %v509_v19 }
  0x2a   : > { %1821 = vmatmul.mubr.msk.f32.gmra.mrb[4].mxu1 %vm250_vm0, %v228_v52  ;;  %357 = vmatprep.mubr.f32.mxu0 %v3463_v7  ;;  %v559_v28 = vld [vmem:[%s3459_s2 + $0x1d0] sm:$0xff]  ;;  %v560_v29 = vld [vmem:[%s3459_s2 + $0x1d8] sm:$0xff]  ;;  %v2743_v32 = vpack.c.bf16 %v542_v23, %v541_v21  ;;  %v2745_v33 = vpack.c.bf16 %v528_v25, %v527_v24  ;;  %v529_v41 = vld [vmem:[%s3459_s2 + $0xe0] sm:$0xff] }
  0x2b   : > { %470 = vmatprep.mubr.f32.mxu1 %v3463_v7  ;;  %2142 = vmatpush3.bf16.msra.mxu0 %v2654_v1  ;;  %v511_v34 = vld [vmem:[%s3459_s2 + $0x50] sm:$0xff]  ;;  %v512_v36 = vld [vmem:[%s3459_s2 + $0x58] sm:$0xff]  ;;  %v2758_v38 = vpack.c.bf16 %v560_v29, %v559_v28  ;;  %v530_v42 = vld [vmem:[%s3459_s2 + $0xe8] sm:$0xff] }
  0x2c   : > { %2174 = vmatpush3.bf16.msra.mxu1 %v2661_v3  ;;  %2144 = vmatprep.subr.bf16.mxu0 %v2663_v4  ;;  %v543_v37 = vld [vmem:[%s3459_s2 + $0x150] sm:$0xff]  ;;  %v544_v40 = vld [vmem:[%s3459_s2 + $0x158] sm:$0xff]  ;;  %v231_v45 = vld [vmem:[%s2539_s15 + $0x28] sm:$0xff]  ;;  %v2780_v49 = vpack.c.bf16 %v512_v36, %v511_v34  ;;  %v2786_v51 = vpack.c.bf16 %v530_v42, %v529_v41 }
  0x2d   : > { %1814 = vmatmul.mubr.msk.f32.gmra.mrb[6].mxu0 %vm250_vm0, %v229_v13  ;;  %2176 = vmatprep.subr.bf16.mxu1 %v2676_v9  ;;  %v561_v46 = vld [vmem:[%s3459_s2 + $0x1e0] sm:$0xff]  ;;  %v562_v47 = vld [vmem:[%s3459_s2 + $0x1e8] sm:$0xff]  ;;  %v2784_v50 = vpack.c.bf16 %v544_v40, %v543_v37  ;;  %v531_v60 = vld [vmem:[%s3459_s2 + $0xf0] sm:$0xff] }
  0x2e   : > { %1822 = vmatmul.mubr.msk.f32.gmra.mrb[6].mxu1 %vm250_vm0, %v229_v13  ;;  %363 = vmatprep.mubr.f32.mxu0 %v3463_v7  ;;  %v513_v52 = vld [vmem:[%s3459_s2 + $0x60] sm:$0xff]  ;;  %v514_v55 = vld [vmem:[%s3459_s2 + $0x68] sm:$0xff]  ;;  %v2799_v57 = vpack.c.bf16 %v562_v47, %v561_v46  ;;  %v532_v61 = vld [vmem:[%s3459_s2 + $0xf8] sm:$0xff] }
  0x2f   : > { %476 = vmatprep.mubr.f32.mxu1 %v3463_v7  ;;  %2146 = vmatpush3.bf16.msra.mxu0 %v2698_v16  ;;  %v545_v56 = vld [vmem:[%s3459_s2 + $0x160] sm:$0xff]  ;;  %v546_v59 = vld [vmem:[%s3459_s2 + $0x168] sm:$0xff]  ;;  %v232_v62 = vld [vmem:[%s2539_s15 + $0x30] sm:$0xff]  ;;  %v2821_v2 = vpack.c.bf16 %v514_v55, %v513_v52  ;;  %v2827_v6 = vpack.c.bf16 %v532_v61, %v531_v60 }
  0x30   : > { %2178 = vmatpush3.bf16.msra.mxu1 %v2702_v17  ;;  %2148 = vmatprep.subr.bf16.mxu0 %v2704_v18  ;;  %v563_v63 = vld [vmem:[%s3459_s2 + $0x1f0] sm:$0xff]  ;;  %v564_v0 = vld [vmem:[%s3459_s2 + $0x1f8] sm:$0xff]  ;;  %v2825_v5 = vpack.c.bf16 %v546_v59, %v545_v56 }
  0x31   : > { %1815 = vmatmul.mubr.msk.f32.gmra.mrb[8].mxu0 %vm250_vm0, %v230_v26  ;;  %2180 = vmatprep.subr.bf16.mxu1 %v2717_v22  ;;  %v515_v8 = vld [vmem:[%s3459_s2 + $0x70] sm:$0xff]  ;;  %v516_v10 = vld [vmem:[%s3459_s2 + $0x78] sm:$0xff]  ;;  %v2837_v11 = vpack.c.bf16 %v564_v0, %v563_v63 }
  0x32   : > { %1823 = vmatmul.mubr.msk.f32.gmra.mrb[8].mxu1 %vm250_vm0, %v230_v26  ;;  %369 = vmatprep.mubr.f32.mxu0 %v3463_v7  ;;  %v547_v12 = vld [vmem:[%s3459_s2 + $0x170] sm:$0xff]  ;;  %v548_v13 = vld [vmem:[%s3459_s2 + $0x178] sm:$0xff]  ;;  %v2850_v15 = vpack.c.bf16 %v516_v10, %v515_v8 }
  0x33   : > { %482 = vmatprep.mubr.f32.mxu1 %v3463_v7  ;;  %2150 = vmatpush3.bf16.msra.mxu0 %v2739_v31  ;;  %v233_v14 = vld [vmem:[%s2539_s15 + $0x38] sm:$0xff]  ;;  %v2854_v19 = vpack.c.bf16 %v548_v13, %v547_v12  ;;  %s216_s15 = sand.u32 1, %s2387_s19  }
  0x34   : > { %2182 = vmatpush3.bf16.msra.mxu1 %v2743_v32  ;;  %2152 = vmatprep.subr.bf16.mxu0 %v2745_v33  ;;  %s1808_s30 = sshll.u32 %s216_s15, 8  ;;  %s3416_s12 = scalar_lea.sflag [#allocation3], %s216_s15 }
  0x35   : > { %1816 = vmatmul.mubr.msk.f32.gmra.mrb[10].mxu0 %vm250_vm0, %v231_v45  ;;  %2184 = vmatprep.subr.bf16.mxu1 %v2758_v38  ;;  %s3315_s6 = scalar_lea.vmem [#allocation2], %s1808_s30 }
  0x36   : > { %1824 = vmatmul.mubr.msk.f32.gmra.mrb[10].mxu1 %vm250_vm0, %v231_v45  ;;  %375 = vmatprep.mubr.f32.mxu0 %v3463_v7  ;;  %s1742_s8 = sshll.u32 %s3315_s6, 4  ;;  %s3406_s8 = int_to_ptr.vmem [resolvable:$true] %s1742_s8 }
  0x37   : > { %488 = vmatprep.mubr.f32.mxu1 %v3463_v7  ;;  %2154 = vmatpush3.bf16.msra.mxu0 %v2780_v49  ;;  %s2333_s13 = scalar_lea.vmem %s3406_s8, 4096  ;;  %p2340_p0 = scmp.lt.s32.totalorder %s3406_s8, %s2338_s11 }
  0x38   : > { %2186 = vmatpush3.bf16.msra.mxu1 %v2784_v50  ;;  %2156 = vmatprep.subr.bf16.mxu0 %v2786_v51  ;;  %p2334_p11 = scmp.ne.s32.totalorder %s3406_s8, %s2333_s13  ;;  %p2341_p1 = scmp.lt.s32.totalorder %s2339_s16, %s2333_s13 }
  0x39   : > { %1817 = vmatmul.mubr.msk.f32.gmra.mrb[12].mxu0 %vm250_vm0, %v232_v62  ;;  %2188 = vmatprep.subr.bf16.mxu1 %v2799_v57 }
  0x3a   : > { %1825 = vmatmul.mubr.msk.f32.gmra.mrb[12].mxu1 %vm250_vm0, %v232_v62  ;;  %381 = vmatprep.mubr.f32.mxu0 %v3463_v7  ;;  %p2335_p12 = pnand %p2334_p11, %p2469_p5  ;;  %p2342_p2 = por %p2341_p1, %p2340_p0 }
  0x3b   : > { %494 = vmatprep.mubr.f32.mxu1 %v3463_v7  ;;  %2158 = vmatpush3.bf16.msra.mxu0 %v2821_v2 }
  0x3c   : > { %2190 = vmatpush3.bf16.msra.mxu1 %v2825_v5  ;;  %2160 = vmatprep.subr.bf16.mxu0 %v2827_v6  ;;  %p2336_p13 = pneg %p2335_p12 }
  0x3d   : > { %1818 = vmatmul.mubr.msk.f32.gmra.mrb[14].mxu0 %vm250_vm0, %v233_v14  ;;  %2192 = vmatprep.subr.bf16.mxu1 %v2837_v11 }
  0x3e   : > { %1826 = vmatmul.mubr.msk.f32.gmra.mrb[14].mxu1 %vm250_vm0, %v233_v14  ;;  %p2343_p3 = pnand %p2342_p2, %p2336_p13 }
  0x3f   : > { %2162 = vmatpush3.bf16.msra.mxu0 %v2850_v15 }
  0x40   : > { %2194 = vmatpush3.bf16.msra.mxu1 %v2854_v19  ;;  %2196 = vmatprep.subr.bf16.mxu0 %v2541_v27 }
  0x41   : > { %2228 = vmatprep.subr.bf16.mxu1 %v2549_v30 }
  0xf4   : > { %v2863_v20 = vpop.f32.mrb[0].mxu0 }
  0xf5   : > { %v2865_v21 = vpop.f32.mrb[0].mxu1  ;;  %v2867_v23 = vpop.f32.mrb[1].mxu0  ;;  %v775_v41 = vmul.f32 %v2863_v20, %v2863_v20 }
  0xf6   : > { %v2869_v24 = vpop.f32.mrb[1].mxu1  ;;  %629 = vmatprep.mubr.f32.mxu0 %v2867_v23  ;;  %v777_v42 = vmul.f32 %v2865_v21, %v2865_v21 }
  0xf7   : > { %734 = vmatprep.mubr.f32.mxu1 %v2869_v24  ;;  %630 = vmatmul.mubr.f32.vlgmr.msra.gmra.mrb[16].mxu0 %v2863_v20  ;;  %v778_v40 = vmul.f32 %v2869_v24, %v2869_v24 }
  0xf8   : > { %735 = vmatmul.mubr.f32.vlgmr.msra.gmra.mrb[16].mxu1 %v2865_v21  ;;  %2198 = vmatpush3.bf16.msra.mxu0 %v2561_v35  ;;  %v2876_v27 = vpop.f32.mrb[2].mxu0 }
  0xf9   : > { %2230 = vmatpush3.bf16.msra.mxu1 %v2573_v39  ;;  %v2879_v30 = vpop.f32.mrb[2].mxu1  ;;  %v2881_v25 = vpop.f32.mrb[3].mxu0  ;;  %2200 = vmatprep.subr.bf16.mxu0 %v2586_v43  ;;  %v779_v47 = vmul.f32 %v2876_v27, %v2876_v27 }
  0xfa   : > { %v2884_v26 = vpop.f32.mrb[3].mxu1  ;;  %634 = vmatprep.mubr.f32.mxu0 %v2881_v25  ;;  %2232 = vmatprep.subr.bf16.mxu1 %v2588_v44  ;;  %v780_v45 = vmul.f32 %v2881_v25, %v2881_v25 }
  0xfb   : > { %739 = vmatprep.mubr.f32.mxu1 %v2884_v26  ;;  %635 = vmatmul.mubr.f32.gmra.mrb[18].mxu0 %v2876_v27  ;;  %v782_v46 = vmul.f32 %v2884_v26, %v2884_v26 }
  0xfc   : > { %740 = vmatmul.mubr.f32.gmra.mrb[18].mxu1 %v2879_v30  ;;  %2202 = vmatpush3.bf16.msra.mxu0 %v2601_v48  ;;  %v2892_v35 = vpop.f32.mrb[4].mxu0 }
  0xfd   : > { %2234 = vmatpush3.bf16.msra.mxu1 %v2615_v53  ;;  %v2895_v39 = vpop.f32.mrb[4].mxu1  ;;  %v2897_v43 = vpop.f32.mrb[5].mxu0  ;;  %2204 = vmatprep.subr.bf16.mxu0 %v2617_v54  ;;  %v783_v52 = vmul.f32 %v2892_v35, %v2892_v35 }
  0xfe   : > { %v2900_v28 = vpop.f32.mrb[5].mxu1  ;;  %639 = vmatprep.mubr.f32.mxu0 %v2897_v43  ;;  %2236 = vmatprep.subr.bf16.mxu1 %v2630_v58  ;;  %v785_v55 = vmul.f32 %v2895_v39, %v2895_v39 }
  0xff   : > { %744 = vmatprep.mubr.f32.mxu1 %v2900_v28  ;;  %640 = vmatmul.mubr.f32.gmra.mrb[20].mxu0 %v2892_v35 }
 0x100   : > { %745 = vmatmul.mubr.f32.gmra.mrb[20].mxu1 %v2895_v39  ;;  %2206 = vmatpush3.bf16.msra.mxu0 %v2654_v1  ;;  %v2908_v44 = vpop.f32.mrb[6].mxu0 }
 0x101   : > { %2238 = vmatpush3.bf16.msra.mxu1 %v2661_v3  ;;  %v2911_v48 = vpop.f32.mrb[6].mxu1  ;;  %v2913_v53 = vpop.f32.mrb[7].mxu0  ;;  %2208 = vmatprep.subr.bf16.mxu0 %v2663_v4  ;;  %v787_v59 = vmul.f32 %v2908_v44, %v2908_v44 }
 0x102   : > { %v2916_v54 = vpop.f32.mrb[7].mxu1  ;;  %644 = vmatprep.mubr.f32.mxu0 %v2913_v53  ;;  %2240 = vmatprep.subr.bf16.mxu1 %v2676_v9  ;;  %v788_v56 = vmul.f32 %v2913_v53, %v2913_v53  ;;  %v789_v60 = vmul.f32 %v2911_v48, %v2911_v48 }
 0x103   : > { %749 = vmatprep.mubr.f32.mxu1 %v2916_v54  ;;  %645 = vmatmul.mubr.f32.gmra.mrb[22].mxu0 %v2908_v44 }
 0x104   : > { %750 = vmatmul.mubr.f32.gmra.mrb[22].mxu1 %v2911_v48  ;;  %2210 = vmatpush3.bf16.msra.mxu0 %v2698_v16  ;;  %v2924_v58 = vpop.f32.mrb[8].mxu0 }
 0x105   : > { %2242 = vmatpush3.bf16.msra.mxu1 %v2702_v17  ;;  %v2927_v1 = vpop.f32.mrb[8].mxu1  ;;  %v2929_v3 = vpop.f32.mrb[9].mxu0  ;;  %2212 = vmatprep.subr.bf16.mxu0 %v2704_v18  ;;  %v791_v63 = vmul.f32 %v2924_v58, %v2924_v58 }
 0x106   : > { %v2932_v4 = vpop.f32.mrb[9].mxu1  ;;  %649 = vmatprep.mubr.f32.mxu0 %v2929_v3  ;;  %2244 = vmatprep.subr.bf16.mxu1 %v2717_v22  ;;  %v792_v61 = vmul.f32 %v2929_v3, %v2929_v3  ;;  %v793_v0 = vmul.f32 %v2927_v1, %v2927_v1 }
 0x107   : > { %754 = vmatprep.mubr.f32.mxu1 %v2932_v4  ;;  %650 = vmatmul.mubr.f32.gmra.mrb[24].mxu0 %v2924_v58  ;;  %v794_v62 = vmul.f32 %v2932_v4, %v2932_v4 }
 0x108   : > { %755 = vmatmul.mubr.f32.gmra.mrb[24].mxu1 %v2927_v1  ;;  %2214 = vmatpush3.bf16.msra.mxu0 %v2739_v31  ;;  %v2940_v9 = vpop.f32.mrb[10].mxu0 }
 0x109   : > { %2246 = vmatpush3.bf16.msra.mxu1 %v2743_v32  ;;  %v2943_v16 = vpop.f32.mrb[10].mxu1  ;;  %v2945_v17 = vpop.f32.mrb[11].mxu0  ;;  %2216 = vmatprep.subr.bf16.mxu0 %v2745_v33 }
 0x10a   : > { %v2948_v18 = vpop.f32.mrb[11].mxu1  ;;  %654 = vmatprep.mubr.f32.mxu0 %v2945_v17  ;;  %2248 = vmatprep.subr.bf16.mxu1 %v2758_v38  ;;  %v776_v38 = vmul.f32 %v2867_v23, %v2867_v23  ;;  %v797_v8 = vmul.f32 %v2943_v16, %v2943_v16 }
 0x10b   : > { %759 = vmatprep.mubr.f32.mxu1 %v2948_v18  ;;  %655 = vmatmul.mubr.f32.gmra.mrb[26].mxu0 %v2940_v9 }
 0x10c   : > { %760 = vmatmul.mubr.f32.gmra.mrb[26].mxu1 %v2943_v16  ;;  %2218 = vmatpush3.bf16.msra.mxu0 %v2780_v49  ;;  %v2956_v22 = vpop.f32.mrb[12].mxu0  ;;  %v781_v49 = vmul.f32 %v2879_v30, %v2879_v30 }
 0x10d   : > { %2250 = vmatpush3.bf16.msra.mxu1 %v2784_v50  ;;  %v2959_v29 = vpop.f32.mrb[12].mxu1  ;;  %v2961_v31 = vpop.f32.mrb[13].mxu0  ;;  %2220 = vmatprep.subr.bf16.mxu0 %v2786_v51  ;;  %v784_v50 = vmul.f32 %v2897_v43, %v2897_v43  ;;  %v786_v51 = vmul.f32 %v2900_v28, %v2900_v28  ;;  %v799_v12 = vmul.f32 %v2956_v22, %v2956_v22 }
 0x10e   : > { %v2964_v32 = vpop.f32.mrb[13].mxu1  ;;  %659 = vmatprep.mubr.f32.mxu0 %v2961_v31  ;;  %2252 = vmatprep.subr.bf16.mxu1 %v2799_v57  ;;  %v790_v57 = vmul.f32 %v2916_v54, %v2916_v54  ;;  %v800_v10 = vmul.f32 %v2961_v31, %v2961_v31  ;;  %v801_v13 = vmul.f32 %v2959_v29, %v2959_v29 }
 0x10f   : > { %764 = vmatprep.mubr.f32.mxu1 %v2964_v32  ;;  %660 = vmatmul.mubr.f32.gmra.mrb[28].mxu0 %v2956_v22 }
 0x110   : > { %765 = vmatmul.mubr.f32.gmra.mrb[28].mxu1 %v2959_v29  ;;  %2222 = vmatpush3.bf16.msra.mxu0 %v2821_v2  ;;  %v2972_v33 = vpop.f32.mrb[14].mxu0  ;;  %v796_v2 = vmul.f32 %v2945_v17, %v2945_v17 }
 0x111   : > { %2254 = vmatpush3.bf16.msra.mxu1 %v2825_v5  ;;  %v2975_v34 = vpop.f32.mrb[14].mxu1  ;;  %v2977_v36 = vpop.f32.mrb[15].mxu0  ;;  %2224 = vmatprep.subr.bf16.mxu0 %v2827_v6  ;;  %v798_v5 = vmul.f32 %v2948_v18, %v2948_v18  ;;  %v795_v6 = vmul.f32 %v2940_v9, %v2940_v9 }
 0x112   : > { %v2980_v37 = vpop.f32.mrb[15].mxu1  ;;  %664 = vmatprep.mubr.f32.mxu0 %v2977_v36  ;;  %2256 = vmatprep.subr.bf16.mxu1 %v2837_v11  ;;  %v802_v11 = vmul.f32 %v2964_v32, %v2964_v32  ;;  %v804_v14 = vmul.f32 %v2977_v36, %v2977_v36 }
 0x113   : > { %3468 = vst [vmem:[#allocation5_spill] sm:$0xff] %v2980_v37  ;;  %769 = vmatprep.mubr.f32.mxu1 %v2980_v37  ;;  %665 = vmatmul.mubr.f32.gmra.mrb[30].mxu0 %v2972_v33 }
 0x114   : > { %770 = vmatmul.mubr.f32.gmra.mrb[30].mxu1 %v2975_v34  ;;  %2226 = vmatpush3.bf16.msra.mxu0 %v2850_v15  ;;  %v806_v15 = vmul.f32 %v2980_v37, %v2980_v37 }
 0x115   : > { %2258 = vmatpush3.bf16.msra.mxu1 %v2854_v19  ;;  %871 = vmatprep.mubr.f32.mxu0 %v776_v38  ;;  %v803_v19 = vmul.f32 %v2972_v33, %v2972_v33  ;;  %v805_v38 = vmul.f32 %v2975_v34, %v2975_v34 }
 0x116   : > { %976 = vmatprep.mubr.f32.mxu1 %v778_v40  ;;  %v1058_v40 = vld [vmem:[%s3460_s3 + $0x8] sm:$0xff] }
 0x117   : > { %872 = vmatmul.mubr.f32.vlgmr.msra.gmra.mrb[32].mxu0 %v775_v41  ;;  %v1062_v41 = vld [vmem:[%s3460_s3 + $0x28] sm:$0xff] }
 0x118   : > { %977 = vmatmul.mubr.f32.vlgmr.msra.gmra.mrb[32].mxu1 %v777_v42  ;;  %876 = vmatprep.mubr.f32.mxu0 %v780_v45  ;;  %v1060_v42 = vld [vmem:[%s3460_s3 + $0x18] sm:$0xff]  ;;  %v2259_v45 = vpack.c.bf16 %v1062_v41, %v1058_v40 }
 0x119   : > { %981 = vmatprep.mubr.f32.mxu1 %v782_v46  ;;  %v1064_v46 = vld [vmem:[%s3460_s3 + $0x38] sm:$0xff] }
 0x11a   : > { %2260 = vmatprep.subr.bf16.mxu0 %v2259_v45 }
 0x11b   : > { %877 = vmatmul.mubr.f32.gmra.mrb[34].mxu0 %v779_v47  ;;  %v1057_v47 = vld [vmem:[%s3460_s3] sm:$0xff] }
 0x11c   : > { %982 = vmatmul.mubr.f32.gmra.mrb[34].mxu1 %v781_v49  ;;  %881 = vmatprep.mubr.f32.mxu0 %v784_v50  ;;  %v1061_v49 = vld [vmem:[%s3460_s3 + $0x20] sm:$0xff]  ;;  %v2263_v50 = vpack.c.bf16 %v1064_v46, %v1060_v42 }
 0x11d   : > { %986 = vmatprep.mubr.f32.mxu1 %v786_v51  ;;  %v3073_v51 = vpack.c.bf16 %v1061_v49, %v1057_v47 }
 0x11e   : > { %2264 = vmatprep.subr.bf16.mxu1 %v2263_v50 }
 0x11f   : > { %882 = vmatmul.mubr.f32.gmra.mrb[36].mxu0 %v783_v52  ;;  %v1059_v52 = vld [vmem:[%s3460_s3 + $0x10] sm:$0xff] }
 0x120   : > { %987 = vmatmul.mubr.f32.gmra.mrb[36].mxu1 %v785_v55  ;;  %886 = vmatprep.mubr.f32.mxu0 %v788_v56  ;;  %v1063_v55 = vld [vmem:[%s3460_s3 + $0x30] sm:$0xff] }
 0x121   : > { %991 = vmatprep.mubr.f32.mxu1 %v790_v57  ;;  %v3081_v56 = vpack.c.bf16 %v1063_v55, %v1059_v52  ;;  %2262 = vmatpush1.bf16.msra.mxu0 %v3073_v51 }
 0x122   : > { %2268 = vmatprep.subr.bf16.mxu0 %v2259_v45 }
 0x123   : > { %887 = vmatmul.mubr.f32.gmra.mrb[38].mxu0 %v787_v59  ;;  %2266 = vmatpush1.bf16.msra.mxu1 %v3081_v56 }
 0x124   : > { %992 = vmatmul.mubr.f32.gmra.mrb[38].mxu1 %v789_v60  ;;  %891 = vmatprep.mubr.f32.mxu0 %v792_v61 }
 0x125   : > { %996 = vmatprep.mubr.f32.mxu1 %v794_v62  ;;  %2272 = vmatprep.subr.bf16.mxu1 %v2263_v50 }
 0x127   : > { %892 = vmatmul.mubr.f32.gmra.mrb[40].mxu0 %v791_v63 }
 0x128   : > { %997 = vmatmul.mubr.f32.gmra.mrb[40].mxu1 %v793_v0  ;;  %896 = vmatprep.mubr.f32.mxu0 %v796_v2 }
 0x129   : > { %1001 = vmatprep.mubr.f32.mxu1 %v798_v5 }
 0x12b   : > { %897 = vmatmul.mubr.f32.gmra.mrb[42].mxu0 %v795_v6 }
 0x12c   : > { %1002 = vmatmul.mubr.f32.gmra.mrb[42].mxu1 %v797_v8  ;;  %901 = vmatprep.mubr.f32.mxu0 %v800_v10 }
 0x12d   : > { %1006 = vmatprep.mubr.f32.mxu1 %v802_v11 }
 0x12f   : > { %902 = vmatmul.mubr.f32.gmra.mrb[44].mxu0 %v799_v12 }
 0x130   : > { %1007 = vmatmul.mubr.f32.gmra.mrb[44].mxu1 %v801_v13  ;;  %906 = vmatprep.mubr.f32.mxu0 %v804_v14 }
 0x131   : > { %1011 = vmatprep.mubr.f32.mxu1 %v806_v15 }
 0x133   : > { %907 = vmatmul.mubr.f32.gmra.mrb[46].mxu0 %v803_v19 }
 0x134   : > { %1012 = vmatmul.mubr.f32.gmra.mrb[46].mxu1 %v805_v38  ;;  %1154 = vmatprep.mubr.f32.mxu0 %v3463_v7 }
 0x135   : > { %1267 = vmatprep.mubr.f32.mxu1 %v3463_v7 }
 0x1ca   : > { %v1923_v57 = vpop.f32.mrb[16].mxu0 }
 0x1cb   : > { %v1979_v59 = vpop.f32.mrb[16].mxu1  ;;  %v1924_v60 = vpop.f32.mrb[17].mxu0 }
 0x1cc   : > { %v1925_v61 = vadd.f32 %v1924_v60, %v1923_v57  ;;  %v1980_v62 = vpop.f32.mrb[17].mxu1 }
 0x1cd   : > { %v1981_v63 = vadd.f32 %v1980_v62, %v1979_v59 }
 0x1ce   : > { %v1926_v0 = vpop.f32.mrb[18].mxu0 }
 0x1cf   : > { %v3085_v2 = vadd.f32 %v1981_v63, %v1925_v61  ;;  %v1982_v5 = vpop.f32.mrb[18].mxu1  ;;  %v1927_v6 = vpop.f32.mrb[19].mxu0 }
 0x1d0   : > { %v1928_v8 = vadd.f32 %v1927_v6, %v1926_v0  ;;  %v1983_v10 = vpop.f32.mrb[19].mxu1 }
 0x1d1   : > { %v1984_v11 = vadd.f32 %v1983_v10, %v1982_v5 }
 0x1d2   : > { %v1929_v12 = vpop.f32.mrb[20].mxu0 }
 0x1d3   : > { %v3087_v13 = vadd.f32 %v1984_v11, %v1928_v8  ;;  %v1985_v14 = vpop.f32.mrb[20].mxu1  ;;  %v1930_v15 = vpop.f32.mrb[21].mxu0 }
 0x1d4   : > { %v1931_v19 = vadd.f32 %v1930_v15, %v1929_v12  ;;  %v1986_v38 = vpop.f32.mrb[21].mxu1 }
 0x1d5   : > { %v1987_v40 = vadd.f32 %v1986_v38, %v1985_v14 }
 0x1d6   : > { %v1932_v41 = vpop.f32.mrb[22].mxu0 }
 0x1d7   : > { %v3089_v42 = vadd.f32 %v1987_v40, %v1931_v19  ;;  %v1988_v45 = vpop.f32.mrb[22].mxu1  ;;  %v1933_v46 = vpop.f32.mrb[23].mxu0 }
 0x1d8   : > { %v1934_v47 = vadd.f32 %v1933_v46, %v1932_v41  ;;  %v1989_v49 = vpop.f32.mrb[23].mxu1 }
 0x1d9   : > { %v1990_v50 = vadd.f32 %v1989_v49, %v1988_v45 }
 0x1da   : > { %v1935_v52 = vpop.f32.mrb[24].mxu0 }
 0x1db   : > { %v3091_v55 = vadd.f32 %v1990_v50, %v1934_v47  ;;  %v1991_v57 = vpop.f32.mrb[24].mxu1  ;;  %v1936_v59 = vpop.f32.mrb[25].mxu0 }
 0x1dc   : > { %v1937_v60 = vadd.f32 %v1936_v59, %v1935_v52  ;;  %v1992_v61 = vpop.f32.mrb[25].mxu1 }
 0x1dd   : > { %v1993_v62 = vadd.f32 %v1992_v61, %v1991_v57 }
 0x1de   : > { %v1938_v63 = vpop.f32.mrb[26].mxu0 }
 0x1df   : > { %v3093_v0 = vadd.f32 %v1993_v62, %v1937_v60  ;;  %v1994_v5 = vpop.f32.mrb[26].mxu1  ;;  %v1939_v6 = vpop.f32.mrb[27].mxu0 }
 0x1e0   : > { %v1940_v8 = vadd.f32 %v1939_v6, %v1938_v63  ;;  %v1995_v10 = vpop.f32.mrb[27].mxu1 }
 0x1e1   : > { %v1996_v11 = vadd.f32 %v1995_v10, %v1994_v5  ;;  %v1017_v10 = vmul.f32 %v3085_v2, %v3085_v2 }
 0x1e2   : > { %v1941_v12 = vpop.f32.mrb[28].mxu0 }
 0x1e3   : > { %v3095_v14 = vadd.f32 %v1996_v11, %v1940_v8  ;;  %v1997_v15 = vpop.f32.mrb[28].mxu1  ;;  %v1942_v19 = vpop.f32.mrb[29].mxu0 }
 0x1e4   : > { %v1943_v38 = vadd.f32 %v1942_v19, %v1941_v12  ;;  %v1998_v40 = vpop.f32.mrb[29].mxu1 }
 0x1e5   : > { %v1999_v41 = vadd.f32 %v1998_v40, %v1997_v15 }
 0x1e6   : > { %v1944_v45 = vpop.f32.mrb[30].mxu0 }
 0x1e7   : > { %v3097_v46 = vadd.f32 %v1999_v41, %v1943_v38  ;;  %v2000_v47 = vpop.f32.mrb[30].mxu1  ;;  %v1945_v49 = vpop.f32.mrb[31].mxu0 }
 0x1e8   : > { %v1946_v50 = vadd.f32 %v1945_v49, %v1944_v45  ;;  %v2001_v52 = vpop.f32.mrb[31].mxu1 }
 0x1e9   : > { %v2002_v57 = vadd.f32 %v2001_v52, %v2000_v47  ;;  %v1018_v47 = vmul.f32 %v3087_v13, %v3087_v13 }
 0x1ea   : > { %v2035_v59 = vpop.f32.mrb[32].mxu0 }
 0x1eb   : > { %v3099_v60 = vadd.f32 %v2002_v57, %v1946_v50  ;;  %v2091_v61 = vpop.f32.mrb[32].mxu1  ;;  %v2036_v62 = vpop.f32.mrb[33].mxu0 }
 0x1ec   : > { %v2037_v63 = vadd.f32 %v2036_v62, %v2035_v59  ;;  %v2092_v5 = vpop.f32.mrb[33].mxu1 }
 0x1ed   : > { %v2093_v6 = vadd.f32 %v2092_v5, %v2091_v61 }
 0x1ee   : > { %v2038_v8 = vpop.f32.mrb[34].mxu0 }
 0x1ef   : > { %v979_v11 = vadd.f32 %v2093_v6, %v2037_v63  ;;  %v2094_v12 = vpop.f32.mrb[34].mxu1  ;;  %v2039_v15 = vpop.f32.mrb[35].mxu0  ;;  %v1019_v6 = vmul.f32 %v3089_v42, %v3089_v42 }
 0x1f0   : > { %v2040_v19 = vadd.f32 %v2039_v15, %v2038_v8  ;;  %v2095_v38 = vpop.f32.mrb[35].mxu1 }
 0x1f1   : > { %v1025_v40 = vsub.f32 %v979_v11, %v1017_v10  ;;  %v2096_v41 = vadd.f32 %v2095_v38, %v2094_v12 }
 0x1f2   : > { %v2041_v45 = vpop.f32.mrb[36].mxu0 }
 0x1f3   : > { %v1033_v49 = vmax.f32 %v1025_v40, 0.0  ;;  %v984_v50 = vadd.f32 %v2096_v41, %v2040_v19  ;;  %v2097_v52 = vpop.f32.mrb[36].mxu1  ;;  %v2042_v57 = vpop.f32.mrb[37].mxu0 }
 0x1f4   : > { %v2043_v59 = vadd.f32 %v2042_v57, %v2041_v45  ;;  %v2098_v61 = vpop.f32.mrb[37].mxu1  ;;  %v1020_v45 = vmul.f32 %v3091_v55, %v3091_v55 }
 0x1f5   : > { %v1041_v62 = vadd.f32 1e-05, %v1033_v49  ;;  %v1026_v5 = vsub.f32 %v984_v50, %v1018_v47  ;;  %v2099_v7 = vadd.f32 %v2098_v61, %v2097_v52 }
 0x1f6   : > { %v2044_v63 = vpop.f32.mrb[38].mxu0 }
 0x1f7   : > { %2317 = vrsqrt.f32 %v1041_v62  ;;  %v1034_v8 = vmax.f32 %v1026_v5, 0.0  ;;  %v989_v10 = vadd.f32 %v2099_v7, %v2043_v59  ;;  %v2100_v11 = vpop.f32.mrb[38].mxu1  ;;  %v2045_v12 = vpop.f32.mrb[39].mxu0 }
 0x1f8   : > { %v2046_v15 = vadd.f32 %v2045_v12, %v2044_v63  ;;  %v2101_v38 = vpop.f32.mrb[39].mxu1  ;;  %v1021_v63 = vmul.f32 %v3093_v0, %v3093_v0 }
 0x1f9   : > { %v1042_v40 = vadd.f32 1e-05, %v1034_v8  ;;  %v1027_v19 = vsub.f32 %v989_v10, %v1019_v6  ;;  %v2102_v41 = vadd.f32 %v2101_v38, %v2100_v11 }
 0x1fa   : > { %v2047_v37 = vpop.f32.mrb[40].mxu0 }
 0x1fb   : > { %2319 = vrsqrt.f32 %v1042_v40  ;;  %v1035_v47 = vmax.f32 %v1027_v19, 0.0  ;;  %v994_v49 = vadd.f32 %v2102_v41, %v2046_v15  ;;  %v2103_v50 = vpop.f32.mrb[40].mxu1  ;;  %v2048_v52 = vpop.f32.mrb[41].mxu0 }
 0x1fc   : > { %v2049_v57 = vadd.f32 %v2048_v52, %v2047_v37  ;;  %v2104_v61 = vpop.f32.mrb[41].mxu1 }
 0x1fd   : > { %v1043_v62 = vadd.f32 1e-05, %v1035_v47  ;;  %v1028_v7 = vsub.f32 %v994_v49, %v1020_v45  ;;  %v2105_v59 = vadd.f32 %v2104_v61, %v2103_v50  ;;  %v1022_v47 = vmul.f32 %v3095_v14, %v3095_v14 }
 0x1fe   : > { %v2050_v5 = vpop.f32.mrb[42].mxu0 }
 0x1ff   : > { %2321 = vrsqrt.f32 %v1043_v62  ;;  %v1036_v6 = vmax.f32 %v1028_v7, 0.0  ;;  %v999_v8 = vadd.f32 %v2105_v59, %v2049_v57  ;;  %v2106_v10 = vpop.f32.mrb[42].mxu1  ;;  %v2051_v11 = vpop.f32.mrb[43].mxu0  ;;  %v3469_v7 = vmov 0.0  }
 0x200   : > { %v2052_v12 = vadd.f32 %v2051_v11, %v2050_v5  ;;  %v2107_v38 = vpop.f32.mrb[43].mxu1 }
 0x201   : > { %v2318_v15 = vpop.eup %2317  ;;  %v1044_v40 = vadd.f32 1e-05, %v1036_v6  ;;  %v1029_v19 = vsub.f32 %v999_v8, %v1021_v63  ;;  %v2108_v37 = vadd.f32 %v2107_v38, %v2106_v10 }
 0x202   : > { %1827 = vmatmul.mubr.msk.f32.vlgmr.msra.gmra.mrb[48].mxu0 %vm1065_vm1, %v2318_v15  ;;  %1835 = vmatmul.mubr.msk.f32.vlgmr.msra.gmra.mrb[48].mxu1 %vm1065_vm1, %v2318_v15  ;;  %v2053_v41 = vpop.f32.mrb[44].mxu0  ;;  %v3114_v45 = vmul.f32 %v2318_v15, %v3085_v2 }
 0x203   : > { %2323 = vrsqrt.f32 %v1044_v40  ;;  %v1037_v49 = vmax.f32 %v1029_v19, 0.0  ;;  %v1004_v50 = vadd.f32 %v2108_v37, %v2052_v12  ;;  %2270 = vmatpush1.bf16.msra.mxu0 %v3073_v51  ;;  %2274 = vmatpush1.bf16.msra.mxu1 %v3081_v56  ;;  %v2109_v52 = vpop.f32.mrb[44].mxu1  ;;  %v2054_v57 = vpop.f32.mrb[45].mxu0  ;;  %v1023_v56 = vmul.f32 %v3097_v46, %v3097_v46 }
 0x204   : > { %v2055_v61 = vadd.f32 %v2054_v57, %v2053_v41  ;;  %v2110_v62 = vpop.f32.mrb[45].mxu1  ;;  %1160 = vmatprep.mubr.f32.mxu0 %v3469_v7  ;;  %1273 = vmatprep.mubr.f32.mxu1 %v3469_v7 }
 0x205   : > { %v2320_v2 = vpop.eup %2319  ;;  %v1045_v59 = vadd.f32 1e-05, %v1037_v49  ;;  %v1030_v5 = vsub.f32 %v1004_v50, %v1022_v47  ;;  %v2111_v63 = vadd.f32 %v2110_v62, %v2109_v52  ;;  %v1024_v47 = vmul.f32 %v3099_v60, %v3099_v60 }
 0x206   : > { %1828 = vmatmul.mubr.msk.f32.gmra.mrb[50].mxu0 %vm1065_vm1, %v2320_v2  ;;  %1836 = vmatmul.mubr.msk.f32.gmra.mrb[50].mxu1 %vm1065_vm1, %v2320_v2  ;;  %v2056_v6 = vpop.f32.mrb[46].mxu0  ;;  %v3125_v51 = vmul.f32 %v2320_v2, %v3087_v13 }
 0x207   : > { %2325 = vrsqrt.f32 %v1045_v59  ;;  %v1038_v8 = vmax.f32 %v1030_v5, 0.0  ;;  %v1009_v10 = vadd.f32 %v2111_v63, %v2055_v61  ;;  %v2112_v11 = vpop.f32.mrb[46].mxu1  ;;  %v2057_v12 = vpop.f32.mrb[47].mxu0  ;;  %1166 = vmatprep.mubr.f32.mxu0 %v3469_v7  ;;  %1279 = vmatprep.mubr.f32.mxu1 %v3469_v7 }
 0x208   : > { %v2058_v38 = vadd.f32 %v2057_v12, %v2056_v6  ;;  %v2113_v15 = vpop.f32.mrb[47].mxu1 }
 0x209   : > { %v2322_v40 = vpop.eup %2321  ;;  %v1046_v19 = vadd.f32 1e-05, %v1038_v8  ;;  %v1031_v37 = vsub.f32 %v1009_v10, %v1023_v56  ;;  %v2114_v41 = vadd.f32 %v2113_v15, %v2112_v11 }
 0x20a   : > { %1829 = vmatmul.mubr.msk.f32.gmra.mrb[52].mxu0 %vm1065_vm1, %v2322_v40  ;;  %1837 = vmatmul.mubr.msk.f32.gmra.mrb[52].mxu1 %vm1065_vm1, %v2322_v40  ;;  %v1318_v13 = vmul.f32 %v2322_v40, %v3089_v42 }
 0x20b   : > { %2327 = vrsqrt.f32 %v1046_v19  ;;  %v1039_v49 = vmax.f32 %v1031_v37, 0.0  ;;  %v1014_v50 = vadd.f32 %v2114_v41, %v2058_v38  ;;  %1172 = vmatprep.mubr.f32.mxu0 %v3469_v7  ;;  %1285 = vmatprep.mubr.f32.mxu1 %v3469_v7 }
 0x20d   : > { %v2324_v52 = vpop.eup %2323  ;;  %v1047_v57 = vadd.f32 1e-05, %v1039_v49  ;;  %v1032_v61 = vsub.f32 %v1014_v50, %v1024_v47 }
 0x20e   : > { %1830 = vmatmul.mubr.msk.f32.gmra.mrb[54].mxu0 %vm1065_vm1, %v2324_v52  ;;  %1838 = vmatmul.mubr.msk.f32.gmra.mrb[54].mxu1 %vm1065_vm1, %v2324_v52  ;;  %v1319_v62 = vmul.f32 %v2324_v52, %v3091_v55 }
 0x20f   : > { %2329 = vrsqrt.f32 %v1047_v57  ;;  %v1040_v42 = vmax.f32 %v1032_v61, 0.0  ;;  %1178 = vmatprep.mubr.f32.mxu0 %v3469_v7  ;;  %1291 = vmatprep.mubr.f32.mxu1 %v3469_v7 }
 0x211   : > { %v2326_v2 = vpop.eup %2325  ;;  %v1048_v59 = vadd.f32 1e-05, %v1040_v42 }
 0x212   : > { %1831 = vmatmul.mubr.msk.f32.gmra.mrb[56].mxu0 %vm1065_vm1, %v2326_v2  ;;  %1839 = vmatmul.mubr.msk.f32.gmra.mrb[56].mxu1 %vm1065_vm1, %v2326_v2  ;;  %v1320_v5 = vmul.f32 %v2326_v2, %v3093_v0 }
 0x213   : > { %2331 = vrsqrt.f32 %v1048_v59  ;;  %1184 = vmatprep.mubr.f32.mxu0 %v3469_v7  ;;  %1297 = vmatprep.mubr.f32.mxu1 %v3469_v7 }
 0x215   : > { %v2328_v55 = vpop.eup %2327 }
 0x216   : > { %1832 = vmatmul.mubr.msk.f32.gmra.mrb[58].mxu0 %vm1065_vm1, %v2328_v55  ;;  %1840 = vmatmul.mubr.msk.f32.gmra.mrb[58].mxu1 %vm1065_vm1, %v2328_v55  ;;  %v1321_v63 = vmul.f32 %v2328_v55, %v3095_v14 }
 0x217   : > { %1190 = vmatprep.mubr.f32.mxu0 %v3469_v7  ;;  %1303 = vmatprep.mubr.f32.mxu1 %v3469_v7 }
 0x219   : > { %v2330_v6 = vpop.eup %2329 }
 0x21a   : > { %1833 = vmatmul.mubr.msk.f32.gmra.mrb[60].mxu0 %vm1065_vm1, %v2330_v6  ;;  %1841 = vmatmul.mubr.msk.f32.gmra.mrb[60].mxu1 %vm1065_vm1, %v2330_v6  ;;  %v1322_v0 = vmul.f32 %v2330_v6, %v3097_v46 }
 0x21b   : > { %1196 = vmatprep.mubr.f32.mxu0 %v3469_v7  ;;  %1309 = vmatprep.mubr.f32.mxu1 %v3469_v7 }
 0x21d   : > { %v2332_v56 = vpop.eup %2331 }
 0x21e   : > { %1834 = vmatmul.mubr.msk.f32.gmra.mrb[62].mxu0 %vm1065_vm1, %v2332_v56  ;;  %1842 = vmatmul.mubr.msk.f32.gmra.mrb[62].mxu1 %vm1065_vm1, %v2332_v56  ;;  %v1323_v14 = vmul.f32 %v2332_v56, %v3099_v60 }
 0x21f   : > { %1412 = vmatprep.mubr.f32.mxu0 %v3469_v7  ;;  %1525 = vmatprep.mubr.f32.mxu1 %v3469_v7 }
 0x222   : > { %1843 = vmatmul.mubr.msk.f32.vlgmr.msra.gmra.mrb[64].mxu0 %vm1065_vm1, %v3114_v45  ;;  %1851 = vmatmul.mubr.msk.f32.vlgmr.msra.gmra.mrb[64].mxu1 %vm1065_vm1, %v3114_v45 }
 0x223   : > { %1418 = vmatprep.mubr.f32.mxu0 %v3469_v7  ;;  %1531 = vmatprep.mubr.f32.mxu1 %v3469_v7 }
 0x226   : > { %1844 = vmatmul.mubr.msk.f32.gmra.mrb[66].mxu0 %vm1065_vm1, %v3125_v51  ;;  %1852 = vmatmul.mubr.msk.f32.gmra.mrb[66].mxu1 %vm1065_vm1, %v3125_v51 }
 0x227   : > { %1424 = vmatprep.mubr.f32.mxu0 %v3469_v7  ;;  %1537 = vmatprep.mubr.f32.mxu1 %v3469_v7 }
 0x22a   : > { %1845 = vmatmul.mubr.msk.f32.gmra.mrb[68].mxu0 %vm1065_vm1, %v1318_v13  ;;  %1853 = vmatmul.mubr.msk.f32.gmra.mrb[68].mxu1 %vm1065_vm1, %v1318_v13 }
 0x22b   : > { %1430 = vmatprep.mubr.f32.mxu0 %v3469_v7  ;;  %1543 = vmatprep.mubr.f32.mxu1 %v3469_v7 }
 0x22e   : > { %1846 = vmatmul.mubr.msk.f32.gmra.mrb[70].mxu0 %vm1065_vm1, %v1319_v62  ;;  %1854 = vmatmul.mubr.msk.f32.gmra.mrb[70].mxu1 %vm1065_vm1, %v1319_v62 }
 0x22f   : > { %1436 = vmatprep.mubr.f32.mxu0 %v3469_v7  ;;  %1549 = vmatprep.mubr.f32.mxu1 %v3469_v7 }
 0x232   : > { %1847 = vmatmul.mubr.msk.f32.gmra.mrb[72].mxu0 %vm1065_vm1, %v1320_v5  ;;  %1855 = vmatmul.mubr.msk.f32.gmra.mrb[72].mxu1 %vm1065_vm1, %v1320_v5 }
 0x233   : > { %1442 = vmatprep.mubr.f32.mxu0 %v3469_v7  ;;  %1555 = vmatprep.mubr.f32.mxu1 %v3469_v7 }
 0x236   : > { %1848 = vmatmul.mubr.msk.f32.gmra.mrb[74].mxu0 %vm1065_vm1, %v1321_v63  ;;  %1856 = vmatmul.mubr.msk.f32.gmra.mrb[74].mxu1 %vm1065_vm1, %v1321_v63 }
 0x237   : > { %1448 = vmatprep.mubr.f32.mxu0 %v3469_v7  ;;  %1561 = vmatprep.mubr.f32.mxu1 %v3469_v7 }
 0x23a   : > { %1849 = vmatmul.mubr.msk.f32.gmra.mrb[76].mxu0 %vm1065_vm1, %v1322_v0  ;;  %1857 = vmatmul.mubr.msk.f32.gmra.mrb[76].mxu1 %vm1065_vm1, %v1322_v0 }
 0x23b   : > { %1454 = vmatprep.mubr.f32.mxu0 %v3469_v7  ;;  %1567 = vmatprep.mubr.f32.mxu1 %v3469_v7 }
 0x23e   : > { %1850 = vmatmul.mubr.msk.f32.gmra.mrb[78].mxu0 %vm1065_vm1, %v1323_v14  ;;  %1858 = vmatmul.mubr.msk.f32.gmra.mrb[78].mxu1 %vm1065_vm1, %v1323_v14 }
 0x2d5   : > { %v1156_v46 = vpop.f32.mrb[48].mxu0  ;;  %v1269_v60 = vpop.f32.mrb[48].mxu1 }
 0x2d6   : > { %v3198_v45 = vmul.f32 %v1156_v46, %v2863_v20  ;;  %v3201_v51 = vmul.f32 %v1269_v60, %v2865_v21  ;;  %v1158_v8 = vpop.f32.mrb[49].mxu0  ;;  %v1271_v10 = vpop.f32.mrb[49].mxu1 }
 0x2d7   : > { %v3204_v11 = vmul.f32 %v1158_v8, %v2867_v23  ;;  %v3207_v12 = vmul.f32 %v1271_v10, %v2869_v24 }
 0x2d9   : > { %v1162_v7 = vpop.f32.mrb[50].mxu0  ;;  %v1275_v38 = vpop.f32.mrb[50].mxu1 }
 0x2da   : > { %v3210_v15 = vmul.f32 %v1162_v7, %v2876_v27  ;;  %v3213_v40 = vmul.f32 %v1275_v38, %v2879_v30  ;;  %v1164_v20 = vpop.f32.mrb[51].mxu0  ;;  %v1277_v19 = vpop.f32.mrb[51].mxu1 }
 0x2db   : > { %v3216_v21 = vmul.f32 %v1164_v20, %v2881_v25  ;;  %v3219_v37 = vmul.f32 %v1277_v19, %v2884_v26 }
 0x2dd   : > { %v1168_v23 = vpop.f32.mrb[52].mxu0  ;;  %v1281_v41 = vpop.f32.mrb[52].mxu1 }
 0x2de   : > { %v3222_v24 = vmul.f32 %v1168_v23, %v2892_v35  ;;  %v3225_v13 = vmul.f32 %v1281_v41, %v2895_v39  ;;  %v1170_v27 = vpop.f32.mrb[53].mxu0  ;;  %v1283_v47 = vpop.f32.mrb[53].mxu1  ;;  %v3470_v41 = vld [vmem:[#allocation5_spill] sm:$0xff] }
 0x2df   : > { %v3228_v30 = vmul.f32 %v1170_v27, %v2897_v43  ;;  %v3231_v49 = vmul.f32 %v1283_v47, %v2900_v28 }
 0x2e1   : > { %v1174_v25 = vpop.f32.mrb[54].mxu0  ;;  %v1287_v50 = vpop.f32.mrb[54].mxu1 }
 0x2e2   : > { %v3234_v26 = vmul.f32 %v1174_v25, %v2908_v44  ;;  %v3237_v52 = vmul.f32 %v1287_v50, %v2911_v48  ;;  %v1176_v35 = vpop.f32.mrb[55].mxu0  ;;  %v1289_v57 = vpop.f32.mrb[55].mxu1 }
 0x2e3   : > { %v3240_v39 = vmul.f32 %v1176_v35, %v2913_v53  ;;  %v3243_v61 = vmul.f32 %v1289_v57, %v2916_v54  ;;  %v1640_v53 = vlaneseq }
 0x2e5   : > { %v1180_v43 = vpop.f32.mrb[56].mxu0  ;;  %v1293_v62 = vpop.f32.mrb[56].mxu1 }
 0x2e6   : > { %v3246_v28 = vmul.f32 %v1180_v43, %v2924_v58  ;;  %v3249_v42 = vmul.f32 %v1293_v62, %v2927_v1  ;;  %v1182_v44 = vpop.f32.mrb[57].mxu0  ;;  %v1295_v2 = vpop.f32.mrb[57].mxu1 }
 0x2e7   : > { %v3252_v48 = vmul.f32 %v1182_v44, %v2929_v3  ;;  %v3255_v59 = vmul.f32 %v1295_v2, %v2932_v4  ;;  %v1641_v4 = vshrl.u32 %v1640_v53, 7 }
 0x2e9   : > { %v1186_v5 = vpop.f32.mrb[58].mxu0  ;;  %v1299_v54 = vpop.f32.mrb[58].mxu1  ;;  %v1650_v8 = vsub.s32 2, %v1641_v4  ;;  %v1654_v38 = vsub.s32 3, %v1641_v4 }
 0x2ea   : > { %v3258_v55 = vmul.f32 %v1186_v5, %v2940_v9  ;;  %v3261_v58 = vmul.f32 %v1299_v54, %v2943_v16  ;;  %v1188_v1 = vpop.f32.mrb[59].mxu0  ;;  %v1301_v63 = vpop.f32.mrb[59].mxu1 }
 0x2eb   : > { %v3264_v6 = vmul.f32 %v1188_v1, %v2945_v17  ;;  %v3267_v3 = vmul.f32 %v1301_v63, %v2948_v18  ;;  %v1642_v18 = vsub.s32 0, %v1641_v4 }
 0x2ed   : > { %v1192_v0 = vpop.f32.mrb[60].mxu0  ;;  %v1305_v56 = vpop.f32.mrb[60].mxu1 }
 0x2ee   : > { %v3270_v14 = vmul.f32 %v1192_v0, %v2956_v22  ;;  %v3273_v9 = vmul.f32 %v1305_v56, %v2959_v29  ;;  %v1194_v46 = vpop.f32.mrb[61].mxu0  ;;  %v1307_v16 = vpop.f32.mrb[61].mxu1  ;;  %v1638_v22 = vld [vmem:[%s3461_s4] sm:$0xf]  ;;  %v1646_v29 = vsub.s32 1, %v1641_v4 }
 0x2ef   : > { %v3276_v60 = vmul.f32 %v1194_v46, %v2961_v31  ;;  %v3279_v17 = vmul.f32 %v1307_v16, %v2964_v32  ;;  %v3299_v47 = vrot.slane %v1638_v22, %v1642_v18  ;;  %v3301_v25 = vrot.slane %v1638_v22, %v1650_v8 }
 0x2f0   : > { %v3303_v35 = vrot.slane %v1638_v22, %v1646_v29 }
 0x2f1   : > { %v1198_v10 = vpop.f32.mrb[62].mxu0  ;;  %v1311_v7 = vpop.f32.mrb[62].mxu1 }
 0x2f2   : > { %v3286_v20 = vmul.f32 %v1198_v10, %v2972_v33  ;;  %v3289_v31 = vmul.f32 %v1311_v7, %v2975_v34  ;;  %v1200_v19 = vpop.f32.mrb[63].mxu0  ;;  %v1313_v32 = vpop.f32.mrb[63].mxu1  ;;  %v3305_v34 = vrot.slane %v1638_v22, %v1654_v38 }
 0x2f3   : > { %v3292_v23 = vmul.f32 %v1200_v19, %v2977_v36  ;;  %v3295_v27 = vmul.f32 %v1313_v32, %v3470_v41 }
 0x2f5   : > { %v1414_v50 = vpop.f32.mrb[64].mxu0  ;;  %v1527_v33 = vpop.f32.mrb[64].mxu1 }
 0x2f6   : > { %v1606_v57 = vsub.f32 %v3198_v45, %v1414_v50  ;;  %v1608_v36 = vsub.f32 %v3201_v51, %v1527_v33  ;;  %v1416_v43 = vpop.f32.mrb[65].mxu0  ;;  %v1529_v62 = vpop.f32.mrb[65].mxu1 }
 0x2f7   : > { %v1607_v44 = vsub.f32 %v3204_v11, %v1416_v43  ;;  %v1609_v2 = vsub.f32 %v3207_v12, %v1529_v62 }
 0x2f8   : > { %v1660_v53 = vadd.f32 %v3299_v47, %v1606_v57  ;;  %v1662_v5 = vadd.f32 %v3301_v25, %v1608_v36 }
 0x2f9   : > { %v1661_v54 = vadd.f32 %v3303_v35, %v1607_v44  ;;  %v1663_v1 = vadd.f32 %v3305_v34, %v1609_v2  ;;  %v1420_v63 = vpop.f32.mrb[66].mxu0  ;;  %v1533_v4 = vpop.f32.mrb[66].mxu1 }
 0x2fa   : > { %1692 = vst [vmem:[%s3315_s6] sm:$0xff] %v1660_v53  ;;  %1867 = vst [vmem:[%s3315_s6 + $0x10] sm:$0xff] %v1662_v5  ;;  %v1610_v45 = vsub.f32 %v3210_v15, %v1420_v63  ;;  %v1612_v51 = vsub.f32 %v3213_v40, %v1533_v4  ;;  %v1422_v11 = vpop.f32.mrb[67].mxu0  ;;  %v1535_v12 = vpop.f32.mrb[67].mxu1 }
 0x2fb   : > { %1859 = vst [vmem:[%s3315_s6 + $0x8] sm:$0xff] %v1661_v54  ;;  %1875 = vst [vmem:[%s3315_s6 + $0x18] sm:$0xff] %v1663_v1  ;;  %v1611_v0 = vsub.f32 %v3216_v21, %v1422_v11  ;;  %v1613_v56 = vsub.f32 %v3219_v37, %v1535_v12 }
 0x2fc   : > { %v1664_v46 = vadd.f32 %v3299_v47, %v1610_v45  ;;  %v1666_v16 = vadd.f32 %v3301_v25, %v1612_v51 }
 0x2fd   : > { %v1665_v18 = vadd.f32 %v3303_v35, %v1611_v0  ;;  %v1667_v15 = vadd.f32 %v3305_v34, %v1613_v56  ;;  %v1426_v8 = vpop.f32.mrb[68].mxu0  ;;  %v1539_v40 = vpop.f32.mrb[68].mxu1 }
 0x2fe   : > { %1693 = vst [vmem:[%s3315_s6 + $0x20] sm:$0xff] %v1664_v46  ;;  %1868 = vst [vmem:[%s3315_s6 + $0x30] sm:$0xff] %v1666_v16  ;;  %v1614_v10 = vsub.f32 %v3222_v24, %v1426_v8  ;;  %v1616_v21 = vsub.f32 %v3225_v13, %v1539_v40  ;;  %v1428_v7 = vpop.f32.mrb[69].mxu0  ;;  %v1541_v37 = vpop.f32.mrb[69].mxu1 }
 0x2ff   : > { %1860 = vst [vmem:[%s3315_s6 + $0x28] sm:$0xff] %v1665_v18  ;;  %1876 = vst [vmem:[%s3315_s6 + $0x38] sm:$0xff] %v1667_v15  ;;  %v1615_v22 = vsub.f32 %v3228_v30, %v1428_v7  ;;  %v1617_v29 = vsub.f32 %v3231_v49, %v1541_v37 }
 0x300   : > { %v1668_v38 = vadd.f32 %v3299_v47, %v1614_v10  ;;  %v1670_v19 = vadd.f32 %v3301_v25, %v1616_v21 }
 0x301   : > { %v1669_v32 = vadd.f32 %v3303_v35, %v1615_v22  ;;  %v1671_v24 = vadd.f32 %v3305_v34, %v1617_v29  ;;  %v1432_v41 = vpop.f32.mrb[70].mxu0  ;;  %v1545_v13 = vpop.f32.mrb[70].mxu1 }
 0x302   : > { %1694 = vst [vmem:[%s3315_s6 + $0x40] sm:$0xff] %v1668_v38  ;;  %1869 = vst [vmem:[%s3315_s6 + $0x50] sm:$0xff] %v1670_v19  ;;  %v1618_v50 = vsub.f32 %v3234_v26, %v1432_v41  ;;  %v1620_v30 = vsub.f32 %v3237_v52, %v1545_v13  ;;  %v1434_v33 = vpop.f32.mrb[71].mxu0  ;;  %v1547_v49 = vpop.f32.mrb[71].mxu1 }
 0x303   : > { %1861 = vst [vmem:[%s3315_s6 + $0x48] sm:$0xff] %v1669_v32  ;;  %1877 = vst [vmem:[%s3315_s6 + $0x58] sm:$0xff] %v1671_v24  ;;  %v1619_v57 = vsub.f32 %v3240_v39, %v1434_v33  ;;  %v1621_v36 = vsub.f32 %v3243_v61, %v1547_v49 }
 0x304   : > { %v1672_v43 = vadd.f32 %v3299_v47, %v1618_v50  ;;  %v1674_v62 = vadd.f32 %v3301_v25, %v1620_v30 }
 0x305   : > { %v1673_v44 = vadd.f32 %v3303_v35, %v1619_v57  ;;  %v1675_v26 = vadd.f32 %v3305_v34, %v1621_v36  ;;  %v1438_v2 = vpop.f32.mrb[72].mxu0  ;;  %v1551_v52 = vpop.f32.mrb[72].mxu1 }
 0x306   : > { %1695 = vst [vmem:[%s3315_s6 + $0x60] sm:$0xff] %v1672_v43  ;;  %1870 = vst [vmem:[%s3315_s6 + $0x70] sm:$0xff] %v1674_v62  ;;  %v1622_v53 = vsub.f32 %v3246_v28, %v1438_v2  ;;  %v1624_v39 = vsub.f32 %v3249_v42, %v1551_v52  ;;  %v1440_v5 = vpop.f32.mrb[73].mxu0  ;;  %v1553_v61 = vpop.f32.mrb[73].mxu1 }
 0x307   : > { %1862 = vst [vmem:[%s3315_s6 + $0x68] sm:$0xff] %v1673_v44  ;;  %1878 = vst [vmem:[%s3315_s6 + $0x78] sm:$0xff] %v1675_v26  ;;  %v1623_v54 = vsub.f32 %v3252_v48, %v1440_v5  ;;  %v1625_v1 = vsub.f32 %v3255_v59, %v1553_v61 }
 0x308   : > { %v1676_v63 = vadd.f32 %v3299_v47, %v1622_v53  ;;  %v1678_v4 = vadd.f32 %v3301_v25, %v1624_v39 }
 0x309   : > { %v1677_v45 = vadd.f32 %v3303_v35, %v1623_v54  ;;  %v1679_v28 = vadd.f32 %v3305_v34, %v1625_v1  ;;  %v1444_v51 = vpop.f32.mrb[74].mxu0  ;;  %v1557_v42 = vpop.f32.mrb[74].mxu1 }
 0x30a   : > { %1696 = vst [vmem:[%s3315_s6 + $0x80] sm:$0xff] %v1676_v63  ;;  %1871 = vst [vmem:[%s3315_s6 + $0x90] sm:$0xff] %v1678_v4  ;;  %v1626_v11 = vsub.f32 %v3258_v55, %v1444_v51  ;;  %v1628_v48 = vsub.f32 %v3261_v58, %v1557_v42  ;;  %v1446_v12 = vpop.f32.mrb[75].mxu0  ;;  %v1559_v59 = vpop.f32.mrb[75].mxu1 }
 0x30b   : > { %1863 = vst [vmem:[%s3315_s6 + $0x88] sm:$0xff] %v1677_v45  ;;  %1879 = vst [vmem:[%s3315_s6 + $0x98] sm:$0xff] %v1679_v28  ;;  %v1627_v0 = vsub.f32 %v3264_v6, %v1446_v12  ;;  %v1629_v56 = vsub.f32 %v3267_v3, %v1559_v59 }
 0x30c   : > { %v1680_v46 = vadd.f32 %v3299_v47, %v1626_v11  ;;  %v1682_v16 = vadd.f32 %v3301_v25, %v1628_v48 }
 0x30d   : > { %v1681_v18 = vadd.f32 %v3303_v35, %v1627_v0  ;;  %v1683_v55 = vadd.f32 %v3305_v34, %v1629_v56  ;;  %v1450_v15 = vpop.f32.mrb[76].mxu0  ;;  %v1563_v58 = vpop.f32.mrb[76].mxu1 }
 0x30e   : > { %1697 = vst [vmem:[%s3315_s6 + $0xa0] sm:$0xff] %v1680_v46  ;;  %1872 = vst [vmem:[%s3315_s6 + $0xb0] sm:$0xff] %v1682_v16  ;;  %v1630_v8 = vsub.f32 %v3270_v14, %v1450_v15  ;;  %v1632_v6 = vsub.f32 %v3273_v9, %v1563_v58  ;;  %v1452_v3 = vpop.f32.mrb[77].mxu0  ;;  %v1565_v40 = vpop.f32.mrb[77].mxu1 }
 0x30f   : > { %1864 = vst [vmem:[%s3315_s6 + $0xa8] sm:$0xff] %v1681_v18  ;;  %1880 = vst [vmem:[%s3315_s6 + $0xb8] sm:$0xff] %v1683_v55  ;;  %v1631_v10 = vsub.f32 %v3276_v60, %v1452_v3  ;;  %v1633_v21 = vsub.f32 %v3279_v17, %v1565_v40 }
 0x310   : > { %v1684_v7 = vadd.f32 %v3299_v47, %v1630_v8  ;;  %v1686_v37 = vadd.f32 %v3301_v25, %v1632_v6 }
 0x311   : > { %v1685_v14 = vadd.f32 %v3303_v35, %v1631_v10  ;;  %v1687_v22 = vadd.f32 %v3305_v34, %v1633_v21  ;;  %v1456_v9 = vpop.f32.mrb[78].mxu0  ;;  %v1569_v29 = vpop.f32.mrb[78].mxu1 }
 0x312   : > { %1698 = vst [vmem:[%s3315_s6 + $0xc0] sm:$0xff] %v1684_v7  ;;  %1873 = vst [vmem:[%s3315_s6 + $0xd0] sm:$0xff] %v1686_v37  ;;  %v1634_v60 = vsub.f32 %v3286_v20, %v1456_v9  ;;  %v1636_v17 = vsub.f32 %v3289_v31, %v1569_v29  ;;  %v1458_v38 = vpop.f32.mrb[79].mxu0  ;;  %v1571_v19 = vpop.f32.mrb[79].mxu1 }
 0x313   : > { %1865 = vst [vmem:[%s3315_s6 + $0xc8] sm:$0xff] %v1685_v14  ;;  %1881 = vst [vmem:[%s3315_s6 + $0xd8] sm:$0xff] %v1687_v22  ;;  %v1635_v32 = vsub.f32 %v3292_v23, %v1458_v38  ;;  %v1637_v24 = vsub.f32 %v3295_v27, %v1571_v19 }
 0x314   : > { %v1688_v41 = vadd.f32 %v3299_v47, %v1634_v60  ;;  %v1690_v13 = vadd.f32 %v3301_v25, %v1636_v17 }
 0x315   : > { %v1689_v20 = vadd.f32 %v3303_v35, %v1635_v32  ;;  %v1691_v31 = vadd.f32 %v3305_v34, %v1637_v24 }
 0x316   : > { %1699 = vst [vmem:[%s3315_s6 + $0xe0] sm:$0xff] %v1688_v41  ;;  %1874 = vst [vmem:[%s3315_s6 + $0xf0] sm:$0xff] %v1690_v13 }
 0x317   : > { %1866 = vst [vmem:[%s3315_s6 + $0xe8] sm:$0xff] %v1689_v20  ;;  %1882 = vst [vmem:[%s3315_s6 + $0xf8] sm:$0xff] %v1691_v31 }
 0x318   : > { %2346 = shalt.err (!%p2343_p3)
}
 0x319   : > { %s2347_s17 = scalar_lea.hbm %s3404_s10, 4096  ;;  %s2351_s25 = scalar_lea.hbm %s3462_s5, 8192 }
 0x31a   : > { %p2348_p4 = scmp.ne.s32.totalorder %s3404_s10, %s2347_s17  ;;  %p2352_p9 = scmp.lt.u32.totalorder %s3404_s10, %s3462_s5 }
 0x31b   : > { %p2353_p10 = scmp.lt.u32.totalorder %s2351_s25, %s2347_s17  ;;  %p2355_p12 = scmp.lt.u32.totalorder %s2347_s17, %s3404_s10 }
 0x31c   : > { %p2349_p7 = pnand %p2348_p4, %p2469_p5 }
 0x31d   : > { %p2354_p11 = por %p2353_p10, %p2352_p9 }
 0x31e   : > { %p2350_p8 = pneg %p2349_p7 }
 0x31f   : > { %p2356_p13 = por %p2355_p12, %p2354_p11 }
 0x321   : > { %p2357_p0 = pnand %p2356_p13, %p2350_p8 }
 0x323   : > { %2360 = shalt.err (!%p2357_p0)
}
 0x324   : > { %s2399_s6 = smov 128   ;;  %s2400_s7 = smov 8  }
 0x325   : > { %2275 = dma.vmem_to_hbm [thread:$0]  (%p2469_p5), %s3406_s8, 4096, %s3404_s10, %s3416_s12, %s2399_s6, %s2399_s6, %s2400_s7  }
 0x326 PF: > { %p2281_p1 = scmp.ge.s32.totalorder %s2395_s21, 2  ;;  %s1757_s22 = sand.u32 1, %s2383_s18  }
 0x327   : > { %s1758_s9 = scalar_lea.sflag [#allocation3], %s1757_s22 }
 0x328   : > { %p2278_p2 = pnand %p2281_p1, %p2473_p6 }
 0x32a   : > { %2378 = dma.done.wait (!%p2278_p2), %s1758_s9, 4096  }
 0x32b   : > { %2380 = vsyncadd (!%p2278_p2), %s1758_s9, 4294963200  ;;  %p15_p3 = scmp.ge.s32.totalorder %s2456_s24, 4   ;;  %s3471_s18 = smov %s2387_s19 }
 0x32c   : > { %s3472_s19 = smov %s2391_s20  ;;  %s3473_s20 = smov %s2467_s27 }
 0x32d   : > { %s3474_s21 = smov %s2456_s24  ;;  %17 = sbr.rel (!%p15_p3) target bundleno = 3 (0x3), region = 78 }
 0x334   :  { %1763 = vsyncpa [#allocation3], 1 }
 0x335   :  { %1765 = vsyncpa [#allocation3 + $0x1], 1 }

// kernel: tpu_custom_call.1
= control target key start
LH: loop header
LB: loop body
LE: loop exit
PB: predicated region body
PF: predicated region fallthrough
CT: control target
= control target key end

     0   :  { %10 = vsyncpa [#allocation3], 0  ;;  %s3457_s0 = inlined_call_operand.vmem [shape: f32[128,32], index: 0, kind: input, shape index: {}]   ;;  %s3458_s1 = inlined_call_operand.vmem [shape: f32[32,512], index: 1, kind: input, shape index: {}]   ;;  %s3459_s2 = inlined_call_operand.vmem [shape: f32[512,16], index: 2, kind: input, shape index: {}]   ;;  %s3460_s3 = inlined_call_operand.vmem [shape: f32[16,512], index: 3, kind: input, shape index: {}]   ;;  %s3461_s4 = inlined_call_operand.vmem [shape: f32[1,512], index: 4, kind: input, shape index: {}]   ;;  %s3462_s5 = inlined_call_operand.hbm [shape: f32[16,4,8,128], index: 5, kind: output, shape index: {}]  }
   0x1   :  { %12 = vsyncpa [#allocation3 + $0x1], 0  ;;  %s2431_s18 = smov 0   ;;  %s2433_s19 = smov 0  }
   0x2   :  { %s2435_s20 = smov 0   ;;  %s2437_s21 = smov 0  }
   0x3 LB: > { %s2452_s22 = sadd.s32 4294967295, %s2395_s21   ;;  %s1804_s23 = sadd.s32 4294967294, %s2395_s21   ;;  %s2395_s21 = sphi %s2437_s21, %s3474_s21   ;;  %s2391_s20 = sphi %s2435_s20, %s3473_s20   ;;  %s2387_s19 = sphi %s2433_s19, %s3472_s19   ;;  %s2383_s18 = sphi %s2431_s18, %s3471_s18  }
   0x4   : > { %s2456_s24 = sadd.s32 1, %s2395_s21   ;;  %s135_s25 = sadd.s32 1, %s2391_s20 }
   0x5   : > { %s132_s26 = ssub.s32 %s2395_s21, %s2456_s24  ;;  %p145_p0 = scmp.ne.s32.totalorder %s2391_s20, %s2387_s19 }
   0x6   : > { %p133_p1 = scmp.eq.s32.totalorder %s132_s26, 0  ;;  %p146_p2 = scmp.eq.s32.totalorder %s2452_s22, 1 }
   0x7   : > { %p151_p3 = scmp.ne.s32.totalorder %s2387_s19, %s2383_s18  ;;  %p152_p4 = scmp.eq.s32.totalorder %s1804_s23, 1 }
   0x8   : > { %s2467_s27 = scalar_select %p133_p1, %s2391_s20, %s135_s25  }
   0x9   : > { %p2469_p5 = por %p146_p2, %p145_p0  ;;  %p2473_p6 = por %p152_p4, %p151_p3 }
   0xa   : > { %p1807_p7 = scmp.ge.s32.totalorder %s2395_s21, 1  ;;  %p191_p8 = scmp.lt.s32.totalorder %s2395_s21, 3 }
   0xc   : > { %p192_p9 = pnand %p1807_p7, %p191_p8 }
   0xe   : > { %195 = sbr.rel (%p192_p9) target bundleno = 806 (0x326), region = 40 }
  0x15   : > { %v235_v0 = vld [vmem:[%s3458_s1 + $0x8] sm:$0xff]  ;;  %v237_v2 = vld [vmem:[%s3458_s1 + $0x18] sm:$0xff]  ;;  %s1809_s11 = sshll.u32 %s2452_s22, 3  ;;  %v234_v5 = vld [vmem:[%s3458_s1] sm:$0xff]  ;;  %v3463_v7 = vmov 0.0   ;;  %vm250_vm0 = vcmask 261120  }
  0x16   : > { %v239_v1 = vld [vmem:[%s3458_s1 + $0x28] sm:$0xff]  ;;  %v241_v4 = vld [vmem:[%s3458_s1 + $0x38] sm:$0xff]  ;;  %v238_v6 = vld [vmem:[%s3458_s1 + $0x20] sm:$0xff]  ;;  %339 = vmatprep.mubr.f32.mxu0 %v3463_v7  ;;  %452 = vmatprep.mubr.f32.mxu1 %v3463_v7  ;;  %p220_p10 = scmp.lt.s32.totalorder %s1809_s11, 15  ;;  %vm1065_vm1 = vcmask 130048   ;;  %s2398_s14 = smov [#allocation2]  }
  0x17   : > { %v2115_v3 = vpack.c.bf16 %v239_v1, %v235_v0  ;;  %v2123_v8 = vpack.c.bf16 %v241_v4, %v237_v2  ;;  %v2117_v9 = vpack.c.bf16 %v238_v6, %v234_v5  ;;  %v236_v10 = vld [vmem:[%s3458_s1 + $0x10] sm:$0xff]  ;;  %v243_v12 = vld [vmem:[%s3458_s1 + $0x48] sm:$0xff]  ;;  %v245_v15 = vld [vmem:[%s3458_s1 + $0x58] sm:$0xff] }
  0x18   : > { %v240_v11 = vld [vmem:[%s3458_s1 + $0x30] sm:$0xff]  ;;  %v247_v14 = vld [vmem:[%s3458_s1 + $0x68] sm:$0xff]  ;;  %v249_v16 = vld [vmem:[%s3458_s1 + $0x78] sm:$0xff]  ;;  %s3476_s11 = smov (!%p220_p10, %s1809_s11), 15 }
  0x19   : > { %2116 = vmatprep.subr.bf16.mxu0 %v2115_v3  ;;  %v2125_v13 = vpack.c.bf16 %v240_v11, %v236_v10  ;;  %2124 = vmatprep.subr.bf16.mxu1 %v2123_v8  ;;  %v2119_v17 = vpack.c.bf16 %v247_v14, %v243_v12  ;;  %v2127_v18 = vpack.c.bf16 %v249_v16, %v245_v15  ;;  %v242_v19 = vld [vmem:[%s3458_s1 + $0x40] sm:$0xff]  ;;  %v244_v21 = vld [vmem:[%s3458_s1 + $0x50] sm:$0xff]  ;;  %s1810_s7 = sshll.u32 %s3476_s11, 3  ;;  %v518_v25 = vld [vmem:[%s3459_s2 + $0x88] sm:$0xff]  ;;  %s2337_s11 = sshll.u32 %s2398_s14, 4  ;;  %s2338_s11 = int_to_ptr.vmem [resolvable:$false] %s2337_s11 }
  0x1a   : > { %2118 = vmatpush1.bf16.msra.mxu0 %v2117_v9  ;;  %v246_v20 = vld [vmem:[%s3458_s1 + $0x60] sm:$0xff]  ;;  %v248_v23 = vld [vmem:[%s3458_s1 + $0x70] sm:$0xff]  ;;  %s2539_s15 = scalar_lea.vmem %s3457_s0, %s1810_s7  ;;  %v550_v29 = vld [vmem:[%s3459_s2 + $0x188] sm:$0xff]  ;;  %s1890_s7 = sshll.u32 %s2452_s22, 12 }
  0x1b   : > { %2126 = vmatpush1.bf16.msra.mxu1 %v2125_v13  ;;  %v2121_v22 = vpack.c.bf16 %v246_v20, %v242_v19  ;;  %v517_v24 = vld [vmem:[%s3459_s2 + $0x80] sm:$0xff]  ;;  %2120 = vmatprep.subr.bf16.mxu0 %v2119_v17  ;;  %v2129_v26 = vpack.c.bf16 %v248_v23, %v244_v21  ;;  %v502_v33 = vld [vmem:[%s3459_s2 + $0x8] sm:$0xff]  ;;  %v519_v38 = vld [vmem:[%s3459_s2 + $0x90] sm:$0xff]  ;;  %s3404_s10 = scalar_lea.hbm %s3462_s5, %s1890_s7  ;;  %s2339_s16 = scalar_lea.vmem %s2338_s11, 8192 }
  0x1c   : > { %2128 = vmatprep.subr.bf16.mxu1 %v2127_v18  ;;  %v2541_v27 = vpack.c.bf16 %v518_v25, %v517_v24  ;;  %v549_v28 = vld [vmem:[%s3459_s2 + $0x180] sm:$0xff]  ;;  %v227_v34 = vld [vmem:[%s2539_s15 + $0x8] sm:$0xff]  ;;  %v520_v40 = vld [vmem:[%s3459_s2 + $0x98] sm:$0xff] }
  0x1d   : > { %v2549_v30 = vpack.c.bf16 %v550_v29, %v549_v28  ;;  %v501_v31 = vld [vmem:[%s3459_s2] sm:$0xff]  ;;  %v534_v37 = vld [vmem:[%s3459_s2 + $0x108] sm:$0xff]  ;;  %v551_v41 = vld [vmem:[%s3459_s2 + $0x190] sm:$0xff]  ;;  %v2586_v43 = vpack.c.bf16 %v520_v40, %v519_v38 }
  0x1e   : > { %2122 = vmatpush1.bf16.msra.mxu0 %v2121_v22  ;;  %v226_v32 = vld [vmem:[%s2539_s15] sm:$0xff]  ;;  %v2561_v35 = vpack.c.bf16 %v502_v33, %v501_v31  ;;  %v552_v42 = vld [vmem:[%s3459_s2 + $0x198] sm:$0xff]  ;;  %v503_v45 = vld [vmem:[%s3459_s2 + $0x10] sm:$0xff] }
  0x1f   : > { %2130 = vmatpush1.bf16.msra.mxu1 %v2129_v26  ;;  %2132 = vmatprep.subr.bf16.mxu0 %v2541_v27  ;;  %v533_v36 = vld [vmem:[%s3459_s2 + $0x100] sm:$0xff]  ;;  %v2588_v44 = vpack.c.bf16 %v552_v42, %v551_v41  ;;  %v504_v46 = vld [vmem:[%s3459_s2 + $0x18] sm:$0xff]  ;;  %v535_v47 = vld [vmem:[%s3459_s2 + $0x110] sm:$0xff] }
  0x20   : > { %2164 = vmatprep.subr.bf16.mxu1 %v2549_v30  ;;  %v2573_v39 = vpack.c.bf16 %v534_v37, %v533_v36  ;;  %v2601_v48 = vpack.c.bf16 %v504_v46, %v503_v45  ;;  %v536_v49 = vld [vmem:[%s3459_s2 + $0x118] sm:$0xff]  ;;  %v521_v50 = vld [vmem:[%s3459_s2 + $0xa0] sm:$0xff]  ;;  %v522_v51 = vld [vmem:[%s3459_s2 + $0xa8] sm:$0xff] }
  0x21   : > { %1811 = vmatmul.mubr.msk.f32.vlgmr.msra.gmra.mrb[0].mxu0 %vm250_vm0, %v226_v32  ;;  %v228_v52 = vld [vmem:[%s2539_s15 + $0x10] sm:$0xff]  ;;  %v2615_v53 = vpack.c.bf16 %v536_v49, %v535_v47  ;;  %v2617_v54 = vpack.c.bf16 %v522_v51, %v521_v50  ;;  %v553_v55 = vld [vmem:[%s3459_s2 + $0x1a0] sm:$0xff]  ;;  %v554_v56 = vld [vmem:[%s3459_s2 + $0x1a8] sm:$0xff] }
  0x22   : > { %1819 = vmatmul.mubr.msk.f32.vlgmr.msra.gmra.mrb[0].mxu1 %vm250_vm0, %v226_v32  ;;  %345 = vmatprep.mubr.f32.mxu0 %v3463_v7  ;;  %v505_v57 = vld [vmem:[%s3459_s2 + $0x20] sm:$0xff]  ;;  %v2630_v58 = vpack.c.bf16 %v554_v56, %v553_v55  ;;  %v506_v59 = vld [vmem:[%s3459_s2 + $0x28] sm:$0xff]  ;;  %v523_v62 = vld [vmem:[%s3459_s2 + $0xb0] sm:$0xff] }
  0x23   : > { %458 = vmatprep.mubr.f32.mxu1 %v3463_v7  ;;  %2134 = vmatpush3.bf16.msra.mxu0 %v2561_v35  ;;  %v537_v60 = vld [vmem:[%s3459_s2 + $0x120] sm:$0xff]  ;;  %v538_v61 = vld [vmem:[%s3459_s2 + $0x128] sm:$0xff]  ;;  %v524_v63 = vld [vmem:[%s3459_s2 + $0xb8] sm:$0xff]  ;;  %v2654_v1 = vpack.c.bf16 %v506_v59, %v505_v57 }
  0x24   : > { %2166 = vmatpush3.bf16.msra.mxu1 %v2573_v39  ;;  %2136 = vmatprep.subr.bf16.mxu0 %v2586_v43  ;;  %v555_v0 = vld [vmem:[%s3459_s2 + $0x1b0] sm:$0xff]  ;;  %v556_v2 = vld [vmem:[%s3459_s2 + $0x1b8] sm:$0xff]  ;;  %v2661_v3 = vpack.c.bf16 %v538_v61, %v537_v60  ;;  %v2663_v4 = vpack.c.bf16 %v524_v63, %v523_v62  ;;  %v525_v11 = vld [vmem:[%s3459_s2 + $0xc0] sm:$0xff] }
  0x25   : > { %1812 = vmatmul.mubr.msk.f32.gmra.mrb[2].mxu0 %vm250_vm0, %v227_v34  ;;  %2168 = vmatprep.subr.bf16.mxu1 %v2588_v44  ;;  %v507_v5 = vld [vmem:[%s3459_s2 + $0x30] sm:$0xff]  ;;  %v508_v6 = vld [vmem:[%s3459_s2 + $0x38] sm:$0xff]  ;;  %v2676_v9 = vpack.c.bf16 %v556_v2, %v555_v0  ;;  %v526_v12 = vld [vmem:[%s3459_s2 + $0xc8] sm:$0xff] }
  0x26   : > { %1820 = vmatmul.mubr.msk.f32.gmra.mrb[2].mxu1 %vm250_vm0, %v227_v34  ;;  %351 = vmatprep.mubr.f32.mxu0 %v3463_v7  ;;  %v539_v8 = vld [vmem:[%s3459_s2 + $0x130] sm:$0xff]  ;;  %v540_v10 = vld [vmem:[%s3459_s2 + $0x138] sm:$0xff]  ;;  %v557_v14 = vld [vmem:[%s3459_s2 + $0x1c0] sm:$0xff]  ;;  %v2698_v16 = vpack.c.bf16 %v508_v6, %v507_v5  ;;  %v2704_v18 = vpack.c.bf16 %v526_v12, %v525_v11 }
  0x27   : > { %464 = vmatprep.mubr.f32.mxu1 %v3463_v7  ;;  %2138 = vmatpush3.bf16.msra.mxu0 %v2601_v48  ;;  %v229_v13 = vld [vmem:[%s2539_s15 + $0x18] sm:$0xff]  ;;  %v558_v15 = vld [vmem:[%s3459_s2 + $0x1c8] sm:$0xff]  ;;  %v2702_v17 = vpack.c.bf16 %v540_v10, %v539_v8  ;;  %v509_v19 = vld [vmem:[%s3459_s2 + $0x40] sm:$0xff] }
  0x28   : > { %2170 = vmatpush3.bf16.msra.mxu1 %v2615_v53  ;;  %2140 = vmatprep.subr.bf16.mxu0 %v2617_v54  ;;  %v510_v20 = vld [vmem:[%s3459_s2 + $0x48] sm:$0xff]  ;;  %v541_v21 = vld [vmem:[%s3459_s2 + $0x140] sm:$0xff]  ;;  %v2717_v22 = vpack.c.bf16 %v558_v15, %v557_v14  ;;  %v527_v24 = vld [vmem:[%s3459_s2 + $0xd0] sm:$0xff] }
  0x29   : > { %1813 = vmatmul.mubr.msk.f32.gmra.mrb[4].mxu0 %vm250_vm0, %v228_v52  ;;  %2172 = vmatprep.subr.bf16.mxu1 %v2630_v58  ;;  %v542_v23 = vld [vmem:[%s3459_s2 + $0x148] sm:$0xff]  ;;  %v528_v25 = vld [vmem:[%s3459_s2 + $0xd8] sm:$0xff]  ;;  %v230_v26 = vld [vmem:[%s2539_s15 + $0x20] sm:$0xff]  ;;  %v2739_v31 = vpack.c.bf16 %v510_v20, %v509_v19 }
  0x2a   : > { %1821 = vmatmul.mubr.msk.f32.gmra.mrb[4].mxu1 %vm250_vm0, %v228_v52  ;;  %357 = vmatprep.mubr.f32.mxu0 %v3463_v7  ;;  %v559_v28 = vld [vmem:[%s3459_s2 + $0x1d0] sm:$0xff]  ;;  %v560_v29 = vld [vmem:[%s3459_s2 + $0x1d8] sm:$0xff]  ;;  %v2743_v32 = vpack.c.bf16 %v542_v23, %v541_v21  ;;  %v2745_v33 = vpack.c.bf16 %v528_v25, %v527_v24  ;;  %v529_v41 = vld [vmem:[%s3459_s2 + $0xe0] sm:$0xff] }
  0x2b   : > { %470 = vmatprep.mubr.f32.mxu1 %v3463_v7  ;;  %2142 = vmatpush3.bf16.msra.mxu0 %v2654_v1  ;;  %v511_v34 = vld [vmem:[%s3459_s2 + $0x50] sm:$0xff]  ;;  %v512_v36 = vld [vmem:[%s3459_s2 + $0x58] sm:$0xff]  ;;  %v2758_v38 = vpack.c.bf16 %v560_v29, %v559_v28  ;;  %v530_v42 = vld [vmem:[%s3459_s2 + $0xe8] sm:$0xff] }
  0x2c   : > { %2174 = vmatpush3.bf16.msra.mxu1 %v2661_v3  ;;  %2144 = vmatprep.subr.bf16.mxu0 %v2663_v4  ;;  %v543_v37 = vld [vmem:[%s3459_s2 + $0x150] sm:$0xff]  ;;  %v544_v40 = vld [vmem:[%s3459_s2 + $0x158] sm:$0xff]  ;;  %v231_v45 = vld [vmem:[%s2539_s15 + $0x28] sm:$0xff]  ;;  %v2780_v49 = vpack.c.bf16 %v512_v36, %v511_v34  ;;  %v2786_v51 = vpack.c.bf16 %v530_v42, %v529_v41 }
  0x2d   : > { %1814 = vmatmul.mubr.msk.f32.gmra.mrb[6].mxu0 %vm250_vm0, %v229_v13  ;;  %2176 = vmatprep.subr.bf16.mxu1 %v2676_v9  ;;  %v561_v46 = vld [vmem:[%s3459_s2 + $0x1e0] sm:$0xff]  ;;  %v562_v47 = vld [vmem:[%s3459_s2 + $0x1e8] sm:$0xff]  ;;  %v2784_v50 = vpack.c.bf16 %v544_v40, %v543_v37  ;;  %v531_v60 = vld [vmem:[%s3459_s2 + $0xf0] sm:$0xff] }
  0x2e   : > { %1822 = vmatmul.mubr.msk.f32.gmra.mrb[6].mxu1 %vm250_vm0, %v229_v13  ;;  %363 = vmatprep.mubr.f32.mxu0 %v3463_v7  ;;  %v513_v52 = vld [vmem:[%s3459_s2 + $0x60] sm:$0xff]  ;;  %v514_v55 = vld [vmem:[%s3459_s2 + $0x68] sm:$0xff]  ;;  %v2799_v57 = vpack.c.bf16 %v562_v47, %v561_v46  ;;  %v532_v61 = vld [vmem:[%s3459_s2 + $0xf8] sm:$0xff] }
  0x2f   : > { %476 = vmatprep.mubr.f32.mxu1 %v3463_v7  ;;  %2146 = vmatpush3.bf16.msra.mxu0 %v2698_v16  ;;  %v545_v56 = vld [vmem:[%s3459_s2 + $0x160] sm:$0xff]  ;;  %v546_v59 = vld [vmem:[%s3459_s2 + $0x168] sm:$0xff]  ;;  %v232_v62 = vld [vmem:[%s2539_s15 + $0x30] sm:$0xff]  ;;  %v2821_v2 = vpack.c.bf16 %v514_v55, %v513_v52  ;;  %v2827_v6 = vpack.c.bf16 %v532_v61, %v531_v60 }
  0x30   : > { %2178 = vmatpush3.bf16.msra.mxu1 %v2702_v17  ;;  %2148 = vmatprep.subr.bf16.mxu0 %v2704_v18  ;;  %v563_v63 = vld [vmem:[%s3459_s2 + $0x1f0] sm:$0xff]  ;;  %v564_v0 = vld [vmem:[%s3459_s2 + $0x1f8] sm:$0xff]  ;;  %v2825_v5 = vpack.c.bf16 %v546_v59, %v545_v56 }
  0x31   : > { %1815 = vmatmul.mubr.msk.f32.gmra.mrb[8].mxu0 %vm250_vm0, %v230_v26  ;;  %2180 = vmatprep.subr.bf16.mxu1 %v2717_v22  ;;  %v515_v8 = vld [vmem:[%s3459_s2 + $0x70] sm:$0xff]  ;;  %v516_v10 = vld [vmem:[%s3459_s2 + $0x78] sm:$0xff]  ;;  %v2837_v11 = vpack.c.bf16 %v564_v0, %v563_v63 }
  0x32   : > { %1823 = vmatmul.mubr.msk.f32.gmra.mrb[8].mxu1 %vm250_vm0, %v230_v26  ;;  %369 = vmatprep.mubr.f32.mxu0 %v3463_v7  ;;  %v547_v12 = vld [vmem:[%s3459_s2 + $0x170] sm:$0xff]  ;;  %v548_v13 = vld [vmem:[%s3459_s2 + $0x178] sm:$0xff]  ;;  %v2850_v15 = vpack.c.bf16 %v516_v10, %v515_v8 }
  0x33   : > { %482 = vmatprep.mubr.f32.mxu1 %v3463_v7  ;;  %2150 = vmatpush3.bf16.msra.mxu0 %v2739_v31  ;;  %v233_v14 = vld [vmem:[%s2539_s15 + $0x38] sm:$0xff]  ;;  %v2854_v19 = vpack.c.bf16 %v548_v13, %v547_v12  ;;  %s216_s15 = sand.u32 1, %s2387_s19  }
  0x34   : > { %2182 = vmatpush3.bf16.msra.mxu1 %v2743_v32  ;;  %2152 = vmatprep.subr.bf16.mxu0 %v2745_v33  ;;  %s1808_s30 = sshll.u32 %s216_s15, 8  ;;  %s3416_s12 = scalar_lea.sflag [#allocation3], %s216_s15 }
  0x35   : > { %1816 = vmatmul.mubr.msk.f32.gmra.mrb[10].mxu0 %vm250_vm0, %v231_v45  ;;  %2184 = vmatprep.subr.bf16.mxu1 %v2758_v38  ;;  %s3315_s6 = scalar_lea.vmem [#allocation2], %s1808_s30 }
  0x36   : > { %1824 = vmatmul.mubr.msk.f32.gmra.mrb[10].mxu1 %vm250_vm0, %v231_v45  ;;  %375 = vmatprep.mubr.f32.mxu0 %v3463_v7  ;;  %s1742_s8 = sshll.u32 %s3315_s6, 4  ;;  %s3406_s8 = int_to_ptr.vmem [resolvable:$true] %s1742_s8 }
  0x37   : > { %488 = vmatprep.mubr.f32.mxu1 %v3463_v7  ;;  %2154 = vmatpush3.bf16.msra.mxu0 %v2780_v49  ;;  %s2333_s13 = scalar_lea.vmem %s3406_s8, 4096  ;;  %p2340_p0 = scmp.lt.s32.totalorder %s3406_s8, %s2338_s11 }
  0x38   : > { %2186 = vmatpush3.bf16.msra.mxu1 %v2784_v50  ;;  %2156 = vmatprep.subr.bf16.mxu0 %v2786_v51  ;;  %p2334_p11 = scmp.ne.s32.totalorder %s3406_s8, %s2333_s13  ;;  %p2341_p1 = scmp.lt.s32.totalorder %s2339_s16, %s2333_s13 }
  0x39   : > { %1817 = vmatmul.mubr.msk.f32.gmra.mrb[12].mxu0 %vm250_vm0, %v232_v62  ;;  %2188 = vmatprep.subr.bf16.mxu1 %v2799_v57 }
  0x3a   : > { %1825 = vmatmul.mubr.msk.f32.gmra.mrb[12].mxu1 %vm250_vm0, %v232_v62  ;;  %381 = vmatprep.mubr.f32.mxu0 %v3463_v7  ;;  %p2335_p12 = pnand %p2334_p11, %p2469_p5  ;;  %p2342_p2 = por %p2341_p1, %p2340_p0 }
  0x3b   : > { %494 = vmatprep.mubr.f32.mxu1 %v3463_v7  ;;  %2158 = vmatpush3.bf16.msra.mxu0 %v2821_v2 }
  0x3c   : > { %2190 = vmatpush3.bf16.msra.mxu1 %v2825_v5  ;;  %2160 = vmatprep.subr.bf16.mxu0 %v2827_v6  ;;  %p2336_p13 = pneg %p2335_p12 }
  0x3d   : > { %1818 = vmatmul.mubr.msk.f32.gmra.mrb[14].mxu0 %vm250_vm0, %v233_v14  ;;  %2192 = vmatprep.subr.bf16.mxu1 %v2837_v11 }
  0x3e   : > { %1826 = vmatmul.mubr.msk.f32.gmra.mrb[14].mxu1 %vm250_vm0, %v233_v14  ;;  %p2343_p3 = pnand %p2342_p2, %p2336_p13 }
  0x3f   : > { %2162 = vmatpush3.bf16.msra.mxu0 %v2850_v15 }
  0x40   : > { %2194 = vmatpush3.bf16.msra.mxu1 %v2854_v19  ;;  %2196 = vmatprep.subr.bf16.mxu0 %v2541_v27 }
  0x41   : > { %2228 = vmatprep.subr.bf16.mxu1 %v2549_v30 }
  0xf4   : > { %v2863_v20 = vpop.f32.mrb[0].mxu0 }
  0xf5   : > { %v2865_v21 = vpop.f32.mrb[0].mxu1  ;;  %v2867_v23 = vpop.f32.mrb[1].mxu0  ;;  %v775_v41 = vmul.f32 %v2863_v20, %v2863_v20 }
  0xf6   : > { %v2869_v24 = vpop.f32.mrb[1].mxu1  ;;  %629 = vmatprep.mubr.f32.mxu0 %v2867_v23  ;;  %v777_v42 = vmul.f32 %v2865_v21, %v2865_v21 }
  0xf7   : > { %734 = vmatprep.mubr.f32.mxu1 %v2869_v24  ;;  %630 = vmatmul.mubr.f32.vlgmr.msra.gmra.mrb[16].mxu0 %v2863_v20  ;;  %v778_v40 = vmul.f32 %v2869_v24, %v2869_v24 }
  0xf8   : > { %735 = vmatmul.mubr.f32.vlgmr.msra.gmra.mrb[16].mxu1 %v2865_v21  ;;  %2198 = vmatpush3.bf16.msra.mxu0 %v2561_v35  ;;  %v2876_v27 = vpop.f32.mrb[2].mxu0 }
  0xf9   : > { %2230 = vmatpush3.bf16.msra.mxu1 %v2573_v39  ;;  %v2879_v30 = vpop.f32.mrb[2].mxu1  ;;  %v2881_v25 = vpop.f32.mrb[3].mxu0  ;;  %2200 = vmatprep.subr.bf16.mxu0 %v2586_v43  ;;  %v779_v47 = vmul.f32 %v2876_v27, %v2876_v27 }
  0xfa   : > { %v2884_v26 = vpop.f32.mrb[3].mxu1  ;;  %634 = vmatprep.mubr.f32.mxu0 %v2881_v25  ;;  %2232 = vmatprep.subr.bf16.mxu1 %v2588_v44  ;;  %v780_v45 = vmul.f32 %v2881_v25, %v2881_v25 }
  0xfb   : > { %739 = vmatprep.mubr.f32.mxu1 %v2884_v26  ;;  %635 = vmatmul.mubr.f32.gmra.mrb[18].mxu0 %v2876_v27  ;;  %v782_v46 = vmul.f32 %v2884_v26, %v2884_v26 }
  0xfc   : > { %740 = vmatmul.mubr.f32.gmra.mrb[18].mxu1 %v2879_v30  ;;  %2202 = vmatpush3.bf16.msra.mxu0 %v2601_v48  ;;  %v2892_v35 = vpop.f32.mrb[4].mxu0 }
  0xfd   : > { %2234 = vmatpush3.bf16.msra.mxu1 %v2615_v53  ;;  %v2895_v39 = vpop.f32.mrb[4].mxu1  ;;  %v2897_v43 = vpop.f32.mrb[5].mxu0  ;;  %2204 = vmatprep.subr.bf16.mxu0 %v2617_v54  ;;  %v783_v52 = vmul.f32 %v2892_v35, %v2892_v35 }
  0xfe   : > { %v2900_v28 = vpop.f32.mrb[5].mxu1  ;;  %639 = vmatprep.mubr.f32.mxu0 %v2897_v43  ;;  %2236 = vmatprep.subr.bf16.mxu1 %v2630_v58  ;;  %v785_v55 = vmul.f32 %v2895_v39, %v2895_v39 }
  0xff   : > { %744 = vmatprep.mubr.f32.mxu1 %v2900_v28  ;;  %640 = vmatmul.mubr.f32.gmra.mrb[20].mxu0 %v2892_v35 }
 0x100   : > { %745 = vmatmul.mubr.f32.gmra.mrb[20].mxu1 %v2895_v39  ;;  %2206 = vmatpush3.bf16.msra.mxu0 %v2654_v1  ;;  %v2908_v44 = vpop.f32.mrb[6].mxu0 }
 0x101   : > { %2238 = vmatpush3.bf16.msra.mxu1 %v2661_v3  ;;  %v2911_v48 = vpop.f32.mrb[6].mxu1  ;;  %v2913_v53 = vpop.f32.mrb[7].mxu0  ;;  %2208 = vmatprep.subr.bf16.mxu0 %v2663_v4  ;;  %v787_v59 = vmul.f32 %v2908_v44, %v2908_v44 }
 0x102   : > { %v2916_v54 = vpop.f32.mrb[7].mxu1  ;;  %644 = vmatprep.mubr.f32.mxu0 %v2913_v53  ;;  %2240 = vmatprep.subr.bf16.mxu1 %v2676_v9  ;;  %v788_v56 = vmul.f32 %v2913_v53, %v2913_v53  ;;  %v789_v60 = vmul.f32 %v2911_v48, %v2911_v48 }
 0x103   : > { %749 = vmatprep.mubr.f32.mxu1 %v2916_v54  ;;  %645 = vmatmul.mubr.f32.gmra.mrb[22].mxu0 %v2908_v44 }
 0x104   : > { %750 = vmatmul.mubr.f32.gmra.mrb[22].mxu1 %v2911_v48  ;;  %2210 = vmatpush3.bf16.msra.mxu0 %v2698_v16  ;;  %v2924_v58 = vpop.f32.mrb[8].mxu0 }
 0x105   : > { %2242 = vmatpush3.bf16.msra.mxu1 %v2702_v17  ;;  %v2927_v1 = vpop.f32.mrb[8].mxu1  ;;  %v2929_v3 = vpop.f32.mrb[9].mxu0  ;;  %2212 = vmatprep.subr.bf16.mxu0 %v2704_v18  ;;  %v791_v63 = vmul.f32 %v2924_v58, %v2924_v58 }
 0x106   : > { %v2932_v4 = vpop.f32.mrb[9].mxu1  ;;  %649 = vmatprep.mubr.f32.mxu0 %v2929_v3  ;;  %2244 = vmatprep.subr.bf16.mxu1 %v2717_v22  ;;  %v792_v61 = vmul.f32 %v2929_v3, %v2929_v3  ;;  %v793_v0 = vmul.f32 %v2927_v1, %v2927_v1 }
 0x107   : > { %754 = vmatprep.mubr.f32.mxu1 %v2932_v4  ;;  %650 = vmatmul.mubr.f32.gmra.mrb[24].mxu0 %v2924_v58  ;;  %v794_v62 = vmul.f32 %v2932_v4, %v2932_v4 }
 0x108   : > { %755 = vmatmul.mubr.f32.gmra.mrb[24].mxu1 %v2927_v1  ;;  %2214 = vmatpush3.bf16.msra.mxu0 %v2739_v31  ;;  %v2940_v9 = vpop.f32.mrb[10].mxu0 }
 0x109   : > { %2246 = vmatpush3.bf16.msra.mxu1 %v2743_v32  ;;  %v2943_v16 = vpop.f32.mrb[10].mxu1  ;;  %v2945_v17 = vpop.f32.mrb[11].mxu0  ;;  %2216 = vmatprep.subr.bf16.mxu0 %v2745_v33 }
 0x10a   : > { %v2948_v18 = vpop.f32.mrb[11].mxu1  ;;  %654 = vmatprep.mubr.f32.mxu0 %v2945_v17  ;;  %2248 = vmatprep.subr.bf16.mxu1 %v2758_v38  ;;  %v776_v38 = vmul.f32 %v2867_v23, %v2867_v23  ;;  %v797_v8 = vmul.f32 %v2943_v16, %v2943_v16 }
 0x10b   : > { %759 = vmatprep.mubr.f32.mxu1 %v2948_v18  ;;  %655 = vmatmul.mubr.f32.gmra.mrb[26].mxu0 %v2940_v9 }
 0x10c   : > { %760 = vmatmul.mubr.f32.gmra.mrb[26].mxu1 %v2943_v16  ;;  %2218 = vmatpush3.bf16.msra.mxu0 %v2780_v49  ;;  %v2956_v22 = vpop.f32.mrb[12].mxu0  ;;  %v781_v49 = vmul.f32 %v2879_v30, %v2879_v30 }
 0x10d   : > { %2250 = vmatpush3.bf16.msra.mxu1 %v2784_v50  ;;  %v2959_v29 = vpop.f32.mrb[12].mxu1  ;;  %v2961_v31 = vpop.f32.mrb[13].mxu0  ;;  %2220 = vmatprep.subr.bf16.mxu0 %v2786_v51  ;;  %v784_v50 = vmul.f32 %v2897_v43, %v2897_v43  ;;  %v786_v51 = vmul.f32 %v2900_v28, %v2900_v28  ;;  %v799_v12 = vmul.f32 %v2956_v22, %v2956_v22 }
 0x10e   : > { %v2964_v32 = vpop.f32.mrb[13].mxu1  ;;  %659 = vmatprep.mubr.f32.mxu0 %v2961_v31  ;;  %2252 = vmatprep.subr.bf16.mxu1 %v2799_v57  ;;  %v790_v57 = vmul.f32 %v2916_v54, %v2916_v54  ;;  %v800_v10 = vmul.f32 %v2961_v31, %v2961_v31  ;;  %v801_v13 = vmul.f32 %v2959_v29, %v2959_v29 }
 0x10f   : > { %764 = vmatprep.mubr.f32.mxu1 %v2964_v32  ;;  %660 = vmatmul.mubr.f32.gmra.mrb[28].mxu0 %v2956_v22 }
 0x110   : > { %765 = vmatmul.mubr.f32.gmra.mrb[28].mxu1 %v2959_v29  ;;  %2222 = vmatpush3.bf16.msra.mxu0 %v2821_v2  ;;  %v2972_v33 = vpop.f32.mrb[14].mxu0  ;;  %v796_v2 = vmul.f32 %v2945_v17, %v2945_v17 }
 0x111   : > { %2254 = vmatpush3.bf16.msra.mxu1 %v2825_v5  ;;  %v2975_v34 = vpop.f32.mrb[14].mxu1  ;;  %v2977_v36 = vpop.f32.mrb[15].mxu0  ;;  %2224 = vmatprep.subr.bf16.mxu0 %v2827_v6  ;;  %v798_v5 = vmul.f32 %v2948_v18, %v2948_v18  ;;  %v795_v6 = vmul.f32 %v2940_v9, %v2940_v9 }
 0x112   : > { %v2980_v37 = vpop.f32.mrb[15].mxu1  ;;  %664 = vmatprep.mubr.f32.mxu0 %v2977_v36  ;;  %2256 = vmatprep.subr.bf16.mxu1 %v2837_v11  ;;  %v802_v11 = vmul.f32 %v2964_v32, %v2964_v32  ;;  %v804_v14 = vmul.f32 %v2977_v36, %v2977_v36 }
 0x113   : > { %3468 = vst [vmem:[#allocation5_spill] sm:$0xff] %v2980_v37  ;;  %769 = vmatprep.mubr.f32.mxu1 %v2980_v37  ;;  %665 = vmatmul.mubr.f32.gmra.mrb[30].mxu0 %v2972_v33 }
 0x114   : > { %770 = vmatmul.mubr.f32.gmra.mrb[30].mxu1 %v2975_v34  ;;  %2226 = vmatpush3.bf16.msra.mxu0 %v2850_v15  ;;  %v806_v15 = vmul.f32 %v2980_v37, %v2980_v37 }
 0x115   : > { %2258 = vmatpush3.bf16.msra.mxu1 %v2854_v19  ;;  %871 = vmatprep.mubr.f32.mxu0 %v776_v38  ;;  %v803_v19 = vmul.f32 %v2972_v33, %v2972_v33  ;;  %v805_v38 = vmul.f32 %v2975_v34, %v2975_v34 }
 0x116   : > { %976 = vmatprep.mubr.f32.mxu1 %v778_v40  ;;  %v1058_v40 = vld [vmem:[%s3460_s3 + $0x8] sm:$0xff] }
 0x117   : > { %872 = vmatmul.mubr.f32.vlgmr.msra.gmra.mrb[32].mxu0 %v775_v41  ;;  %v1062_v41 = vld [vmem:[%s3460_s3 + $0x28] sm:$0xff] }
 0x118   : > { %977 = vmatmul.mubr.f32.vlgmr.msra.gmra.mrb[32].mxu1 %v777_v42  ;;  %876 = vmatprep.mubr.f32.mxu0 %v780_v45  ;;  %v1060_v42 = vld [vmem:[%s3460_s3 + $0x18] sm:$0xff]  ;;  %v2259_v45 = vpack.c.bf16 %v1062_v41, %v1058_v40 }
 0x119   : > { %981 = vmatprep.mubr.f32.mxu1 %v782_v46  ;;  %v1064_v46 = vld [vmem:[%s3460_s3 + $0x38] sm:$0xff] }
 0x11a   : > { %2260 = vmatprep.subr.bf16.mxu0 %v2259_v45 }
 0x11b   : > { %877 = vmatmul.mubr.f32.gmra.mrb[34].mxu0 %v779_v47  ;;  %v1057_v47 = vld [vmem:[%s3460_s3] sm:$0xff] }
 0x11c   : > { %982 = vmatmul.mubr.f32.gmra.mrb[34].mxu1 %v781_v49  ;;  %881 = vmatprep.mubr.f32.mxu0 %v784_v50  ;;  %v1061_v49 = vld [vmem:[%s3460_s3 + $0x20] sm:$0xff]  ;;  %v2263_v50 = vpack.c.bf16 %v1064_v46, %v1060_v42 }
 0x11d   : > { %986 = vmatprep.mubr.f32.mxu1 %v786_v51  ;;  %v3073_v51 = vpack.c.bf16 %v1061_v49, %v1057_v47 }
 0x11e   : > { %2264 = vmatprep.subr.bf16.mxu1 %v2263_v50 }
 0x11f   : > { %882 = vmatmul.mubr.f32.gmra.mrb[36].mxu0 %v783_v52  ;;  %v1059_v52 = vld [vmem:[%s3460_s3 + $0x10] sm:$0xff] }
 0x120   : > { %987 = vmatmul.mubr.f32.gmra.mrb[36].mxu1 %v785_v55  ;;  %886 = vmatprep.mubr.f32.mxu0 %v788_v56  ;;  %v1063_v55 = vld [vmem:[%s3460_s3 + $0x30] sm:$0xff] }
 0x121   : > { %991 = vmatprep.mubr.f32.mxu1 %v790_v57  ;;  %v3081_v56 = vpack.c.bf16 %v1063_v55, %v1059_v52  ;;  %2262 = vmatpush1.bf16.msra.mxu0 %v3073_v51 }
 0x122   : > { %2268 = vmatprep.subr.bf16.mxu0 %v2259_v45 }
 0x123   : > { %887 = vmatmul.mubr.f32.gmra.mrb[38].mxu0 %v787_v59  ;;  %2266 = vmatpush1.bf16.msra.mxu1 %v3081_v56 }
 0x124   : > { %992 = vmatmul.mubr.f32.gmra.mrb[38].mxu1 %v789_v60  ;;  %891 = vmatprep.mubr.f32.mxu0 %v792_v61 }
 0x125   : > { %996 = vmatprep.mubr.f32.mxu1 %v794_v62  ;;  %2272 = vmatprep.subr.bf16.mxu1 %v2263_v50 }
 0x127   : > { %892 = vmatmul.mubr.f32.gmra.mrb[40].mxu0 %v791_v63 }
 0x128   : > { %997 = vmatmul.mubr.f32.gmra.mrb[40].mxu1 %v793_v0  ;;  %896 = vmatprep.mubr.f32.mxu0 %v796_v2 }
 0x129   : > { %1001 = vmatprep.mubr.f32.mxu1 %v798_v5 }
 0x12b   : > { %897 = vmatmul.mubr.f32.gmra.mrb[42].mxu0 %v795_v6 }
 0x12c   : > { %1002 = vmatmul.mubr.f32.gmra.mrb[42].mxu1 %v797_v8  ;;  %901 = vmatprep.mubr.f32.mxu0 %v800_v10 }
 0x12d   : > { %1006 = vmatprep.mubr.f32.mxu1 %v802_v11 }
 0x12f   : > { %902 = vmatmul.mubr.f32.gmra.mrb[44].mxu0 %v799_v12 }
 0x130   : > { %1007 = vmatmul.mubr.f32.gmra.mrb[44].mxu1 %v801_v13  ;;  %906 = vmatprep.mubr.f32.mxu0 %v804_v14 }
 0x131   : > { %1011 = vmatprep.mubr.f32.mxu1 %v806_v15 }
 0x133   : > { %907 = vmatmul.mubr.f32.gmra.mrb[46].mxu0 %v803_v19 }
 0x134   : > { %1012 = vmatmul.mubr.f32.gmra.mrb[46].mxu1 %v805_v38  ;;  %1154 = vmatprep.mubr.f32.mxu0 %v3463_v7 }
 0x135   : > { %1267 = vmatprep.mubr.f32.mxu1 %v3463_v7 }
 0x1ca   : > { %v1923_v57 = vpop.f32.mrb[16].mxu0 }
 0x1cb   : > { %v1979_v59 = vpop.f32.mrb[16].mxu1  ;;  %v1924_v60 = vpop.f32.mrb[17].mxu0 }
 0x1cc   : > { %v1925_v61 = vadd.f32 %v1924_v60, %v1923_v57  ;;  %v1980_v62 = vpop.f32.mrb[17].mxu1 }
 0x1cd   : > { %v1981_v63 = vadd.f32 %v1980_v62, %v1979_v59 }
 0x1ce   : > { %v1926_v0 = vpop.f32.mrb[18].mxu0 }
 0x1cf   : > { %v3085_v2 = vadd.f32 %v1981_v63, %v1925_v61  ;;  %v1982_v5 = vpop.f32.mrb[18].mxu1  ;;  %v1927_v6 = vpop.f32.mrb[19].mxu0 }
 0x1d0   : > { %v1928_v8 = vadd.f32 %v1927_v6, %v1926_v0  ;;  %v1983_v10 = vpop.f32.mrb[19].mxu1 }
 0x1d1   : > { %v1984_v11 = vadd.f32 %v1983_v10, %v1982_v5 }
 0x1d2   : > { %v1929_v12 = vpop.f32.mrb[20].mxu0 }
 0x1d3   : > { %v3087_v13 = vadd.f32 %v1984_v11, %v1928_v8  ;;  %v1985_v14 = vpop.f32.mrb[20].mxu1  ;;  %v1930_v15 = vpop.f32.mrb[21].mxu0 }
 0x1d4   : > { %v1931_v19 = vadd.f32 %v1930_v15, %v1929_v12  ;;  %v1986_v38 = vpop.f32.mrb[21].mxu1 }
 0x1d5   : > { %v1987_v40 = vadd.f32 %v1986_v38, %v1985_v14 }
 0x1d6   : > { %v1932_v41 = vpop.f32.mrb[22].mxu0 }
 0x1d7   : > { %v3089_v42 = vadd.f32 %v1987_v40, %v1931_v19  ;;  %v1988_v45 = vpop.f32.mrb[22].mxu1  ;;  %v1933_v46 = vpop.f32.mrb[23].mxu0 }
 0x1d8   : > { %v1934_v47 = vadd.f32 %v1933_v46, %v1932_v41  ;;  %v1989_v49 = vpop.f32.mrb[23].mxu1 }
 0x1d9   : > { %v1990_v50 = vadd.f32 %v1989_v49, %v1988_v45 }
 0x1da   : > { %v1935_v52 = vpop.f32.mrb[24].mxu0 }
 0x1db   : > { %v3091_v55 = vadd.f32 %v1990_v50, %v1934_v47  ;;  %v1991_v57 = vpop.f32.mrb[24].mxu1  ;;  %v1936_v59 = vpop.f32.mrb[25].mxu0 }
 0x1dc   : > { %v1937_v60 = vadd.f32 %v1936_v59, %v1935_v52  ;;  %v1992_v61 = vpop.f32.mrb[25].mxu1 }
 0x1dd   : > { %v1993_v62 = vadd.f32 %v1992_v61, %v1991_v57 }
 0x1de   : > { %v1938_v63 = vpop.f32.mrb[26].mxu0 }
 0x1df   : > { %v3093_v0 = vadd.f32 %v1993_v62, %v1937_v60  ;;  %v1994_v5 = vpop.f32.mrb[26].mxu1  ;;  %v1939_v6 = vpop.f32.mrb[27].mxu0 }
 0x1e0   : > { %v1940_v8 = vadd.f32 %v1939_v6, %v1938_v63  ;;  %v1995_v10 = vpop.f32.mrb[27].mxu1 }
 0x1e1   : > { %v1996_v11 = vadd.f32 %v1995_v10, %v1994_v5  ;;  %v1017_v10 = vmul.f32 %v3085_v2, %v3085_v2 }
 0x1e2   : > { %v1941_v12 = vpop.f32.mrb[28].mxu0 }
 0x1e3   : > { %v3095_v14 = vadd.f32 %v1996_v11, %v1940_v8  ;;  %v1997_v15 = vpop.f32.mrb[28].mxu1  ;;  %v1942_v19 = vpop.f32.mrb[29].mxu0 }
 0x1e4   : > { %v1943_v38 = vadd.f32 %v1942_v19, %v1941_v12  ;;  %v1998_v40 = vpop.f32.mrb[29].mxu1 }
 0x1e5   : > { %v1999_v41 = vadd.f32 %v1998_v40, %v1997_v15 }
 0x1e6   : > { %v1944_v45 = vpop.f32.mrb[30].mxu0 }
 0x1e7   : > { %v3097_v46 = vadd.f32 %v1999_v41, %v1943_v38  ;;  %v2000_v47 = vpop.f32.mrb[30].mxu1  ;;  %v1945_v49 = vpop.f32.mrb[31].mxu0 }
 0x1e8   : > { %v1946_v50 = vadd.f32 %v1945_v49, %v1944_v45  ;;  %v2001_v52 = vpop.f32.mrb[31].mxu1 }
 0x1e9   : > { %v2002_v57 = vadd.f32 %v2001_v52, %v2000_v47  ;;  %v1018_v47 = vmul.f32 %v3087_v13, %v3087_v13 }
 0x1ea   : > { %v2035_v59 = vpop.f32.mrb[32].mxu0 }
 0x1eb   : > { %v3099_v60 = vadd.f32 %v2002_v57, %v1946_v50  ;;  %v2091_v61 = vpop.f32.mrb[32].mxu1  ;;  %v2036_v62 = vpop.f32.mrb[33].mxu0 }
 0x1ec   : > { %v2037_v63 = vadd.f32 %v2036_v62, %v2035_v59  ;;  %v2092_v5 = vpop.f32.mrb[33].mxu1 }
 0x1ed   : > { %v2093_v6 = vadd.f32 %v2092_v5, %v2091_v61 }
 0x1ee   : > { %v2038_v8 = vpop.f32.mrb[34].mxu0 }
 0x1ef   : > { %v979_v11 = vadd.f32 %v2093_v6, %v2037_v63  ;;  %v2094_v12 = vpop.f32.mrb[34].mxu1  ;;  %v2039_v15 = vpop.f32.mrb[35].mxu0  ;;  %v1019_v6 = vmul.f32 %v3089_v42, %v3089_v42 }
 0x1f0   : > { %v2040_v19 = vadd.f32 %v2039_v15, %v2038_v8  ;;  %v2095_v38 = vpop.f32.mrb[35].mxu1 }
 0x1f1   : > { %v1025_v40 = vsub.f32 %v979_v11, %v1017_v10  ;;  %v2096_v41 = vadd.f32 %v2095_v38, %v2094_v12 }
 0x1f2   : > { %v2041_v45 = vpop.f32.mrb[36].mxu0 }
 0x1f3   : > { %v1033_v49 = vmax.f32 %v1025_v40, 0.0  ;;  %v984_v50 = vadd.f32 %v2096_v41, %v2040_v19  ;;  %v2097_v52 = vpop.f32.mrb[36].mxu1  ;;  %v2042_v57 = vpop.f32.mrb[37].mxu0 }
 0x1f4   : > { %v2043_v59 = vadd.f32 %v2042_v57, %v2041_v45  ;;  %v2098_v61 = vpop.f32.mrb[37].mxu1  ;;  %v1020_v45 = vmul.f32 %v3091_v55, %v3091_v55 }
 0x1f5   : > { %v1041_v62 = vadd.f32 1e-05, %v1033_v49  ;;  %v1026_v5 = vsub.f32 %v984_v50, %v1018_v47  ;;  %v2099_v7 = vadd.f32 %v2098_v61, %v2097_v52 }
 0x1f6   : > { %v2044_v63 = vpop.f32.mrb[38].mxu0 }
 0x1f7   : > { %2317 = vrsqrt.f32 %v1041_v62  ;;  %v1034_v8 = vmax.f32 %v1026_v5, 0.0  ;;  %v989_v10 = vadd.f32 %v2099_v7, %v2043_v59  ;;  %v2100_v11 = vpop.f32.mrb[38].mxu1  ;;  %v2045_v12 = vpop.f32.mrb[39].mxu0 }
 0x1f8   : > { %v2046_v15 = vadd.f32 %v2045_v12, %v2044_v63  ;;  %v2101_v38 = vpop.f32.mrb[39].mxu1  ;;  %v1021_v63 = vmul.f32 %v3093_v0, %v3093_v0 }
 0x1f9   : > { %v1042_v40 = vadd.f32 1e-05, %v1034_v8  ;;  %v1027_v19 = vsub.f32 %v989_v10, %v1019_v6  ;;  %v2102_v41 = vadd.f32 %v2101_v38, %v2100_v11 }
 0x1fa   : > { %v2047_v37 = vpop.f32.mrb[40].mxu0 }
 0x1fb   : > { %2319 = vrsqrt.f32 %v1042_v40  ;;  %v1035_v47 = vmax.f32 %v1027_v19, 0.0  ;;  %v994_v49 = vadd.f32 %v2102_v41, %v2046_v15  ;;  %v2103_v50 = vpop.f32.mrb[40].mxu1  ;;  %v2048_v52 = vpop.f32.mrb[41].mxu0 }
 0x1fc   : > { %v2049_v57 = vadd.f32 %v2048_v52, %v2047_v37  ;;  %v2104_v61 = vpop.f32.mrb[41].mxu1 }
 0x1fd   : > { %v1043_v62 = vadd.f32 1e-05, %v1035_v47  ;;  %v1028_v7 = vsub.f32 %v994_v49, %v1020_v45  ;;  %v2105_v59 = vadd.f32 %v2104_v61, %v2103_v50  ;;  %v1022_v47 = vmul.f32 %v3095_v14, %v3095_v14 }
 0x1fe   : > { %v2050_v5 = vpop.f32.mrb[42].mxu0 }
 0x1ff   : > { %2321 = vrsqrt.f32 %v1043_v62  ;;  %v1036_v6 = vmax.f32 %v1028_v7, 0.0  ;;  %v999_v8 = vadd.f32 %v2105_v59, %v2049_v57  ;;  %v2106_v10 = vpop.f32.mrb[42].mxu1  ;;  %v2051_v11 = vpop.f32.mrb[43].mxu0  ;;  %v3469_v7 = vmov 0.0  }
 0x200   : > { %v2052_v12 = vadd.f32 %v2051_v11, %v2050_v5  ;;  %v2107_v38 = vpop.f32.mrb[43].mxu1 }
 0x201   : > { %v2318_v15 = vpop.eup %2317  ;;  %v1044_v40 = vadd.f32 1e-05, %v1036_v6  ;;  %v1029_v19 = vsub.f32 %v999_v8, %v1021_v63  ;;  %v2108_v37 = vadd.f32 %v2107_v38, %v2106_v10 }
 0x202   : > { %1827 = vmatmul.mubr.msk.f32.vlgmr.msra.gmra.mrb[48].mxu0 %vm1065_vm1, %v2318_v15  ;;  %1835 = vmatmul.mubr.msk.f32.vlgmr.msra.gmra.mrb[48].mxu1 %vm1065_vm1, %v2318_v15  ;;  %v2053_v41 = vpop.f32.mrb[44].mxu0  ;;  %v3114_v45 = vmul.f32 %v2318_v15, %v3085_v2 }
 0x203   : > { %2323 = vrsqrt.f32 %v1044_v40  ;;  %v1037_v49 = vmax.f32 %v1029_v19, 0.0  ;;  %v1004_v50 = vadd.f32 %v2108_v37, %v2052_v12  ;;  %2270 = vmatpush1.bf16.msra.mxu0 %v3073_v51  ;;  %2274 = vmatpush1.bf16.msra.mxu1 %v3081_v56  ;;  %v2109_v52 = vpop.f32.mrb[44].mxu1  ;;  %v2054_v57 = vpop.f32.mrb[45].mxu0  ;;  %v1023_v56 = vmul.f32 %v3097_v46, %v3097_v46 }
 0x204   : > { %v2055_v61 = vadd.f32 %v2054_v57, %v2053_v41  ;;  %v2110_v62 = vpop.f32.mrb[45].mxu1  ;;  %1160 = vmatprep.mubr.f32.mxu0 %v3469_v7  ;;  %1273 = vmatprep.mubr.f32.mxu1 %v3469_v7 }
 0x205   : > { %v2320_v2 = vpop.eup %2319  ;;  %v1045_v59 = vadd.f32 1e-05, %v1037_v49  ;;  %v1030_v5 = vsub.f32 %v1004_v50, %v1022_v47  ;;  %v2111_v63 = vadd.f32 %v2110_v62, %v2109_v52  ;;  %v1024_v47 = vmul.f32 %v3099_v60, %v3099_v60 }
 0x206   : > { %1828 = vmatmul.mubr.msk.f32.gmra.mrb[50].mxu0 %vm1065_vm1, %v2320_v2  ;;  %1836 = vmatmul.mubr.msk.f32.gmra.mrb[50].mxu1 %vm1065_vm1, %v2320_v2  ;;  %v2056_v6 = vpop.f32.mrb[46].mxu0  ;;  %v3125_v51 = vmul.f32 %v2320_v2, %v3087_v13 }
 0x207   : > { %2325 = vrsqrt.f32 %v1045_v59  ;;  %v1038_v8 = vmax.f32 %v1030_v5, 0.0  ;;  %v1009_v10 = vadd.f32 %v2111_v63, %v2055_v61  ;;  %v2112_v11 = vpop.f32.mrb[46].mxu1  ;;  %v2057_v12 = vpop.f32.mrb[47].mxu0  ;;  %1166 = vmatprep.mubr.f32.mxu0 %v3469_v7  ;;  %1279 = vmatprep.mubr.f32.mxu1 %v3469_v7 }
 0x208   : > { %v2058_v38 = vadd.f32 %v2057_v12, %v2056_v6  ;;  %v2113_v15 = vpop.f32.mrb[47].mxu1 }
 0x209   : > { %v2322_v40 = vpop.eup %2321  ;;  %v1046_v19 = vadd.f32 1e-05, %v1038_v8  ;;  %v1031_v37 = vsub.f32 %v1009_v10, %v1023_v56  ;;  %v2114_v41 = vadd.f32 %v2113_v15, %v2112_v11 }
 0x20a   : > { %1829 = vmatmul.mubr.msk.f32.gmra.mrb[52].mxu0 %vm1065_vm1, %v2322_v40  ;;  %1837 = vmatmul.mubr.msk.f32.gmra.mrb[52].mxu1 %vm1065_vm1, %v2322_v40  ;;  %v1318_v13 = vmul.f32 %v2322_v40, %v3089_v42 }
 0x20b   : > { %2327 = vrsqrt.f32 %v1046_v19  ;;  %v1039_v49 = vmax.f32 %v1031_v37, 0.0  ;;  %v1014_v50 = vadd.f32 %v2114_v41, %v2058_v38  ;;  %1172 = vmatprep.mubr.f32.mxu0 %v3469_v7  ;;  %1285 = vmatprep.mubr.f32.mxu1 %v3469_v7 }
 0x20d   : > { %v2324_v52 = vpop.eup %2323  ;;  %v1047_v57 = vadd.f32 1e-05, %v1039_v49  ;;  %v1032_v61 = vsub.f32 %v1014_v50, %v1024_v47 }
 0x20e   : > { %1830 = vmatmul.mubr.msk.f32.gmra.mrb[54].mxu0 %vm1065_vm1, %v2324_v52  ;;  %1838 = vmatmul.mubr.msk.f32.gmra.mrb[54].mxu1 %vm1065_vm1, %v2324_v52  ;;  %v1319_v62 = vmul.f32 %v2324_v52, %v3091_v55 }
 0x20f   : > { %2329 = vrsqrt.f32 %v1047_v57  ;;  %v1040_v42 = vmax.f32 %v1032_v61, 0.0  ;;  %1178 = vmatprep.mubr.f32.mxu0 %v3469_v7  ;;  %1291 = vmatprep.mubr.f32.mxu1 %v3469_v7 }
 0x211   : > { %v2326_v2 = vpop.eup %2325  ;;  %v1048_v59 = vadd.f32 1e-05, %v1040_v42 }
 0x212   : > { %1831 = vmatmul.mubr.msk.f32.gmra.mrb[56].mxu0 %vm1065_vm1, %v2326_v2  ;;  %1839 = vmatmul.mubr.msk.f32.gmra.mrb[56].mxu1 %vm1065_vm1, %v2326_v2  ;;  %v1320_v5 = vmul.f32 %v2326_v2, %v3093_v0 }
 0x213   : > { %2331 = vrsqrt.f32 %v1048_v59  ;;  %1184 = vmatprep.mubr.f32.mxu0 %v3469_v7  ;;  %1297 = vmatprep.mubr.f32.mxu1 %v3469_v7 }
 0x215   : > { %v2328_v55 = vpop.eup %2327 }
 0x216   : > { %1832 = vmatmul.mubr.msk.f32.gmra.mrb[58].mxu0 %vm1065_vm1, %v2328_v55  ;;  %1840 = vmatmul.mubr.msk.f32.gmra.mrb[58].mxu1 %vm1065_vm1, %v2328_v55  ;;  %v1321_v63 = vmul.f32 %v2328_v55, %v3095_v14 }
 0x217   : > { %1190 = vmatprep.mubr.f32.mxu0 %v3469_v7  ;;  %1303 = vmatprep.mubr.f32.mxu1 %v3469_v7 }
 0x219   : > { %v2330_v6 = vpop.eup %2329 }
 0x21a   : > { %1833 = vmatmul.mubr.msk.f32.gmra.mrb[60].mxu0 %vm1065_vm1, %v2330_v6  ;;  %1841 = vmatmul.mubr.msk.f32.gmra.mrb[60].mxu1 %vm1065_vm1, %v2330_v6  ;;  %v1322_v0 = vmul.f32 %v2330_v6, %v3097_v46 }
 0x21b   : > { %1196 = vmatprep.mubr.f32.mxu0 %v3469_v7  ;;  %1309 = vmatprep.mubr.f32.mxu1 %v3469_v7 }
 0x21d   : > { %v2332_v56 = vpop.eup %2331 }
 0x21e   : > { %1834 = vmatmul.mubr.msk.f32.gmra.mrb[62].mxu0 %vm1065_vm1, %v2332_v56  ;;  %1842 = vmatmul.mubr.msk.f32.gmra.mrb[62].mxu1 %vm1065_vm1, %v2332_v56  ;;  %v1323_v14 = vmul.f32 %v2332_v56, %v3099_v60 }
 0x21f   : > { %1412 = vmatprep.mubr.f32.mxu0 %v3469_v7  ;;  %1525 = vmatprep.mubr.f32.mxu1 %v3469_v7 }
 0x222   : > { %1843 = vmatmul.mubr.msk.f32.vlgmr.msra.gmra.mrb[64].mxu0 %vm1065_vm1, %v3114_v45  ;;  %1851 = vmatmul.mubr.msk.f32.vlgmr.msra.gmra.mrb[64].mxu1 %vm1065_vm1, %v3114_v45 }
 0x223   : > { %1418 = vmatprep.mubr.f32.mxu0 %v3469_v7  ;;  %1531 = vmatprep.mubr.f32.mxu1 %v3469_v7 }
 0x226   : > { %1844 = vmatmul.mubr.msk.f32.gmra.mrb[66].mxu0 %vm1065_vm1, %v3125_v51  ;;  %1852 = vmatmul.mubr.msk.f32.gmra.mrb[66].mxu1 %vm1065_vm1, %v3125_v51 }
 0x227   : > { %1424 = vmatprep.mubr.f32.mxu0 %v3469_v7  ;;  %1537 = vmatprep.mubr.f32.mxu1 %v3469_v7 }
 0x22a   : > { %1845 = vmatmul.mubr.msk.f32.gmra.mrb[68].mxu0 %vm1065_vm1, %v1318_v13  ;;  %1853 = vmatmul.mubr.msk.f32.gmra.mrb[68].mxu1 %vm1065_vm1, %v1318_v13 }
 0x22b   : > { %1430 = vmatprep.mubr.f32.mxu0 %v3469_v7  ;;  %1543 = vmatprep.mubr.f32.mxu1 %v3469_v7 }
 0x22e   : > { %1846 = vmatmul.mubr.msk.f32.gmra.mrb[70].mxu0 %vm1065_vm1, %v1319_v62  ;;  %1854 = vmatmul.mubr.msk.f32.gmra.mrb[70].mxu1 %vm1065_vm1, %v1319_v62 }
 0x22f   : > { %1436 = vmatprep.mubr.f32.mxu0 %v3469_v7  ;;  %1549 = vmatprep.mubr.f32.mxu1 %v3469_v7 }
 0x232   : > { %1847 = vmatmul.mubr.msk.f32.gmra.mrb[72].mxu0 %vm1065_vm1, %v1320_v5  ;;  %1855 = vmatmul.mubr.msk.f32.gmra.mrb[72].mxu1 %vm1065_vm1, %v1320_v5 }
 0x233   : > { %1442 = vmatprep.mubr.f32.mxu0 %v3469_v7  ;;  %1555 = vmatprep.mubr.f32.mxu1 %v3469_v7 }
 0x236   : > { %1848 = vmatmul.mubr.msk.f32.gmra.mrb[74].mxu0 %vm1065_vm1, %v1321_v63  ;;  %1856 = vmatmul.mubr.msk.f32.gmra.mrb[74].mxu1 %vm1065_vm1, %v1321_v63 }
 0x237   : > { %1448 = vmatprep.mubr.f32.mxu0 %v3469_v7  ;;  %1561 = vmatprep.mubr.f32.mxu1 %v3469_v7 }
 0x23a   : > { %1849 = vmatmul.mubr.msk.f32.gmra.mrb[76].mxu0 %vm1065_vm1, %v1322_v0  ;;  %1857 = vmatmul.mubr.msk.f32.gmra.mrb[76].mxu1 %vm1065_vm1, %v1322_v0 }
 0x23b   : > { %1454 = vmatprep.mubr.f32.mxu0 %v3469_v7  ;;  %1567 = vmatprep.mubr.f32.mxu1 %v3469_v7 }
 0x23e   : > { %1850 = vmatmul.mubr.msk.f32.gmra.mrb[78].mxu0 %vm1065_vm1, %v1323_v14  ;;  %1858 = vmatmul.mubr.msk.f32.gmra.mrb[78].mxu1 %vm1065_vm1, %v1323_v14 }
 0x2d5   : > { %v1156_v46 = vpop.f32.mrb[48].mxu0  ;;  %v1269_v60 = vpop.f32.mrb[48].mxu1 }
 0x2d6   : > { %v3198_v45 = vmul.f32 %v1156_v46, %v2863_v20  ;;  %v3201_v51 = vmul.f32 %v1269_v60, %v2865_v21  ;;  %v1158_v8 = vpop.f32.mrb[49].mxu0  ;;  %v1271_v10 = vpop.f32.mrb[49].mxu1 }
 0x2d7   : > { %v3204_v11 = vmul.f32 %v1158_v8, %v2867_v23  ;;  %v3207_v12 = vmul.f32 %v1271_v10, %v2869_v24 }
 0x2d9   : > { %v1162_v7 = vpop.f32.mrb[50].mxu0  ;;  %v1275_v38 = vpop.f32.mrb[50].mxu1 }
 0x2da   : > { %v3210_v15 = vmul.f32 %v1162_v7, %v2876_v27  ;;  %v3213_v40 = vmul.f32 %v1275_v38, %v2879_v30  ;;  %v1164_v20 = vpop.f32.mrb[51].mxu0  ;;  %v1277_v19 = vpop.f32.mrb[51].mxu1 }
 0x2db   : > { %v3216_v21 = vmul.f32 %v1164_v20, %v2881_v25  ;;  %v3219_v37 = vmul.f32 %v1277_v19, %v2884_v26 }
 0x2dd   : > { %v1168_v23 = vpop.f32.mrb[52].mxu0  ;;  %v1281_v41 = vpop.f32.mrb[52].mxu1 }
 0x2de   : > { %v3222_v24 = vmul.f32 %v1168_v23, %v2892_v35  ;;  %v3225_v13 = vmul.f32 %v1281_v41, %v2895_v39  ;;  %v1170_v27 = vpop.f32.mrb[53].mxu0  ;;  %v1283_v47 = vpop.f32.mrb[53].mxu1  ;;  %v3470_v41 = vld [vmem:[#allocation5_spill] sm:$0xff] }
 0x2df   : > { %v3228_v30 = vmul.f32 %v1170_v27, %v2897_v43  ;;  %v3231_v49 = vmul.f32 %v1283_v47, %v2900_v28 }
 0x2e1   : > { %v1174_v25 = vpop.f32.mrb[54].mxu0  ;;  %v1287_v50 = vpop.f32.mrb[54].mxu1 }
 0x2e2   : > { %v3234_v26 = vmul.f32 %v1174_v25, %v2908_v44  ;;  %v3237_v52 = vmul.f32 %v1287_v50, %v2911_v48  ;;  %v1176_v35 = vpop.f32.mrb[55].mxu0  ;;  %v1289_v57 = vpop.f32.mrb[55].mxu1 }
 0x2e3   : > { %v3240_v39 = vmul.f32 %v1176_v35, %v2913_v53  ;;  %v3243_v61 = vmul.f32 %v1289_v57, %v2916_v54  ;;  %v1640_v53 = vlaneseq }
 0x2e5   : > { %v1180_v43 = vpop.f32.mrb[56].mxu0  ;;  %v1293_v62 = vpop.f32.mrb[56].mxu1 }
 0x2e6   : > { %v3246_v28 = vmul.f32 %v1180_v43, %v2924_v58  ;;  %v3249_v42 = vmul.f32 %v1293_v62, %v2927_v1  ;;  %v1182_v44 = vpop.f32.mrb[57].mxu0  ;;  %v1295_v2 = vpop.f32.mrb[57].mxu1 }
 0x2e7   : > { %v3252_v48 = vmul.f32 %v1182_v44, %v2929_v3  ;;  %v3255_v59 = vmul.f32 %v1295_v2, %v2932_v4  ;;  %v1641_v4 = vshrl.u32 %v1640_v53, 7 }
 0x2e9   : > { %v1186_v5 = vpop.f32.mrb[58].mxu0  ;;  %v1299_v54 = vpop.f32.mrb[58].mxu1  ;;  %v1650_v8 = vsub.s32 2, %v1641_v4  ;;  %v1654_v38 = vsub.s32 3, %v1641_v4 }
 0x2ea   : > { %v3258_v55 = vmul.f32 %v1186_v5, %v2940_v9  ;;  %v3261_v58 = vmul.f32 %v1299_v54, %v2943_v16  ;;  %v1188_v1 = vpop.f32.mrb[59].mxu0  ;;  %v1301_v63 = vpop.f32.mrb[59].mxu1 }
 0x2eb   : > { %v3264_v6 = vmul.f32 %v1188_v1, %v2945_v17  ;;  %v3267_v3 = vmul.f32 %v1301_v63, %v2948_v18  ;;  %v1642_v18 = vsub.s32 0, %v1641_v4 }
 0x2ed   : > { %v1192_v0 = vpop.f32.mrb[60].mxu0  ;;  %v1305_v56 = vpop.f32.mrb[60].mxu1 }
 0x2ee   : > { %v3270_v14 = vmul.f32 %v1192_v0, %v2956_v22  ;;  %v3273_v9 = vmul.f32 %v1305_v56, %v2959_v29  ;;  %v1194_v46 = vpop.f32.mrb[61].mxu0  ;;  %v1307_v16 = vpop.f32.mrb[61].mxu1  ;;  %v1638_v22 = vld [vmem:[%s3461_s4] sm:$0xf]  ;;  %v1646_v29 = vsub.s32 1, %v1641_v4 }
 0x2ef   : > { %v3276_v60 = vmul.f32 %v1194_v46, %v2961_v31  ;;  %v3279_v17 = vmul.f32 %v1307_v16, %v2964_v32  ;;  %v3299_v47 = vrot.slane %v1638_v22, %v1642_v18  ;;  %v3301_v25 = vrot.slane %v1638_v22, %v1650_v8 }
 0x2f0   : > { %v3303_v35 = vrot.slane %v1638_v22, %v1646_v29 }
 0x2f1   : > { %v1198_v10 = vpop.f32.mrb[62].mxu0  ;;  %v1311_v7 = vpop.f32.mrb[62].mxu1 }
 0x2f2   : > { %v3286_v20 = vmul.f32 %v1198_v10, %v2972_v33  ;;  %v3289_v31 = vmul.f32 %v1311_v7, %v2975_v34  ;;  %v1200_v19 = vpop.f32.mrb[63].mxu0  ;;  %v1313_v32 = vpop.f32.mrb[63].mxu1  ;;  %v3305_v34 = vrot.slane %v1638_v22, %v1654_v38 }
 0x2f3   : > { %v3292_v23 = vmul.f32 %v1200_v19, %v2977_v36  ;;  %v3295_v27 = vmul.f32 %v1313_v32, %v3470_v41 }
 0x2f5   : > { %v1414_v50 = vpop.f32.mrb[64].mxu0  ;;  %v1527_v33 = vpop.f32.mrb[64].mxu1 }
 0x2f6   : > { %v1606_v57 = vsub.f32 %v3198_v45, %v1414_v50  ;;  %v1608_v36 = vsub.f32 %v3201_v51, %v1527_v33  ;;  %v1416_v43 = vpop.f32.mrb[65].mxu0  ;;  %v1529_v62 = vpop.f32.mrb[65].mxu1 }
 0x2f7   : > { %v1607_v44 = vsub.f32 %v3204_v11, %v1416_v43  ;;  %v1609_v2 = vsub.f32 %v3207_v12, %v1529_v62 }
 0x2f8   : > { %v1660_v53 = vadd.f32 %v3299_v47, %v1606_v57  ;;  %v1662_v5 = vadd.f32 %v3301_v25, %v1608_v36 }
 0x2f9   : > { %v1661_v54 = vadd.f32 %v3303_v35, %v1607_v44  ;;  %v1663_v1 = vadd.f32 %v3305_v34, %v1609_v2  ;;  %v1420_v63 = vpop.f32.mrb[66].mxu0  ;;  %v1533_v4 = vpop.f32.mrb[66].mxu1 }
 0x2fa   : > { %1692 = vst [vmem:[%s3315_s6] sm:$0xff] %v1660_v53  ;;  %1867 = vst [vmem:[%s3315_s6 + $0x10] sm:$0xff] %v1662_v5  ;;  %v1610_v45 = vsub.f32 %v3210_v15, %v1420_v63  ;;  %v1612_v51 = vsub.f32 %v3213_v40, %v1533_v4  ;;  %v1422_v11 = vpop.f32.mrb[67].mxu0  ;;  %v1535_v12 = vpop.f32.mrb[67].mxu1 }
 0x2fb   : > { %1859 = vst [vmem:[%s3315_s6 + $0x8] sm:$0xff] %v1661_v54  ;;  %1875 = vst [vmem:[%s3315_s6 + $0x18] sm:$0xff] %v1663_v1  ;;  %v1611_v0 = vsub.f32 %v3216_v21, %v1422_v11  ;;  %v1613_v56 = vsub.f32 %v3219_v37, %v1535_v12 }
 0x2fc   : > { %v1664_v46 = vadd.f32 %v3299_v47, %v1610_v45  ;;  %v1666_v16 = vadd.f32 %v3301_v25, %v1612_v51 }
 0x2fd   : > { %v1665_v18 = vadd.f32 %v3303_v35, %v1611_v0  ;;  %v1667_v15 = vadd.f32 %v3305_v34, %v1613_v56  ;;  %v1426_v8 = vpop.f32.mrb[68].mxu0  ;;  %v1539_v40 = vpop.f32.mrb[68].mxu1 }
 0x2fe   : > { %1693 = vst [vmem:[%s3315_s6 + $0x20] sm:$0xff] %v1664_v46  ;;  %1868 = vst [vmem:[%s3315_s6 + $0x30] sm:$0xff] %v1666_v16  ;;  %v1614_v10 = vsub.f32 %v3222_v24, %v1426_v8  ;;  %v1616_v21 = vsub.f32 %v3225_v13, %v1539_v40  ;;  %v1428_v7 = vpop.f32.mrb[69].mxu0  ;;  %v1541_v37 = vpop.f32.mrb[69].mxu1 }
 0x2ff   : > { %1860 = vst [vmem:[%s3315_s6 + $0x28] sm:$0xff] %v1665_v18  ;;  %1876 = vst [vmem:[%s3315_s6 + $0x38] sm:$0xff] %v1667_v15  ;;  %v1615_v22 = vsub.f32 %v3228_v30, %v1428_v7  ;;  %v1617_v29 = vsub.f32 %v3231_v49, %v1541_v37 }
 0x300   : > { %v1668_v38 = vadd.f32 %v3299_v47, %v1614_v10  ;;  %v1670_v19 = vadd.f32 %v3301_v25, %v1616_v21 }
 0x301   : > { %v1669_v32 = vadd.f32 %v3303_v35, %v1615_v22  ;;  %v1671_v24 = vadd.f32 %v3305_v34, %v1617_v29  ;;  %v1432_v41 = vpop.f32.mrb[70].mxu0  ;;  %v1545_v13 = vpop.f32.mrb[70].mxu1 }
 0x302   : > { %1694 = vst [vmem:[%s3315_s6 + $0x40] sm:$0xff] %v1668_v38  ;;  %1869 = vst [vmem:[%s3315_s6 + $0x50] sm:$0xff] %v1670_v19  ;;  %v1618_v50 = vsub.f32 %v3234_v26, %v1432_v41  ;;  %v1620_v30 = vsub.f32 %v3237_v52, %v1545_v13  ;;  %v1434_v33 = vpop.f32.mrb[71].mxu0  ;;  %v1547_v49 = vpop.f32.mrb[71].mxu1 }
 0x303   : > { %1861 = vst [vmem:[%s3315_s6 + $0x48] sm:$0xff] %v1669_v32  ;;  %1877 = vst [vmem:[%s3315_s6 + $0x58] sm:$0xff] %v1671_v24  ;;  %v1619_v57 = vsub.f32 %v3240_v39, %v1434_v33  ;;  %v1621_v36 = vsub.f32 %v3243_v61, %v1547_v49 }
 0x304   : > { %v1672_v43 = vadd.f32 %v3299_v47, %v1618_v50  ;;  %v1674_v62 = vadd.f32 %v3301_v25, %v1620_v30 }
 0x305   : > { %v1673_v44 = vadd.f32 %v3303_v35, %v1619_v57  ;;  %v1675_v26 = vadd.f32 %v3305_v34, %v1621_v36  ;;  %v1438_v2 = vpop.f32.mrb[72].mxu0  ;;  %v1551_v52 = vpop.f32.mrb[72].mxu1 }
 0x306   : > { %1695 = vst [vmem:[%s3315_s6 + $0x60] sm:$0xff] %v1672_v43  ;;  %1870 = vst [vmem:[%s3315_s6 + $0x70] sm:$0xff] %v1674_v62  ;;  %v1622_v53 = vsub.f32 %v3246_v28, %v1438_v2  ;;  %v1624_v39 = vsub.f32 %v3249_v42, %v1551_v52  ;;  %v1440_v5 = vpop.f32.mrb[73].mxu0  ;;  %v1553_v61 = vpop.f32.mrb[73].mxu1 }
 0x307   : > { %1862 = vst [vmem:[%s3315_s6 + $0x68] sm:$0xff] %v1673_v44  ;;  %1878 = vst [vmem:[%s3315_s6 + $0x78] sm:$0xff] %v1675_v26  ;;  %v1623_v54 = vsub.f32 %v3252_v48, %v1440_v5  ;;  %v1625_v1 = vsub.f32 %v3255_v59, %v1553_v61 }
 0x308   : > { %v1676_v63 = vadd.f32 %v3299_v47, %v1622_v53  ;;  %v1678_v4 = vadd.f32 %v3301_v25, %v1624_v39 }
 0x309   : > { %v1677_v45 = vadd.f32 %v3303_v35, %v1623_v54  ;;  %v1679_v28 = vadd.f32 %v3305_v34, %v1625_v1  ;;  %v1444_v51 = vpop.f32.mrb[74].mxu0  ;;  %v1557_v42 = vpop.f32.mrb[74].mxu1 }
 0x30a   : > { %1696 = vst [vmem:[%s3315_s6 + $0x80] sm:$0xff] %v1676_v63  ;;  %1871 = vst [vmem:[%s3315_s6 + $0x90] sm:$0xff] %v1678_v4  ;;  %v1626_v11 = vsub.f32 %v3258_v55, %v1444_v51  ;;  %v1628_v48 = vsub.f32 %v3261_v58, %v1557_v42  ;;  %v1446_v12 = vpop.f32.mrb[75].mxu0  ;;  %v1559_v59 = vpop.f32.mrb[75].mxu1 }
 0x30b   : > { %1863 = vst [vmem:[%s3315_s6 + $0x88] sm:$0xff] %v1677_v45  ;;  %1879 = vst [vmem:[%s3315_s6 + $0x98] sm:$0xff] %v1679_v28  ;;  %v1627_v0 = vsub.f32 %v3264_v6, %v1446_v12  ;;  %v1629_v56 = vsub.f32 %v3267_v3, %v1559_v59 }
 0x30c   : > { %v1680_v46 = vadd.f32 %v3299_v47, %v1626_v11  ;;  %v1682_v16 = vadd.f32 %v3301_v25, %v1628_v48 }
 0x30d   : > { %v1681_v18 = vadd.f32 %v3303_v35, %v1627_v0  ;;  %v1683_v55 = vadd.f32 %v3305_v34, %v1629_v56  ;;  %v1450_v15 = vpop.f32.mrb[76].mxu0  ;;  %v1563_v58 = vpop.f32.mrb[76].mxu1 }
 0x30e   : > { %1697 = vst [vmem:[%s3315_s6 + $0xa0] sm:$0xff] %v1680_v46  ;;  %1872 = vst [vmem:[%s3315_s6 + $0xb0] sm:$0xff] %v1682_v16  ;;  %v1630_v8 = vsub.f32 %v3270_v14, %v1450_v15  ;;  %v1632_v6 = vsub.f32 %v3273_v9, %v1563_v58  ;;  %v1452_v3 = vpop.f32.mrb[77].mxu0  ;;  %v1565_v40 = vpop.f32.mrb[77].mxu1 }
 0x30f   : > { %1864 = vst [vmem:[%s3315_s6 + $0xa8] sm:$0xff] %v1681_v18  ;;  %1880 = vst [vmem:[%s3315_s6 + $0xb8] sm:$0xff] %v1683_v55  ;;  %v1631_v10 = vsub.f32 %v3276_v60, %v1452_v3  ;;  %v1633_v21 = vsub.f32 %v3279_v17, %v1565_v40 }
 0x310   : > { %v1684_v7 = vadd.f32 %v3299_v47, %v1630_v8  ;;  %v1686_v37 = vadd.f32 %v3301_v25, %v1632_v6 }
 0x311   : > { %v1685_v14 = vadd.f32 %v3303_v35, %v1631_v10  ;;  %v1687_v22 = vadd.f32 %v3305_v34, %v1633_v21  ;;  %v1456_v9 = vpop.f32.mrb[78].mxu0  ;;  %v1569_v29 = vpop.f32.mrb[78].mxu1 }
 0x312   : > { %1698 = vst [vmem:[%s3315_s6 + $0xc0] sm:$0xff] %v1684_v7  ;;  %1873 = vst [vmem:[%s3315_s6 + $0xd0] sm:$0xff] %v1686_v37  ;;  %v1634_v60 = vsub.f32 %v3286_v20, %v1456_v9  ;;  %v1636_v17 = vsub.f32 %v3289_v31, %v1569_v29  ;;  %v1458_v38 = vpop.f32.mrb[79].mxu0  ;;  %v1571_v19 = vpop.f32.mrb[79].mxu1 }
 0x313   : > { %1865 = vst [vmem:[%s3315_s6 + $0xc8] sm:$0xff] %v1685_v14  ;;  %1881 = vst [vmem:[%s3315_s6 + $0xd8] sm:$0xff] %v1687_v22  ;;  %v1635_v32 = vsub.f32 %v3292_v23, %v1458_v38  ;;  %v1637_v24 = vsub.f32 %v3295_v27, %v1571_v19 }
 0x314   : > { %v1688_v41 = vadd.f32 %v3299_v47, %v1634_v60  ;;  %v1690_v13 = vadd.f32 %v3301_v25, %v1636_v17 }
 0x315   : > { %v1689_v20 = vadd.f32 %v3303_v35, %v1635_v32  ;;  %v1691_v31 = vadd.f32 %v3305_v34, %v1637_v24 }
 0x316   : > { %1699 = vst [vmem:[%s3315_s6 + $0xe0] sm:$0xff] %v1688_v41  ;;  %1874 = vst [vmem:[%s3315_s6 + $0xf0] sm:$0xff] %v1690_v13 }
 0x317   : > { %1866 = vst [vmem:[%s3315_s6 + $0xe8] sm:$0xff] %v1689_v20  ;;  %1882 = vst [vmem:[%s3315_s6 + $0xf8] sm:$0xff] %v1691_v31 }
 0x318   : > { %2346 = shalt.err (!%p2343_p3)
}
 0x319   : > { %s2347_s17 = scalar_lea.hbm %s3404_s10, 4096  ;;  %s2351_s25 = scalar_lea.hbm %s3462_s5, 8192 }
 0x31a   : > { %p2348_p4 = scmp.ne.s32.totalorder %s3404_s10, %s2347_s17  ;;  %p2352_p9 = scmp.lt.u32.totalorder %s3404_s10, %s3462_s5 }
 0x31b   : > { %p2353_p10 = scmp.lt.u32.totalorder %s2351_s25, %s2347_s17  ;;  %p2355_p12 = scmp.lt.u32.totalorder %s2347_s17, %s3404_s10 }
 0x31c   : > { %p2349_p7 = pnand %p2348_p4, %p2469_p5 }
 0x31d   : > { %p2354_p11 = por %p2353_p10, %p2352_p9 }
 0x31e   : > { %p2350_p8 = pneg %p2349_p7 }
 0x31f   : > { %p2356_p13 = por %p2355_p12, %p2354_p11 }
 0x321   : > { %p2357_p0 = pnand %p2356_p13, %p2350_p8 }
 0x323   : > { %2360 = shalt.err (!%p2357_p0)
}
 0x324   : > { %s2399_s6 = smov 128   ;;  %s2400_s7 = smov 8  }
 0x325   : > { %2275 = dma.vmem_to_hbm [thread:$0]  (%p2469_p5), %s3406_s8, 4096, %s3404_s10, %s3416_s12, %s2399_s6, %s2399_s6, %s2400_s7  }
 0x326 PF: > { %p2281_p1 = scmp.ge.s32.totalorder %s2395_s21, 2  ;;  %s1757_s22 = sand.u32 1, %s2383_s18  }
 0x327   : > { %s1758_s9 = scalar_lea.sflag [#allocation3], %s1757_s22 }
 0x328   : > { %p2278_p2 = pnand %p2281_p1, %p2473_p6 }
 0x32a   : > { %2378 = dma.done.wait (!%p2278_p2), %s1758_s9, 4096  }
 0x32b   : > { %2380 = vsyncadd (!%p2278_p2), %s1758_s9, 4294963200  ;;  %p15_p3 = scmp.ge.s32.totalorder %s2456_s24, 4   ;;  %s3471_s18 = smov %s2387_s19 }
 0x32c   : > { %s3472_s19 = smov %s2391_s20  ;;  %s3473_s20 = smov %s2467_s27 }
 0x32d   : > { %s3474_s21 = smov %s2456_s24  ;;  %17 = sbr.rel (!%p15_p3) target bundleno = 3 (0x3), region = 78 }
 0x334   :  { %1763 = vsyncpa [#allocation3], 1 }
 0x335   :  { %1765 = vsyncpa [#allocation3 + $0x1], 1 }

</bundles_post_ra>
